<compile_context>
chip_gen: v5e
topology: v5e:2x2
jax: 0.10.0
libtpu: 0.0.40
codegen_flags: <defaults>
</compile_context>

<pallas_src>
import functools
import math

import jax
import jax.numpy as jnp
from jax.experimental import pallas as pl

LN_EPS = 1e-5


# ---------------------------------------------------------------------------
# In-kernel building blocks (operate on plain jnp values loaded from refs)
# ---------------------------------------------------------------------------
def _layer_norm(x, gamma, beta):
    mu = jnp.mean(x, axis=-1, keepdims=True)
    var = jnp.mean((x - mu) ** 2, axis=-1, keepdims=True)
    return (x - mu) * jax.lax.rsqrt(var + LN_EPS) * gamma + beta


def _ffn(x, w1, b1, w2, b2):
    h = jnp.dot(x, w1, preferred_element_type=jnp.float32) + b1
    h = jax.nn.silu(h)  # FFNActivation.SILU
    return jnp.dot(h, w2, preferred_element_type=jnp.float32) + b2


def _mha_heads(q3, k3, v3, wo, num_heads, hd):
    """Multi-head attention core with head-batched einsums.

    q3: [S, Nq, D] (scale already folded into the q projection)
    k3, v3: [S, Nk, D];  wo: [D, D]
    Returns the output projection (without bias): [S*Nq, D].
    Per-head results are folded straight into the output projection via
    sublane row-slices of wo (no lane-wise concatenate).
    """
    S, Nq, D = q3.shape
    acc = jnp.zeros((S * Nq, D), jnp.float32)
    for h in range(num_heads):  # static, small head count
        sl = slice(h * hd, (h + 1) * hd)
        qh = q3[..., sl]
        kh = k3[..., sl]
        vh = v3[..., sl]
        s = jnp.einsum("bnd,bmd->bnm", qh, kh, preferred_element_type=jnp.float32)
        s = s - jnp.max(s, axis=-1, keepdims=True)
        p = jnp.exp(s)
        p = p / jnp.sum(p, axis=-1, keepdims=True)
        oh = jnp.einsum("bnm,bmd->bnd", p, vh, preferred_element_type=jnp.float32)
        acc = acc + jnp.dot(oh.reshape(S * Nq, hd), wo[sl, :],
                            preferred_element_type=jnp.float32)
    return acc


# ---------------------------------------------------------------------------
# Fused kernel: LN -> self-MHA -> FFN (x & v stacked) -> cross-MHA -> FFN
# ---------------------------------------------------------------------------
def impgtno_block_kernel(xv_ref, q_ref,
                         lng_ref, lnb_ref,
                         wqkv_ref, bqkv_ref, wo_ref, bo_ref,
                         f1w_ref, f1b_ref, f2w_ref, f2b_ref,
                         cwq_ref, cbq_ref, cwkv_ref, cbkv_ref, cwo_ref, cbo_ref,
                         x_out_ref, v_out_ref,
                         *, B, N, D, num_heads):
    hd = D // num_heads
    SB = 2 * B           # stacked sequences: (b, {x, v})
    M = SB * N            # total rows

    # ---- stage 1: pre-norm + shared self-attention + residual + FFN -------
    xv = xv_ref[...]                                        # [2B, N, D]
    xn = _layer_norm(xv, lng_ref[...], lnb_ref[...])        # pre_norm
    xn_flat = xn.reshape(M, D)

    qkv = jnp.dot(xn_flat, wqkv_ref[...],
                  preferred_element_type=jnp.float32) + bqkv_ref[...]   # [M, 3D]
    q3 = qkv[:, :D].reshape(SB, N, D)
    k3 = qkv[:, D:2 * D].reshape(SB, N, D)
    v3 = qkv[:, 2 * D:].reshape(SB, N, D)

    attn = _mha_heads(q3, k3, v3, wo_ref[...], num_heads, hd) + bo_ref[...]
    y = xn_flat + attn                                      # residual on normed input
    xv_after = _ffn(y, f1w_ref[...], f1b_ref[...],
                    f2w_ref[...], f2b_ref[...])             # [M, D]

    xv_b = xv_after.reshape(B, 2 * N, D)                    # per-batch [x0 ; v0] rows
    x_after = xv_b[:, :N, :]                                # [B, N, D]
    v_out_ref[...] = xv_b[:, N:, :]                         # v_0 output

    # ---- stage 2: heterogeneous cross attention (QHCA) + residual + FFN ---
    qd = q_ref[...].reshape(B * N, D)
    qc = (jnp.dot(qd, cwq_ref[...], preferred_element_type=jnp.float32)
          + cbq_ref[...]).reshape(B, N, D)
    kvc = jnp.dot(xv_after, cwkv_ref[...],
                  preferred_element_type=jnp.float32) + cbkv_ref[...]   # [M, 2D]
    kc = kvc[:, :D].reshape(B, 2 * N, D)                    # already "concat([x0, v0])"
    vc = kvc[:, D:].reshape(B, 2 * N, D)

    cattn = _mha_heads(qc, kc, vc, cwo_ref[...], num_heads, hd) + cbo_ref[...]
    hx = x_after.reshape(B * N, D) + cattn
    x_final = _ffn(hx, f1w_ref[...], f1b_ref[...], f2w_ref[...], f2b_ref[...])
    x_out_ref[...] = x_final.reshape(B, N, D)


# ---------------------------------------------------------------------------
# Wrapper
# ---------------------------------------------------------------------------
@functools.partial(jax.jit, static_argnames=("num_heads",))
def impgtno_block_forward(batch, q_data, params, num_heads):
    """Pallas implementation of IMPGTNOBlock.forward (SplitInputMHA + QHCA path)."""
    x0 = batch["x_0"]
    v0 = batch["v_0"]
    B, N, D = x0.shape
    hd = D // num_heads
    scale = 1.0 / math.sqrt(hd)

    # Stack x_0 / v_0 per batch element: row order (b, {x, v}, n).
    xv = jnp.stack([x0, v0], axis=1).reshape(2 * B, N, D)

    # Host-side weight fusion: QKV / KV concat + 1/sqrt(hd) folded into Wq, bq.
    wqkv = jnp.concatenate(
        [params["mha_wq"] * scale, params["mha_wk"], params["mha_wv"]], axis=1)
    bqkv = jnp.concatenate(
        [params["mha_bq"] * scale, params["mha_bk"], params["mha_bv"]], axis=1)
    cwkv = jnp.concatenate([params["hca_wk"], params["hca_wv"]], axis=1)
    cbkv = jnp.concatenate([params["hca_bk"], params["hca_bv"]], axis=1)

    args = (
        xv, q_data,
        params["ln_g"], params["ln_b"],
        wqkv, bqkv, params["mha_wo"], params["mha_bo"],
        params["ffn_w1"], params["ffn_b1"], params["ffn_w2"], params["ffn_b2"],
        params["hca_wq"] * scale, params["hca_bq"] * scale,
        cwkv, cbkv, params["hca_wo"], params["hca_bo"],
    )

    # Whole problem (<100 KiB resident) in one kernel invocation: no grid,
    # every operand fully resident in VMEM, single launch, single writeback.
    x_out, v_out = pl.pallas_call(
        functools.partial(impgtno_block_kernel, B=B, N=N, D=D,
                          num_heads=num_heads),
        out_shape=(jax.ShapeDtypeStruct((B, N, D), jnp.float32),
                   jax.ShapeDtypeStruct((B, N, D), jnp.float32)),
    )(*args)

    out = dict(batch)
    out["x_0"] = x_out
    out["v_0"] = v_out
    return out


# ---------------------------------------------------------------------------
# Deterministic parameter construction + pure-JAX reference
# ---------------------------------------------------------------------------
def make_params(key, D):
    ks = jax.random.split(key, 24)
    g = lambda k, shape: (0.02 * jax.random.normal(k, shape)).astype(jnp.float32)
    return {
        "ln_g": jnp.ones((1, D), jnp.float32),
        "ln_b": jnp.zeros((1, D), jnp.float32),
        # graph self-attention (SplitInputMHA) projections, [in, out]
        "mha_wq": g(ks[0], (D, D)), "mha_bq": g(ks[1], (1, D)),
        "mha_wk": g(ks[2], (D, D)), "mha_bk": g(ks[3], (1, D)),
        "mha_wv": g(ks[4], (D, D)), "mha_bv": g(ks[5], (1, D)),
        "mha_wo": g(ks[6], (D, D)), "mha_bo": g(ks[7], (1, D)),
        # shared FFN (Linear -> SiLU -> Linear)
        "ffn_w1": g(ks[8], (D, D)), "ffn_b1": g(ks[9], (1, D)),
        "ffn_w2": g(ks[10], (D, D)), "ffn_b2": g(ks[11], (1, D)),
        # heterogeneous cross-attention (QHCA) projections
        "hca_wq": g(ks[12], (D, D)), "hca_bq": g(ks[13], (1, D)),
        "hca_wk": g(ks[14], (D, D)), "hca_bk": g(ks[15], (1, D)),
        "hca_wv": g(ks[16], (D, D)), "hca_bv": g(ks[17], (1, D)),
        "hca_wo": g(ks[18], (D, D)), "hca_bo": g(ks[19], (1, D)),
    }


def reference_forward(batch, q_data, p, num_heads):
    D = batch["x_0"].shape[-1]
    hd = D // num_heads
    scale = 1.0 / math.sqrt(hd)

    def ln(x):
        mu = jnp.mean(x, axis=-1, keepdims=True)
        var = jnp.mean((x - mu) ** 2, axis=-1, keepdims=True)
        return (x - mu) * jax.lax.rsqrt(var + LN_EPS) * p["ln_g"][0] + p["ln_b"][0]

    def mha(q_in, kv_in, pre):
        q = q_in @ p[pre + "_wq"] + p[pre + "_bq"][0]
        k = kv_in @ p[pre + "_wk"] + p[pre + "_bk"][0]
        v = kv_in @ p[pre + "_wv"] + p[pre + "_bv"][0]

        def split(t):
            b_, s_, _ = t.shape
            return t.reshape(b_, s_, num_heads, hd).transpose(0, 2, 1, 3)

        qh, kh, vh = split(q), split(k), split(v)
        s = jnp.einsum("bhnd,bhmd->bhnm", qh, kh) * scale
        a = jax.nn.softmax(s, axis=-1)
        o = jnp.einsum("bhnm,bhmd->bhnd", a, vh)
        o = o.transpose(0, 2, 1, 3).reshape(q_in.shape)
        return o @ p[pre + "_wo"] + p[pre + "_bo"][0]

    def ffn(x):
        h = x @ p["ffn_w1"] + p["ffn_b1"][0]
        return jax.nn.silu(h) @ p["ffn_w2"] + p["ffn_b2"][0]

    x0 = ln(batch["x_0"])
    v0 = ln(batch["v_0"])
    x0 = ffn(x0 + mha(x0, x0, "mha"))
    v0 = ffn(v0 + mha(v0, v0, "mha"))
    kv = jnp.concatenate([x0, v0], axis=1)
    x0 = ffn(x0 + mha(q_data, kv, "hca"))
    return {"x_0": x0, "v_0": v0}


if __name__ == "__main__":
    B, N, D, H = 2, 16, 32, 4  # batch, nodes, lifting_dim, num_heads

    key = jax.random.PRNGKey(0)
    kx, kvel, kq, kp = jax.random.split(key, 4)
    batch = {
        "x_0": jax.random.normal(kx, (B, N, D), jnp.float32),
        "v_0": jax.random.normal(kvel, (B, N, D), jnp.float32),
    }
    q_data = jax.random.normal(kq, (B, N, D), jnp.float32)
    params = make_params(kp, D)

    out = impgtno_block_forward(batch, q_data, params, num_heads=H)
    out = jax.tree_util.tree_map(jax.block_until_ready, out)

    ref = reference_forward(batch, q_data, params, H)
    assert jnp.allclose(out["x_0"], ref["x_0"], atol=1e-4, rtol=1e-4), (
        float(jnp.max(jnp.abs(out["x_0"] - ref["x_0"]))))
    assert jnp.allclose(out["v_0"], ref["v_0"], atol=1e-4, rtol=1e-4), (
        float(jnp.max(jnp.abs(out["v_0"] - ref["v_0"]))))

    print("KERNEL_OK")
</pallas_src>

<mosaic_0001>
module attributes {stable_mosaic.version = 11 : i64} {
  func.func @impgtno_block_kernel(%arg0: memref<4x16x32xf32, #tpu.memory_space<vmem>>, %arg1: memref<2x16x32xf32, #tpu.memory_space<vmem>>, %arg2: memref<1x32xf32, #tpu.memory_space<vmem>>, %arg3: memref<1x32xf32, #tpu.memory_space<vmem>>, %arg4: memref<32x96xf32, #tpu.memory_space<vmem>>, %arg5: memref<1x96xf32, #tpu.memory_space<vmem>>, %arg6: memref<32x32xf32, #tpu.memory_space<vmem>>, %arg7: memref<1x32xf32, #tpu.memory_space<vmem>>, %arg8: memref<32x32xf32, #tpu.memory_space<vmem>>, %arg9: memref<1x32xf32, #tpu.memory_space<vmem>>, %arg10: memref<32x32xf32, #tpu.memory_space<vmem>>, %arg11: memref<1x32xf32, #tpu.memory_space<vmem>>, %arg12: memref<32x32xf32, #tpu.memory_space<vmem>>, %arg13: memref<1x32xf32, #tpu.memory_space<vmem>>, %arg14: memref<32x64xf32, #tpu.memory_space<vmem>>, %arg15: memref<1x64xf32, #tpu.memory_space<vmem>>, %arg16: memref<32x32xf32, #tpu.memory_space<vmem>>, %arg17: memref<1x32xf32, #tpu.memory_space<vmem>>, %arg18: memref<2x16x32xf32, #tpu.memory_space<vmem>>, %arg19: memref<2x16x32xf32, #tpu.memory_space<vmem>>) attributes {dimension_semantics = [], scalar_prefetch = 0 : i64, scratch_operands = 0 : i64, tpu.core_type = #tpu.core_type<tc>} {
    %c0 = arith.constant 0 : index
    %c0_0 = arith.constant 0 : index
    %c0_1 = arith.constant 0 : index
    %0 = vector.load %arg0[%c0, %c0_0, %c0_1] : memref<4x16x32xf32, #tpu.memory_space<vmem>>, vector<4x16x32xf32>
    %c0_2 = arith.constant 0 : index
    %c0_3 = arith.constant 0 : index
    %1 = vector.load %arg2[%c0_2, %c0_3] : memref<1x32xf32, #tpu.memory_space<vmem>>, vector<1x32xf32>
    %c0_4 = arith.constant 0 : index
    %c0_5 = arith.constant 0 : index
    %2 = vector.load %arg3[%c0_4, %c0_5] : memref<1x32xf32, #tpu.memory_space<vmem>>, vector<1x32xf32>
    %cst = arith.constant dense<0.000000e+00> : vector<4x16xf32>
    %3 = vector.multi_reduction <add>, %0, %cst [2] : vector<4x16x32xf32> to vector<4x16xf32>
    %4 = vector.shape_cast %3 : vector<4x16xf32> to vector<4x16x1xf32>
    %cst_6 = arith.constant 3.200000e+01 : f32
    %5 = vector.broadcast %cst_6 : f32 to vector<4x16x1xf32>
    %6 = arith.divf %4, %5 : vector<4x16x1xf32>
    %7 = vector.broadcast %6 : vector<4x16x1xf32> to vector<4x16x32xf32>
    %8 = arith.subf %0, %7 : vector<4x16x32xf32>
    %9 = arith.mulf %8, %8 : vector<4x16x32xf32>
    %cst_7 = arith.constant dense<0.000000e+00> : vector<4x16xf32>
    %10 = vector.multi_reduction <add>, %9, %cst_7 [2] : vector<4x16x32xf32> to vector<4x16xf32>
    %11 = vector.shape_cast %10 : vector<4x16xf32> to vector<4x16x1xf32>
    %cst_8 = arith.constant 3.200000e+01 : f32
    %12 = vector.broadcast %cst_8 : f32 to vector<4x16x1xf32>
    %13 = arith.divf %11, %12 : vector<4x16x1xf32>
    %14 = vector.broadcast %6 : vector<4x16x1xf32> to vector<4x16x32xf32>
    %15 = arith.subf %0, %14 : vector<4x16x32xf32>
    %cst_9 = arith.constant 9.99999974E-6 : f32
    %16 = vector.broadcast %cst_9 : f32 to vector<4x16x1xf32>
    %17 = arith.addf %13, %16 : vector<4x16x1xf32>
    %18 = math.rsqrt %17 : vector<4x16x1xf32>
    %19 = vector.broadcast %18 : vector<4x16x1xf32> to vector<4x16x32xf32>
    %20 = arith.mulf %15, %19 : vector<4x16x32xf32>
    %21 = vector.shape_cast %1 : vector<1x32xf32> to vector<1x1x32xf32>
    %22 = vector.broadcast %21 : vector<1x1x32xf32> to vector<4x16x32xf32>
    %23 = arith.mulf %20, %22 : vector<4x16x32xf32>
    %24 = vector.shape_cast %2 : vector<1x32xf32> to vector<1x1x32xf32>
    %25 = vector.broadcast %24 : vector<1x1x32xf32> to vector<4x16x32xf32>
    %26 = arith.addf %23, %25 : vector<4x16x32xf32>
    %27 = vector.shape_cast %26 : vector<4x16x32xf32> to vector<64x32xf32>
    %c0_10 = arith.constant 0 : index
    %c0_11 = arith.constant 0 : index
    %28 = vector.load %arg4[%c0_10, %c0_11] : memref<32x96xf32, #tpu.memory_space<vmem>>, vector<32x96xf32>
    %cst_12 = arith.constant dense<0.000000e+00> : vector<64x96xf32>
    %29 = tpu.matmul %27, %28, %cst_12 {dimension_numbers = #tpu.dot_dimension_numbers<[1], [0], [0], [1], [0, 0, 1, 1], [], []>} : vector<64x32xf32>, vector<32x96xf32>, vector<64x96xf32> -> vector<64x96xf32>
    %c0_13 = arith.constant 0 : index
    %c0_14 = arith.constant 0 : index
    %30 = vector.load %arg5[%c0_13, %c0_14] : memref<1x96xf32, #tpu.memory_space<vmem>>, vector<1x96xf32>
    %31 = vector.broadcast %30 : vector<1x96xf32> to vector<64x96xf32>
    %32 = arith.addf %29, %31 : vector<64x96xf32>
    %33 = vector.extract_strided_slice %32 {offsets = [0, 0], sizes = [64, 32], strides = [1, 1]} : vector<64x96xf32> to vector<64x32xf32>
    %34 = vector.shape_cast %33 : vector<64x32xf32> to vector<4x16x32xf32>
    %35 = vector.extract_strided_slice %32 {offsets = [0, 32], sizes = [64, 32], strides = [1, 1]} : vector<64x96xf32> to vector<64x32xf32>
    %36 = vector.shape_cast %35 : vector<64x32xf32> to vector<4x16x32xf32>
    %37 = vector.extract_strided_slice %32 {offsets = [0, 64], sizes = [64, 32], strides = [1, 1]} : vector<64x96xf32> to vector<64x32xf32>
    %38 = vector.shape_cast %37 : vector<64x32xf32> to vector<4x16x32xf32>
    %c0_15 = arith.constant 0 : index
    %c0_16 = arith.constant 0 : index
    %39 = vector.load %arg6[%c0_15, %c0_16] : memref<32x32xf32, #tpu.memory_space<vmem>>, vector<32x32xf32>
    %cst_17 = arith.constant 0.000000e+00 : f32
    %40 = vector.broadcast %cst_17 : f32 to vector<64x32xf32>
    %41 = vector.extract_strided_slice %34 {offsets = [0, 0, 0], sizes = [4, 16, 8], strides = [1, 1, 1]} : vector<4x16x32xf32> to vector<4x16x8xf32>
    %42 = vector.extract_strided_slice %36 {offsets = [0, 0, 0], sizes = [4, 16, 8], strides = [1, 1, 1]} : vector<4x16x32xf32> to vector<4x16x8xf32>
    %43 = vector.extract_strided_slice %38 {offsets = [0, 0, 0], sizes = [4, 16, 8], strides = [1, 1, 1]} : vector<4x16x32xf32> to vector<4x16x8xf32>
    "tpu.trace_start"() <{level = 10 : i32, message = "bnd,bmd->bnm"}> : () -> ()
    %cst_18 = arith.constant dense<0.000000e+00> : vector<4x16x16xf32>
    %44 = tpu.matmul %41, %42, %cst_18 {dimension_numbers = #tpu.dot_dimension_numbers<[2], [2], [1], [1], [0, 0, 0, 1, 1, 1], [0], [0]>} : vector<4x16x8xf32>, vector<4x16x8xf32>, vector<4x16x16xf32> -> vector<4x16x16xf32>
    "tpu.trace_stop"() : () -> ()
    %cst_19 = arith.constant dense<0xFF800000> : vector<4x16xf32>
    %45 = vector.multi_reduction <maximumf>, %44, %cst_19 [2] : vector<4x16x16xf32> to vector<4x16xf32>
    %46 = vector.shape_cast %45 : vector<4x16xf32> to vector<4x16x1xf32>
    %47 = vector.broadcast %46 : vector<4x16x1xf32> to vector<4x16x16xf32>
    %48 = arith.subf %44, %47 : vector<4x16x16xf32>
    %49 = math.exp %48 : vector<4x16x16xf32>
    %cst_20 = arith.constant dense<0.000000e+00> : vector<4x16xf32>
    %50 = vector.multi_reduction <add>, %49, %cst_20 [2] : vector<4x16x16xf32> to vector<4x16xf32>
    %51 = vector.shape_cast %50 : vector<4x16xf32> to vector<4x16x1xf32>
    %52 = vector.broadcast %51 : vector<4x16x1xf32> to vector<4x16x16xf32>
    %53 = arith.divf %49, %52 : vector<4x16x16xf32>
    "tpu.trace_start"() <{level = 10 : i32, message = "bnm,bmd->bnd"}> : () -> ()
    %cst_21 = arith.constant dense<0.000000e+00> : vector<4x16x8xf32>
    %54 = tpu.matmul %53, %43, %cst_21 {dimension_numbers = #tpu.dot_dimension_numbers<[2], [1], [1], [2], [0, 0, 0, 1, 1, 2], [0], [0]>} : vector<4x16x16xf32>, vector<4x16x8xf32>, vector<4x16x8xf32> -> vector<4x16x8xf32>
    "tpu.trace_stop"() : () -> ()
    %55 = vector.shape_cast %54 : vector<4x16x8xf32> to vector<64x8xf32>
    %56 = vector.extract_strided_slice %39 {offsets = [0, 0], sizes = [8, 32], strides = [1, 1]} : vector<32x32xf32> to vector<8x32xf32>
    %cst_22 = arith.constant dense<0.000000e+00> : vector<64x32xf32>
    %57 = tpu.matmul %55, %56, %cst_22 {dimension_numbers = #tpu.dot_dimension_numbers<[1], [0], [0], [1], [0, 0, 1, 1], [], []>} : vector<64x8xf32>, vector<8x32xf32>, vector<64x32xf32> -> vector<64x32xf32>
    %58 = arith.addf %40, %57 : vector<64x32xf32>
    %59 = vector.extract_strided_slice %34 {offsets = [0, 0, 8], sizes = [4, 16, 8], strides = [1, 1, 1]} : vector<4x16x32xf32> to vector<4x16x8xf32>
    %60 = vector.extract_strided_slice %36 {offsets = [0, 0, 8], sizes = [4, 16, 8], strides = [1, 1, 1]} : vector<4x16x32xf32> to vector<4x16x8xf32>
    %61 = vector.extract_strided_slice %38 {offsets = [0, 0, 8], sizes = [4, 16, 8], strides = [1, 1, 1]} : vector<4x16x32xf32> to vector<4x16x8xf32>
    "tpu.trace_start"() <{level = 10 : i32, message = "bnd,bmd->bnm"}> : () -> ()
    %cst_23 = arith.constant dense<0.000000e+00> : vector<4x16x16xf32>
    %62 = tpu.matmul %59, %60, %cst_23 {dimension_numbers = #tpu.dot_dimension_numbers<[2], [2], [1], [1], [0, 0, 0, 1, 1, 1], [0], [0]>} : vector<4x16x8xf32>, vector<4x16x8xf32>, vector<4x16x16xf32> -> vector<4x16x16xf32>
    "tpu.trace_stop"() : () -> ()
    %cst_24 = arith.constant dense<0xFF800000> : vector<4x16xf32>
    %63 = vector.multi_reduction <maximumf>, %62, %cst_24 [2] : vector<4x16x16xf32> to vector<4x16xf32>
    %64 = vector.shape_cast %63 : vector<4x16xf32> to vector<4x16x1xf32>
    %65 = vector.broadcast %64 : vector<4x16x1xf32> to vector<4x16x16xf32>
    %66 = arith.subf %62, %65 : vector<4x16x16xf32>
    %67 = math.exp %66 : vector<4x16x16xf32>
    %cst_25 = arith.constant dense<0.000000e+00> : vector<4x16xf32>
    %68 = vector.multi_reduction <add>, %67, %cst_25 [2] : vector<4x16x16xf32> to vector<4x16xf32>
    %69 = vector.shape_cast %68 : vector<4x16xf32> to vector<4x16x1xf32>
    %70 = vector.broadcast %69 : vector<4x16x1xf32> to vector<4x16x16xf32>
    %71 = arith.divf %67, %70 : vector<4x16x16xf32>
    "tpu.trace_start"() <{level = 10 : i32, message = "bnm,bmd->bnd"}> : () -> ()
    %cst_26 = arith.constant dense<0.000000e+00> : vector<4x16x8xf32>
    %72 = tpu.matmul %71, %61, %cst_26 {dimension_numbers = #tpu.dot_dimension_numbers<[2], [1], [1], [2], [0, 0, 0, 1, 1, 2], [0], [0]>} : vector<4x16x16xf32>, vector<4x16x8xf32>, vector<4x16x8xf32> -> vector<4x16x8xf32>
    "tpu.trace_stop"() : () -> ()
    %73 = vector.shape_cast %72 : vector<4x16x8xf32> to vector<64x8xf32>
    %74 = vector.extract_strided_slice %39 {offsets = [8, 0], sizes = [8, 32], strides = [1, 1]} : vector<32x32xf32> to vector<8x32xf32>
    %cst_27 = arith.constant dense<0.000000e+00> : vector<64x32xf32>
    %75 = tpu.matmul %73, %74, %cst_27 {dimension_numbers = #tpu.dot_dimension_numbers<[1], [0], [0], [1], [0, 0, 1, 1], [], []>} : vector<64x8xf32>, vector<8x32xf32>, vector<64x32xf32> -> vector<64x32xf32>
    %76 = arith.addf %58, %75 : vector<64x32xf32>
    %77 = vector.extract_strided_slice %34 {offsets = [0, 0, 16], sizes = [4, 16, 8], strides = [1, 1, 1]} : vector<4x16x32xf32> to vector<4x16x8xf32>
    %78 = vector.extract_strided_slice %36 {offsets = [0, 0, 16], sizes = [4, 16, 8], strides = [1, 1, 1]} : vector<4x16x32xf32> to vector<4x16x8xf32>
    %79 = vector.extract_strided_slice %38 {offsets = [0, 0, 16], sizes = [4, 16, 8], strides = [1, 1, 1]} : vector<4x16x32xf32> to vector<4x16x8xf32>
    "tpu.trace_start"() <{level = 10 : i32, message = "bnd,bmd->bnm"}> : () -> ()
    %cst_28 = arith.constant dense<0.000000e+00> : vector<4x16x16xf32>
    %80 = tpu.matmul %77, %78, %cst_28 {dimension_numbers = #tpu.dot_dimension_numbers<[2], [2], [1], [1], [0, 0, 0, 1, 1, 1], [0], [0]>} : vector<4x16x8xf32>, vector<4x16x8xf32>, vector<4x16x16xf32> -> vector<4x16x16xf32>
    "tpu.trace_stop"() : () -> ()
    %cst_29 = arith.constant dense<0xFF800000> : vector<4x16xf32>
    %81 = vector.multi_reduction <maximumf>, %80, %cst_29 [2] : vector<4x16x16xf32> to vector<4x16xf32>
    %82 = vector.shape_cast %81 : vector<4x16xf32> to vector<4x16x1xf32>
    %83 = vector.broadcast %82 : vector<4x16x1xf32> to vector<4x16x16xf32>
    %84 = arith.subf %80, %83 : vector<4x16x16xf32>
    %85 = math.exp %84 : vector<4x16x16xf32>
    %cst_30 = arith.constant dense<0.000000e+00> : vector<4x16xf32>
    %86 = vector.multi_reduction <add>, %85, %cst_30 [2] : vector<4x16x16xf32> to vector<4x16xf32>
    %87 = vector.shape_cast %86 : vector<4x16xf32> to vector<4x16x1xf32>
    %88 = vector.broadcast %87 : vector<4x16x1xf32> to vector<4x16x16xf32>
    %89 = arith.divf %85, %88 : vector<4x16x16xf32>
    "tpu.trace_start"() <{level = 10 : i32, message = "bnm,bmd->bnd"}> : () -> ()
    %cst_31 = arith.constant dense<0.000000e+00> : vector<4x16x8xf32>
    %90 = tpu.matmul %89, %79, %cst_31 {dimension_numbers = #tpu.dot_dimension_numbers<[2], [1], [1], [2], [0, 0, 0, 1, 1, 2], [0], [0]>} : vector<4x16x16xf32>, vector<4x16x8xf32>, vector<4x16x8xf32> -> vector<4x16x8xf32>
    "tpu.trace_stop"() : () -> ()
    %91 = vector.shape_cast %90 : vector<4x16x8xf32> to vector<64x8xf32>
    %92 = vector.extract_strided_slice %39 {offsets = [16, 0], sizes = [8, 32], strides = [1, 1]} : vector<32x32xf32> to vector<8x32xf32>
    %cst_32 = arith.constant dense<0.000000e+00> : vector<64x32xf32>
    %93 = tpu.matmul %91, %92, %cst_32 {dimension_numbers = #tpu.dot_dimension_numbers<[1], [0], [0], [1], [0, 0, 1, 1], [], []>} : vector<64x8xf32>, vector<8x32xf32>, vector<64x32xf32> -> vector<64x32xf32>
    %94 = arith.addf %76, %93 : vector<64x32xf32>
    %95 = vector.extract_strided_slice %34 {offsets = [0, 0, 24], sizes = [4, 16, 8], strides = [1, 1, 1]} : vector<4x16x32xf32> to vector<4x16x8xf32>
    %96 = vector.extract_strided_slice %36 {offsets = [0, 0, 24], sizes = [4, 16, 8], strides = [1, 1, 1]} : vector<4x16x32xf32> to vector<4x16x8xf32>
    %97 = vector.extract_strided_slice %38 {offsets = [0, 0, 24], sizes = [4, 16, 8], strides = [1, 1, 1]} : vector<4x16x32xf32> to vector<4x16x8xf32>
    "tpu.trace_start"() <{level = 10 : i32, message = "bnd,bmd->bnm"}> : () -> ()
    %cst_33 = arith.constant dense<0.000000e+00> : vector<4x16x16xf32>
    %98 = tpu.matmul %95, %96, %cst_33 {dimension_numbers = #tpu.dot_dimension_numbers<[2], [2], [1], [1], [0, 0, 0, 1, 1, 1], [0], [0]>} : vector<4x16x8xf32>, vector<4x16x8xf32>, vector<4x16x16xf32> -> vector<4x16x16xf32>
    "tpu.trace_stop"() : () -> ()
    %cst_34 = arith.constant dense<0xFF800000> : vector<4x16xf32>
    %99 = vector.multi_reduction <maximumf>, %98, %cst_34 [2] : vector<4x16x16xf32> to vector<4x16xf32>
    %100 = vector.shape_cast %99 : vector<4x16xf32> to vector<4x16x1xf32>
    %101 = vector.broadcast %100 : vector<4x16x1xf32> to vector<4x16x16xf32>
    %102 = arith.subf %98, %101 : vector<4x16x16xf32>
    %103 = math.exp %102 : vector<4x16x16xf32>
    %cst_35 = arith.constant dense<0.000000e+00> : vector<4x16xf32>
    %104 = vector.multi_reduction <add>, %103, %cst_35 [2] : vector<4x16x16xf32> to vector<4x16xf32>
    %105 = vector.shape_cast %104 : vector<4x16xf32> to vector<4x16x1xf32>
    %106 = vector.broadcast %105 : vector<4x16x1xf32> to vector<4x16x16xf32>
    %107 = arith.divf %103, %106 : vector<4x16x16xf32>
    "tpu.trace_start"() <{level = 10 : i32, message = "bnm,bmd->bnd"}> : () -> ()
    %cst_36 = arith.constant dense<0.000000e+00> : vector<4x16x8xf32>
    %108 = tpu.matmul %107, %97, %cst_36 {dimension_numbers = #tpu.dot_dimension_numbers<[2], [1], [1], [2], [0, 0, 0, 1, 1, 2], [0], [0]>} : vector<4x16x16xf32>, vector<4x16x8xf32>, vector<4x16x8xf32> -> vector<4x16x8xf32>
    "tpu.trace_stop"() : () -> ()
    %109 = vector.shape_cast %108 : vector<4x16x8xf32> to vector<64x8xf32>
    %110 = vector.extract_strided_slice %39 {offsets = [24, 0], sizes = [8, 32], strides = [1, 1]} : vector<32x32xf32> to vector<8x32xf32>
    %cst_37 = arith.constant dense<0.000000e+00> : vector<64x32xf32>
    %111 = tpu.matmul %109, %110, %cst_37 {dimension_numbers = #tpu.dot_dimension_numbers<[1], [0], [0], [1], [0, 0, 1, 1], [], []>} : vector<64x8xf32>, vector<8x32xf32>, vector<64x32xf32> -> vector<64x32xf32>
    %112 = arith.addf %94, %111 : vector<64x32xf32>
    %c0_38 = arith.constant 0 : index
    %c0_39 = arith.constant 0 : index
    %113 = vector.load %arg7[%c0_38, %c0_39] : memref<1x32xf32, #tpu.memory_space<vmem>>, vector<1x32xf32>
    %114 = vector.broadcast %113 : vector<1x32xf32> to vector<64x32xf32>
    %115 = arith.addf %112, %114 : vector<64x32xf32>
    %116 = arith.addf %27, %115 : vector<64x32xf32>
    %c0_40 = arith.constant 0 : index
    %c0_41 = arith.constant 0 : index
    %117 = vector.load %arg8[%c0_40, %c0_41] : memref<32x32xf32, #tpu.memory_space<vmem>>, vector<32x32xf32>
    %c0_42 = arith.constant 0 : index
    %c0_43 = arith.constant 0 : index
    %118 = vector.load %arg9[%c0_42, %c0_43] : memref<1x32xf32, #tpu.memory_space<vmem>>, vector<1x32xf32>
    %c0_44 = arith.constant 0 : index
    %c0_45 = arith.constant 0 : index
    %119 = vector.load %arg10[%c0_44, %c0_45] : memref<32x32xf32, #tpu.memory_space<vmem>>, vector<32x32xf32>
    %c0_46 = arith.constant 0 : index
    %c0_47 = arith.constant 0 : index
    %120 = vector.load %arg11[%c0_46, %c0_47] : memref<1x32xf32, #tpu.memory_space<vmem>>, vector<1x32xf32>
    %cst_48 = arith.constant dense<0.000000e+00> : vector<64x32xf32>
    %121 = tpu.matmul %116, %117, %cst_48 {dimension_numbers = #tpu.dot_dimension_numbers<[1], [0], [0], [1], [0, 0, 1, 1], [], []>} : vector<64x32xf32>, vector<32x32xf32>, vector<64x32xf32> -> vector<64x32xf32>
    %122 = vector.broadcast %118 : vector<1x32xf32> to vector<64x32xf32>
    %123 = arith.addf %121, %122 : vector<64x32xf32>
    %124 = arith.negf %123 : vector<64x32xf32>
    %125 = math.exp %124 : vector<64x32xf32>
    %cst_49 = arith.constant 1.000000e+00 : f32
    %126 = vector.broadcast %cst_49 : f32 to vector<64x32xf32>
    %127 = arith.addf %126, %125 : vector<64x32xf32>
    %128 = arith.divf %126, %127 : vector<64x32xf32>
    %129 = arith.mulf %123, %128 : vector<64x32xf32>
    %cst_50 = arith.constant dense<0.000000e+00> : vector<64x32xf32>
    %130 = tpu.matmul %129, %119, %cst_50 {dimension_numbers = #tpu.dot_dimension_numbers<[1], [0], [0], [1], [0, 0, 1, 1], [], []>} : vector<64x32xf32>, vector<32x32xf32>, vector<64x32xf32> -> vector<64x32xf32>
    %131 = vector.broadcast %120 : vector<1x32xf32> to vector<64x32xf32>
    %132 = arith.addf %130, %131 : vector<64x32xf32>
    %133 = vector.shape_cast %132 : vector<64x32xf32> to vector<2x32x32xf32>
    %134 = vector.extract_strided_slice %133 {offsets = [0, 0, 0], sizes = [2, 16, 32], strides = [1, 1, 1]} : vector<2x32x32xf32> to vector<2x16x32xf32>
    %135 = vector.extract_strided_slice %133 {offsets = [0, 16, 0], sizes = [2, 16, 32], strides = [1, 1, 1]} : vector<2x32x32xf32> to vector<2x16x32xf32>
    %c0_51 = arith.constant 0 : index
    %c0_52 = arith.constant 0 : index
    %c0_53 = arith.constant 0 : index
    %136 = vector.load %arg19[%c0_51, %c0_52, %c0_53] : memref<2x16x32xf32, #tpu.memory_space<vmem>>, vector<2x16x32xf32>
    tpu.vector_store %arg19[%c0_51, %c0_52, %c0_53], %135 {strides = array<i32>} : memref<2x16x32xf32, #tpu.memory_space<vmem>>, vector<2x16x32xf32>,
    %c0_54 = arith.constant 0 : index
    %c0_55 = arith.constant 0 : index
    %c0_56 = arith.constant 0 : index
    %137 = vector.load %arg1[%c0_54, %c0_55, %c0_56] : memref<2x16x32xf32, #tpu.memory_space<vmem>>, vector<2x16x32xf32>
    %138 = vector.shape_cast %137 : vector<2x16x32xf32> to vector<32x32xf32>
    %c0_57 = arith.constant 0 : index
    %c0_58 = arith.constant 0 : index
    %139 = vector.load %arg12[%c0_57, %c0_58] : memref<32x32xf32, #tpu.memory_space<vmem>>, vector<32x32xf32>
    %cst_59 = arith.constant dense<0.000000e+00> : vector<32x32xf32>
    %140 = tpu.matmul %138, %139, %cst_59 {dimension_numbers = #tpu.dot_dimension_numbers<[1], [0], [0], [1], [0, 0, 1, 1], [], []>} : vector<32x32xf32>, vector<32x32xf32>, vector<32x32xf32> -> vector<32x32xf32>
    %c0_60 = arith.constant 0 : index
    %c0_61 = arith.constant 0 : index
    %141 = vector.load %arg13[%c0_60, %c0_61] : memref<1x32xf32, #tpu.memory_space<vmem>>, vector<1x32xf32>
    %142 = vector.broadcast %141 : vector<1x32xf32> to vector<32x32xf32>
    %143 = arith.addf %140, %142 : vector<32x32xf32>
    %144 = vector.shape_cast %143 : vector<32x32xf32> to vector<2x16x32xf32>
    %c0_62 = arith.constant 0 : index
    %c0_63 = arith.constant 0 : index
    %145 = vector.load %arg14[%c0_62, %c0_63] : memref<32x64xf32, #tpu.memory_space<vmem>>, vector<32x64xf32>
    %cst_64 = arith.constant dense<0.000000e+00> : vector<64x64xf32>
    %146 = tpu.matmul %132, %145, %cst_64 {dimension_numbers = #tpu.dot_dimension_numbers<[1], [0], [0], [1], [0, 0, 1, 1], [], []>} : vector<64x32xf32>, vector<32x64xf32>, vector<64x64xf32> -> vector<64x64xf32>
    %c0_65 = arith.constant 0 : index
    %c0_66 = arith.constant 0 : index
    %147 = vector.load %arg15[%c0_65, %c0_66] : memref<1x64xf32, #tpu.memory_space<vmem>>, vector<1x64xf32>
    %148 = vector.broadcast %147 : vector<1x64xf32> to vector<64x64xf32>
    %149 = arith.addf %146, %148 : vector<64x64xf32>
    %150 = vector.extract_strided_slice %149 {offsets = [0, 0], sizes = [64, 32], strides = [1, 1]} : vector<64x64xf32> to vector<64x32xf32>
    %151 = vector.shape_cast %150 : vector<64x32xf32> to vector<2x32x32xf32>
    %152 = vector.extract_strided_slice %149 {offsets = [0, 32], sizes = [64, 32], strides = [1, 1]} : vector<64x64xf32> to vector<64x32xf32>
    %153 = vector.shape_cast %152 : vector<64x32xf32> to vector<2x32x32xf32>
    %c0_67 = arith.constant 0 : index
    %c0_68 = arith.constant 0 : index
    %154 = vector.load %arg16[%c0_67, %c0_68] : memref<32x32xf32, #tpu.memory_space<vmem>>, vector<32x32xf32>
    %cst_69 = arith.constant 0.000000e+00 : f32
    %155 = vector.broadcast %cst_69 : f32 to vector<32x32xf32>
    %156 = vector.extract_strided_slice %144 {offsets = [0, 0, 0], sizes = [2, 16, 8], strides = [1, 1, 1]} : vector<2x16x32xf32> to vector<2x16x8xf32>
    %157 = vector.extract_strided_slice %151 {offsets = [0, 0, 0], sizes = [2, 32, 8], strides = [1, 1, 1]} : vector<2x32x32xf32> to vector<2x32x8xf32>
    %158 = vector.extract_strided_slice %153 {offsets = [0, 0, 0], sizes = [2, 32, 8], strides = [1, 1, 1]} : vector<2x32x32xf32> to vector<2x32x8xf32>
    "tpu.trace_start"() <{level = 10 : i32, message = "bnd,bmd->bnm"}> : () -> ()
    %cst_70 = arith.constant dense<0.000000e+00> : vector<2x16x32xf32>
    %159 = tpu.matmul %156, %157, %cst_70 {dimension_numbers = #tpu.dot_dimension_numbers<[2], [2], [1], [1], [0, 0, 0, 1, 1, 1], [0], [0]>} : vector<2x16x8xf32>, vector<2x32x8xf32>, vector<2x16x32xf32> -> vector<2x16x32xf32>
    "tpu.trace_stop"() : () -> ()
    %cst_71 = arith.constant dense<0xFF800000> : vector<2x16xf32>
    %160 = vector.multi_reduction <maximumf>, %159, %cst_71 [2] : vector<2x16x32xf32> to vector<2x16xf32>
    %161 = vector.shape_cast %160 : vector<2x16xf32> to vector<2x16x1xf32>
    %162 = vector.broadcast %161 : vector<2x16x1xf32> to vector<2x16x32xf32>
    %163 = arith.subf %159, %162 : vector<2x16x32xf32>
    %164 = math.exp %163 : vector<2x16x32xf32>
    %cst_72 = arith.constant dense<0.000000e+00> : vector<2x16xf32>
    %165 = vector.multi_reduction <add>, %164, %cst_72 [2] : vector<2x16x32xf32> to vector<2x16xf32>
    %166 = vector.shape_cast %165 : vector<2x16xf32> to vector<2x16x1xf32>
    %167 = vector.broadcast %166 : vector<2x16x1xf32> to vector<2x16x32xf32>
    %168 = arith.divf %164, %167 : vector<2x16x32xf32>
    "tpu.trace_start"() <{level = 10 : i32, message = "bnm,bmd->bnd"}> : () -> ()
    %cst_73 = arith.constant dense<0.000000e+00> : vector<2x16x8xf32>
    %169 = tpu.matmul %168, %158, %cst_73 {dimension_numbers = #tpu.dot_dimension_numbers<[2], [1], [1], [2], [0, 0, 0, 1, 1, 2], [0], [0]>} : vector<2x16x32xf32>, vector<2x32x8xf32>, vector<2x16x8xf32> -> vector<2x16x8xf32>
    "tpu.trace_stop"() : () -> ()
    %170 = vector.shape_cast %169 : vector<2x16x8xf32> to vector<32x8xf32>
    %171 = vector.extract_strided_slice %154 {offsets = [0, 0], sizes = [8, 32], strides = [1, 1]} : vector<32x32xf32> to vector<8x32xf32>
    %cst_74 = arith.constant dense<0.000000e+00> : vector<32x32xf32>
    %172 = tpu.matmul %170, %171, %cst_74 {dimension_numbers = #tpu.dot_dimension_numbers<[1], [0], [0], [1], [0, 0, 1, 1], [], []>} : vector<32x8xf32>, vector<8x32xf32>, vector<32x32xf32> -> vector<32x32xf32>
    %173 = arith.addf %155, %172 : vector<32x32xf32>
    %174 = vector.extract_strided_slice %144 {offsets = [0, 0, 8], sizes = [2, 16, 8], strides = [1, 1, 1]} : vector<2x16x32xf32> to vector<2x16x8xf32>
    %175 = vector.extract_strided_slice %151 {offsets = [0, 0, 8], sizes = [2, 32, 8], strides = [1, 1, 1]} : vector<2x32x32xf32> to vector<2x32x8xf32>
    %176 = vector.extract_strided_slice %153 {offsets = [0, 0, 8], sizes = [2, 32, 8], strides = [1, 1, 1]} : vector<2x32x32xf32> to vector<2x32x8xf32>
    "tpu.trace_start"() <{level = 10 : i32, message = "bnd,bmd->bnm"}> : () -> ()
    %cst_75 = arith.constant dense<0.000000e+00> : vector<2x16x32xf32>
    %177 = tpu.matmul %174, %175, %cst_75 {dimension_numbers = #tpu.dot_dimension_numbers<[2], [2], [1], [1], [0, 0, 0, 1, 1, 1], [0], [0]>} : vector<2x16x8xf32>, vector<2x32x8xf32>, vector<2x16x32xf32> -> vector<2x16x32xf32>
    "tpu.trace_stop"() : () -> ()
    %cst_76 = arith.constant dense<0xFF800000> : vector<2x16xf32>
    %178 = vector.multi_reduction <maximumf>, %177, %cst_76 [2] : vector<2x16x32xf32> to vector<2x16xf32>
    %179 = vector.shape_cast %178 : vector<2x16xf32> to vector<2x16x1xf32>
    %180 = vector.broadcast %179 : vector<2x16x1xf32> to vector<2x16x32xf32>
    %181 = arith.subf %177, %180 : vector<2x16x32xf32>
    %182 = math.exp %181 : vector<2x16x32xf32>
    %cst_77 = arith.constant dense<0.000000e+00> : vector<2x16xf32>
    %183 = vector.multi_reduction <add>, %182, %cst_77 [2] : vector<2x16x32xf32> to vector<2x16xf32>
    %184 = vector.shape_cast %183 : vector<2x16xf32> to vector<2x16x1xf32>
    %185 = vector.broadcast %184 : vector<2x16x1xf32> to vector<2x16x32xf32>
    %186 = arith.divf %182, %185 : vector<2x16x32xf32>
    "tpu.trace_start"() <{level = 10 : i32, message = "bnm,bmd->bnd"}> : () -> ()
    %cst_78 = arith.constant dense<0.000000e+00> : vector<2x16x8xf32>
    %187 = tpu.matmul %186, %176, %cst_78 {dimension_numbers = #tpu.dot_dimension_numbers<[2], [1], [1], [2], [0, 0, 0, 1, 1, 2], [0], [0]>} : vector<2x16x32xf32>, vector<2x32x8xf32>, vector<2x16x8xf32> -> vector<2x16x8xf32>
    "tpu.trace_stop"() : () -> ()
    %188 = vector.shape_cast %187 : vector<2x16x8xf32> to vector<32x8xf32>
    %189 = vector.extract_strided_slice %154 {offsets = [8, 0], sizes = [8, 32], strides = [1, 1]} : vector<32x32xf32> to vector<8x32xf32>
    %cst_79 = arith.constant dense<0.000000e+00> : vector<32x32xf32>
    %190 = tpu.matmul %188, %189, %cst_79 {dimension_numbers = #tpu.dot_dimension_numbers<[1], [0], [0], [1], [0, 0, 1, 1], [], []>} : vector<32x8xf32>, vector<8x32xf32>, vector<32x32xf32> -> vector<32x32xf32>
    %191 = arith.addf %173, %190 : vector<32x32xf32>
    %192 = vector.extract_strided_slice %144 {offsets = [0, 0, 16], sizes = [2, 16, 8], strides = [1, 1, 1]} : vector<2x16x32xf32> to vector<2x16x8xf32>
    %193 = vector.extract_strided_slice %151 {offsets = [0, 0, 16], sizes = [2, 32, 8], strides = [1, 1, 1]} : vector<2x32x32xf32> to vector<2x32x8xf32>
    %194 = vector.extract_strided_slice %153 {offsets = [0, 0, 16], sizes = [2, 32, 8], strides = [1, 1, 1]} : vector<2x32x32xf32> to vector<2x32x8xf32>
    "tpu.trace_start"() <{level = 10 : i32, message = "bnd,bmd->bnm"}> : () -> ()
    %cst_80 = arith.constant dense<0.000000e+00> : vector<2x16x32xf32>
    %195 = tpu.matmul %192, %193, %cst_80 {dimension_numbers = #tpu.dot_dimension_numbers<[2], [2], [1], [1], [0, 0, 0, 1, 1, 1], [0], [0]>} : vector<2x16x8xf32>, vector<2x32x8xf32>, vector<2x16x32xf32> -> vector<2x16x32xf32>
    "tpu.trace_stop"() : () -> ()
    %cst_81 = arith.constant dense<0xFF800000> : vector<2x16xf32>
    %196 = vector.multi_reduction <maximumf>, %195, %cst_81 [2] : vector<2x16x32xf32> to vector<2x16xf32>
    %197 = vector.shape_cast %196 : vector<2x16xf32> to vector<2x16x1xf32>
    %198 = vector.broadcast %197 : vector<2x16x1xf32> to vector<2x16x32xf32>
    %199 = arith.subf %195, %198 : vector<2x16x32xf32>
    %200 = math.exp %199 : vector<2x16x32xf32>
    %cst_82 = arith.constant dense<0.000000e+00> : vector<2x16xf32>
    %201 = vector.multi_reduction <add>, %200, %cst_82 [2] : vector<2x16x32xf32> to vector<2x16xf32>
    %202 = vector.shape_cast %201 : vector<2x16xf32> to vector<2x16x1xf32>
    %203 = vector.broadcast %202 : vector<2x16x1xf32> to vector<2x16x32xf32>
    %204 = arith.divf %200, %203 : vector<2x16x32xf32>
    "tpu.trace_start"() <{level = 10 : i32, message = "bnm,bmd->bnd"}> : () -> ()
    %cst_83 = arith.constant dense<0.000000e+00> : vector<2x16x8xf32>
    %205 = tpu.matmul %204, %194, %cst_83 {dimension_numbers = #tpu.dot_dimension_numbers<[2], [1], [1], [2], [0, 0, 0, 1, 1, 2], [0], [0]>} : vector<2x16x32xf32>, vector<2x32x8xf32>, vector<2x16x8xf32> -> vector<2x16x8xf32>
    "tpu.trace_stop"() : () -> ()
    %206 = vector.shape_cast %205 : vector<2x16x8xf32> to vector<32x8xf32>
    %207 = vector.extract_strided_slice %154 {offsets = [16, 0], sizes = [8, 32], strides = [1, 1]} : vector<32x32xf32> to vector<8x32xf32>
    %cst_84 = arith.constant dense<0.000000e+00> : vector<32x32xf32>
    %208 = tpu.matmul %206, %207, %cst_84 {dimension_numbers = #tpu.dot_dimension_numbers<[1], [0], [0], [1], [0, 0, 1, 1], [], []>} : vector<32x8xf32>, vector<8x32xf32>, vector<32x32xf32> -> vector<32x32xf32>
    %209 = arith.addf %191, %208 : vector<32x32xf32>
    %210 = vector.extract_strided_slice %144 {offsets = [0, 0, 24], sizes = [2, 16, 8], strides = [1, 1, 1]} : vector<2x16x32xf32> to vector<2x16x8xf32>
    %211 = vector.extract_strided_slice %151 {offsets = [0, 0, 24], sizes = [2, 32, 8], strides = [1, 1, 1]} : vector<2x32x32xf32> to vector<2x32x8xf32>
    %212 = vector.extract_strided_slice %153 {offsets = [0, 0, 24], sizes = [2, 32, 8], strides = [1, 1, 1]} : vector<2x32x32xf32> to vector<2x32x8xf32>
    "tpu.trace_start"() <{level = 10 : i32, message = "bnd,bmd->bnm"}> : () -> ()
    %cst_85 = arith.constant dense<0.000000e+00> : vector<2x16x32xf32>
    %213 = tpu.matmul %210, %211, %cst_85 {dimension_numbers = #tpu.dot_dimension_numbers<[2], [2], [1], [1], [0, 0, 0, 1, 1, 1], [0], [0]>} : vector<2x16x8xf32>, vector<2x32x8xf32>, vector<2x16x32xf32> -> vector<2x16x32xf32>
    "tpu.trace_stop"() : () -> ()
    %cst_86 = arith.constant dense<0xFF800000> : vector<2x16xf32>
    %214 = vector.multi_reduction <maximumf>, %213, %cst_86 [2] : vector<2x16x32xf32> to vector<2x16xf32>
    %215 = vector.shape_cast %214 : vector<2x16xf32> to vector<2x16x1xf32>
    %216 = vector.broadcast %215 : vector<2x16x1xf32> to vector<2x16x32xf32>
    %217 = arith.subf %213, %216 : vector<2x16x32xf32>
    %218 = math.exp %217 : vector<2x16x32xf32>
    %cst_87 = arith.constant dense<0.000000e+00> : vector<2x16xf32>
    %219 = vector.multi_reduction <add>, %218, %cst_87 [2] : vector<2x16x32xf32> to vector<2x16xf32>
    %220 = vector.shape_cast %219 : vector<2x16xf32> to vector<2x16x1xf32>
    %221 = vector.broadcast %220 : vector<2x16x1xf32> to vector<2x16x32xf32>
    %222 = arith.divf %218, %221 : vector<2x16x32xf32>
    "tpu.trace_start"() <{level = 10 : i32, message = "bnm,bmd->bnd"}> : () -> ()
    %cst_88 = arith.constant dense<0.000000e+00> : vector<2x16x8xf32>
    %223 = tpu.matmul %222, %212, %cst_88 {dimension_numbers = #tpu.dot_dimension_numbers<[2], [1], [1], [2], [0, 0, 0, 1, 1, 2], [0], [0]>} : vector<2x16x32xf32>, vector<2x32x8xf32>, vector<2x16x8xf32> -> vector<2x16x8xf32>
    "tpu.trace_stop"() : () -> ()
    %224 = vector.shape_cast %223 : vector<2x16x8xf32> to vector<32x8xf32>
    %225 = vector.extract_strided_slice %154 {offsets = [24, 0], sizes = [8, 32], strides = [1, 1]} : vector<32x32xf32> to vector<8x32xf32>
    %cst_89 = arith.constant dense<0.000000e+00> : vector<32x32xf32>
    %226 = tpu.matmul %224, %225, %cst_89 {dimension_numbers = #tpu.dot_dimension_numbers<[1], [0], [0], [1], [0, 0, 1, 1], [], []>} : vector<32x8xf32>, vector<8x32xf32>, vector<32x32xf32> -> vector<32x32xf32>
    %227 = arith.addf %209, %226 : vector<32x32xf32>
    %c0_90 = arith.constant 0 : index
    %c0_91 = arith.constant 0 : index
    %228 = vector.load %arg17[%c0_90, %c0_91] : memref<1x32xf32, #tpu.memory_space<vmem>>, vector<1x32xf32>
    %229 = vector.broadcast %228 : vector<1x32xf32> to vector<32x32xf32>
    %230 = arith.addf %227, %229 : vector<32x32xf32>
    %231 = vector.shape_cast %134 : vector<2x16x32xf32> to vector<32x32xf32>
    %232 = arith.addf %231, %230 : vector<32x32xf32>
    %c0_92 = arith.constant 0 : index
    %c0_93 = arith.constant 0 : index
    %233 = vector.load %arg8[%c0_92, %c0_93] : memref<32x32xf32, #tpu.memory_space<vmem>>, vector<32x32xf32>
    %c0_94 = arith.constant 0 : index
    %c0_95 = arith.constant 0 : index
    %234 = vector.load %arg9[%c0_94, %c0_95] : memref<1x32xf32, #tpu.memory_space<vmem>>, vector<1x32xf32>
    %c0_96 = arith.constant 0 : index
    %c0_97 = arith.constant 0 : index
    %235 = vector.load %arg10[%c0_96, %c0_97] : memref<32x32xf32, #tpu.memory_space<vmem>>, vector<32x32xf32>
    %c0_98 = arith.constant 0 : index
    %c0_99 = arith.constant 0 : index
    %236 = vector.load %arg11[%c0_98, %c0_99] : memref<1x32xf32, #tpu.memory_space<vmem>>, vector<1x32xf32>
    %cst_100 = arith.constant dense<0.000000e+00> : vector<32x32xf32>
    %237 = tpu.matmul %232, %233, %cst_100 {dimension_numbers = #tpu.dot_dimension_numbers<[1], [0], [0], [1], [0, 0, 1, 1], [], []>} : vector<32x32xf32>, vector<32x32xf32>, vector<32x32xf32> -> vector<32x32xf32>
    %238 = vector.broadcast %234 : vector<1x32xf32> to vector<32x32xf32>
    %239 = arith.addf %237, %238 : vector<32x32xf32>
    %240 = arith.negf %239 : vector<32x32xf32>
    %241 = math.exp %240 : vector<32x32xf32>
    %cst_101 = arith.constant 1.000000e+00 : f32
    %242 = vector.broadcast %cst_101 : f32 to vector<32x32xf32>
    %243 = arith.addf %242, %241 : vector<32x32xf32>
    %244 = arith.divf %242, %243 : vector<32x32xf32>
    %245 = arith.mulf %239, %244 : vector<32x32xf32>
    %cst_102 = arith.constant dense<0.000000e+00> : vector<32x32xf32>
    %246 = tpu.matmul %245, %235, %cst_102 {dimension_numbers = #tpu.dot_dimension_numbers<[1], [0], [0], [1], [0, 0, 1, 1], [], []>} : vector<32x32xf32>, vector<32x32xf32>, vector<32x32xf32> -> vector<32x32xf32>
    %247 = vector.broadcast %236 : vector<1x32xf32> to vector<32x32xf32>
    %248 = arith.addf %246, %247 : vector<32x32xf32>
    %249 = vector.shape_cast %248 : vector<32x32xf32> to vector<2x16x32xf32>
    %c0_103 = arith.constant 0 : index
    %c0_104 = arith.constant 0 : index
    %c0_105 = arith.constant 0 : index
    %250 = vector.load %arg18[%c0_103, %c0_104, %c0_105] : memref<2x16x32xf32, #tpu.memory_space<vmem>>, vector<2x16x32xf32>
    tpu.vector_store %arg18[%c0_103, %c0_104, %c0_105], %249 {strides = array<i32>} : memref<2x16x32xf32, #tpu.memory_space<vmem>>, vector<2x16x32xf32>,
    return
  }
}

</mosaic_0001>

<bundles_post_ra>
// kernel: impgtno_block_forward.1
= control target key start
LH: loop header
LB: loop body
LE: loop exit
PB: predicated region body
PF: predicated region fallthrough
CT: control target
= control target key end

     0   :  { %s6995_s0 = inlined_call_operand.vmem [shape: f32[4,16,32], index: 0, kind: input, shape index: {}]   ;;  %s6996_s1 = inlined_call_operand.vmem [shape: f32[2,16,32], index: 1, kind: input, shape index: {}]   ;;  %s6997_s2 = inlined_call_operand.vmem [shape: f32[1,32], index: 2, kind: input, shape index: {}]   ;;  %s6998_s3 = inlined_call_operand.vmem [shape: f32[1,32], index: 3, kind: input, shape index: {}]   ;;  %s6999_s4 = inlined_call_operand.vmem [shape: f32[32,96], index: 4, kind: input, shape index: {}]   ;;  %s7000_s5 = inlined_call_operand.vmem [shape: f32[1,96], index: 5, kind: input, shape index: {}]   ;;  %s7001_s6 = inlined_call_operand.vmem [shape: f32[32,32], index: 6, kind: input, shape index: {}]   ;;  %s7002_s7 = inlined_call_operand.vmem [shape: f32[1,32], index: 7, kind: input, shape index: {}]   ;;  %s7003_s8 = inlined_call_operand.vmem [shape: f32[32,32], index: 8, kind: input, shape index: {}]   ;;  %s7004_s9 = inlined_call_operand.vmem [shape: f32[1,32], index: 9, kind: input, shape index: {}]   ;;  %s7005_s10 = inlined_call_operand.vmem [shape: f32[32,32], index: 10, kind: input, shape index: {}]   ;;  %s7006_s11 = inlined_call_operand.vmem [shape: f32[1,32], index: 11, kind: input, shape index: {}]   ;;  %s7007_s12 = inlined_call_operand.vmem [shape: f32[32,32], index: 12, kind: input, shape index: {}]   ;;  %s7008_s13 = inlined_call_operand.vmem [shape: f32[1,32], index: 13, kind: input, shape index: {}]   ;;  %s7009_s14 = inlined_call_operand.vmem [shape: f32[32,64], index: 14, kind: input, shape index: {}]   ;;  %s7010_s15 = inlined_call_operand.vmem [shape: f32[1,64], index: 15, kind: input, shape index: {}]   ;;  %s7011_s16 = inlined_call_operand.vmem [shape: f32[32,32], index: 16, kind: input, shape index: {}]   ;;  %s7012_s17 = inlined_call_operand.vmem [shape: f32[1,32], index: 17, kind: input, shape index: {}]   ;;  %s7013_s18 = inlined_call_operand.hbm [shape: f32[2,16,32], index: 18, kind: output, shape index: {0}]   ;;  %s7014_s19 = inlined_call_operand.hbm [shape: f32[2,16,32], index: 19, kind: output, shape index: {1}]  }
   0x1   :  { %7017 = sst [smem:[#allocation8_spill]] %s6995_s0 }
   0x2   :  { %7018 = sst [smem:[#allocation9_spill]] %s6996_s1 }
   0x3   :  { %7019 = sst [smem:[#allocation10_spill]] %s6997_s2 }
   0x4   :  { %7020 = sst [smem:[#allocation11_spill]] %s6998_s3 }
   0x5   :  { %25 = vsyncpa [#allocation3], 0  ;;  %s7021_s20 = sld [smem:[#allocation8_spill]]  ;;  %vm73_vm0 = vcmask 261120  }
   0xb   :  { %v67_v0 = vld [vmem:[%s7021_s20 + $0x20] sm:$0xff]  ;;  %v65_v1 = vld [vmem:[%s7021_s20 + $0x10] sm:$0xff]  ;;  %v68_v6 = vld [vmem:[%s7021_s20 + $0x28] sm:$0xff] }
   0xc   :  { %v63_v2 = vld [vmem:[%s7021_s20] sm:$0xff]  ;;  %v86_v3 = vsel %vm73_vm0, %v67_v0, 0.0  ;;  %v80_v4 = vsel %vm73_vm0, %v65_v1, 0.0  ;;  %v64_v7 = vld [vmem:[%s7021_s20 + $0x8] sm:$0xff]  ;;  %v66_v8 = vld [vmem:[%s7021_s20 + $0x18] sm:$0xff] }
   0xd   :  { %v74_v5 = vsel %vm73_vm0, %v63_v2, 0.0  ;;  %87 = vadd.xlane.f32.xlu2 %v86_v3  ;;  %81 = vadd.xlane.f32.xlu1 %v80_v4 }
   0xe   :  { %75 = vadd.xlane.f32.xlu0 %v74_v5 }
   0xf   :  { %26 = vsyncpa [#allocation5], 0  ;;  %v89_v9 = vsel %vm73_vm0, %v68_v6, 0.0  ;;  %v83_v10 = vsel %vm73_vm0, %v66_v8, 0.0  ;;  %v77_v11 = vsel %vm73_vm0, %v64_v7, 0.0  ;;  %v69_v12 = vld [vmem:[%s7021_s20 + $0x30] sm:$0xff] }
  0x10   :  { %v92_v13 = vsel %vm73_vm0, %v69_v12, 0.0  ;;  %v5281_v14 = vmov 32.0   ;;  %v70_v40 = vld [vmem:[%s7021_s20 + $0x38] sm:$0xff]  ;;  %v281_v59 = vld [vmem:[%s6999_s4 + $0x10] sm:$0xff]  ;;  %v280_v60 = vld [vmem:[%s6999_s4 + $0x8] sm:$0xff]  ;;  %s7022_s26 = sld [smem:[#allocation10_spill]] }
  0x11   :  { %4971 = vrcp.f32 %v5281_v14  ;;  %v95_v45 = vsel %vm73_vm0, %v70_v40, 0.0  ;;  %v282_v58 = vld [vmem:[%s6999_s4 + $0x18] sm:$0xff]  ;;  %v279_v61 = vld [vmem:[%s6999_s4] sm:$0xff]  ;;  %s7023_s29 = sld [smem:[#allocation11_spill]]  ;;  %s5282_s20 = smov 96  }
  0x12   :  { %323 = vmatpush.msra.mxu0 %v282_v58  ;;  %s5284_s21 = smov 88   ;;  %s5285_s1 = smov 120  }
  0x13   :  { %s5286_s22 = smov 56   ;;  %s5287_s2 = smov 80  }
  0x14   :  { %324 = vmatpush.msra.mxu0 %v281_v59  ;;  %s5288_s23 = smov 112   ;;  %s5289_s24 = smov 48  }
  0x15   :  { %90 = vadd.xlane.f32.xlu2 %v89_v9  ;;  %84 = vadd.xlane.f32.xlu1 %v83_v10  ;;  %s5290_s25 = smov 72   ;;  %s5291_s4 = smov 104  }
  0x16   :  { %78 = vadd.xlane.f32.xlu0 %v77_v11  ;;  %325 = vmatpush.msra.mxu0 %v280_v60  ;;  %s5292_s30 = smov 40   ;;  %s4486_s3 = sshll.u32 %s7013_s18, 4  ;;  %s4487_s3 = int_to_ptr.hbm [resolvable:$true] %s4486_s3 }
  0x17   :  { %v4972_v15 = vpop.eup %4971 }
  0x18   :  { %v99_v16 = vmul.f32 32.0, %v4972_v15  ;;  %vm103_vm1 = vweird.f32 %v4972_v15  ;;  %326 = vmatpush.msra.mxu0 %v279_v61 }
  0x1a   :  { %v100_v17 = vsub.f32 1.0, %v99_v16 }
  0x1c   :  { %v101_v18 = vmul.f32 %v4972_v15, %v100_v17 }
  0x1d   :  { %93 = vadd.xlane.f32.xlu1 %v92_v13 }
  0x1e   :  { %v102_v19 = vadd.f32 %v4972_v15, %v101_v18 }
  0x20   :  { %v5425_v20 = vsel %vm103_vm1, %v4972_v15, %v102_v19 }
  0x80   :  { %v88_v21 = vpop.xlane.xlu2 %87  ;;  %v82_v22 = vpop.xlane.xlu1 %81 }
  0x81   :  { %v107_v23 = vmul.f32 %v5425_v20, %v82_v22  ;;  %v76_v24 = vpop.xlane.xlu0 %75  ;;  %v109_v36 = vmul.f32 %v5425_v20, %v88_v21 }
  0x82   :  { %v105_v25 = vmul.f32 %v5425_v20, %v76_v24 }
  0x83   :  { %v5429_v26 = vsub.f32 %v65_v1, %v107_v23  ;;  %v5452_v43 = vsub.f32 %v67_v0, %v109_v36 }
  0x84   :  { %v5431_v27 = vsub.f32 %v63_v2, %v105_v25 }
  0x85   :  { %v123_v28 = vmul.f32 %v5429_v26, %v5429_v26  ;;  %v125_v51 = vmul.f32 %v5452_v43, %v5452_v43 }
  0x86   :  { %v121_v29 = vmul.f32 %v5431_v27, %v5431_v27 }
  0x87   :  { %v135_v30 = vsel %vm73_vm0, %v123_v28, 0.0  ;;  %v141_v54 = vsel %vm73_vm0, %v125_v51, 0.0 }
  0x88   :  { %v91_v31 = vpop.xlane.xlu2 %90  ;;  %136 = vadd.xlane.f32.xlu1 %v135_v30  ;;  %v129_v32 = vsel %vm73_vm0, %v121_v29, 0.0  ;;  %v85_v33 = vpop.xlane.xlu1 %84 }
  0x89   :  { %v110_v34 = vmul.f32 %v5425_v20, %v91_v31  ;;  %130 = vadd.xlane.f32.xlu0 %v129_v32  ;;  %v79_v35 = vpop.xlane.xlu0 %78  ;;  %v108_v38 = vmul.f32 %v5425_v20, %v85_v33 }
  0x8a   :  { %v106_v37 = vmul.f32 %v5425_v20, %v79_v35  ;;  %v5510_v35 = vld [vmem:[%s7022_s26] ss:$0 sm:$0xff] }
  0x8b   :  { %v5443_v39 = vsub.f32 %v68_v6, %v110_v34  ;;  %v5454_v44 = vsub.f32 %v66_v8, %v108_v38 }
  0x8c   :  { %v5448_v41 = vsub.f32 %v64_v7, %v106_v37 }
  0x8d   :  { %v126_v42 = vmul.f32 %v5443_v39, %v5443_v39  ;;  %v124_v52 = vmul.f32 %v5454_v44, %v5454_v44 }
  0x8e   :  { %v122_v46 = vmul.f32 %v5448_v41, %v5448_v41 }
  0x8f   :  { %v144_v47 = vsel %vm73_vm0, %v126_v42, 0.0  ;;  %v138_v55 = vsel %vm73_vm0, %v124_v52, 0.0  ;;  %v5519_v42 = vld [vmem:[%s7023_s29] ss:$0 sm:$0xff]  ;;  %s7028_s29 = sld [smem:[#allocation9_spill]] }
  0x90   :  { %145 = vadd.xlane.f32.xlu1 %v144_v47  ;;  %v132_v48 = vsel %vm73_vm0, %v122_v46, 0.0  ;;  %v94_v49 = vpop.xlane.xlu1 %93 }
  0x91   :  { %96 = vadd.xlane.f32.xlu0 %v95_v45  ;;  %133 = vadd.xlane.f32.xlu2 %v132_v48  ;;  %v111_v50 = vmul.f32 %v5425_v20, %v94_v49 }
  0x93   :  { %v5466_v53 = vsub.f32 %v69_v12, %v111_v50 }
  0x95   :  { %v127_v56 = vmul.f32 %v5466_v53, %v5466_v53 }
  0x97   :  { %v147_v57 = vsel %vm73_vm0, %v127_v56, 0.0 }
  0x99   :  { %142 = vadd.xlane.f32.xlu0 %v141_v54  ;;  %139 = vadd.xlane.f32.xlu2 %v138_v55 }
  0xa1   :  { %148 = vadd.xlane.f32.xlu2 %v147_v57 }
  0xfb   :  { %v137_v62 = vpop.xlane.xlu1 %136 }
  0xfc   :  { %v155_v63 = vmul.f32 %v137_v62, %v5425_v20  ;;  %v131_v0 = vpop.xlane.xlu0 %130 }
  0xfd   :  { %v153_v1 = vmul.f32 %v131_v0, %v5425_v20 }
  0xfe   :  { %v5487_v2 = vadd.f32 1e-05, %v155_v63 }
  0xff   :  { %v161_v3 = vadd.f32 1e-05, %v153_v1 }
 0x100   :  { %4973 = vrsqrt.f32 %v5487_v2  ;;  %vm195_vm7 = vweird.f32 %v5487_v2 }
 0x101   :  { %4975 = vrsqrt.f32 %v161_v3  ;;  %vm175_vm3 = vweird.f32 %v161_v3 }
 0x103   :  { %v146_v16 = vpop.xlane.xlu1 %145 }
 0x104   :  { %v134_v4 = vpop.xlane.xlu2 %133  ;;  %v97_v5 = vpop.xlane.xlu0 %96  ;;  %v158_v29 = vmul.f32 %v146_v16, %v5425_v20 }
 0x105   :  { %v154_v6 = vmul.f32 %v134_v4, %v5425_v20  ;;  %v112_v7 = vmul.f32 %v5425_v20, %v97_v5 }
 0x106   :  { %v5492_v8 = vpop.eup %4973  ;;  %v5513_v38 = vadd.f32 1e-05, %v158_v29 }
 0x107   :  { %v4976_v9 = vpop.eup %4975  ;;  %v162_v10 = vadd.f32 1e-05, %v154_v6  ;;  %v5494_v11 = vsub.f32 %v70_v40, %v112_v7  ;;  %v190_v12 = vmul.f32 %v5492_v8, %v5487_v2  ;;  %vm196_vm8 = vweird.f32 %v5492_v8 }
 0x108   :  { %v170_v13 = vmul.f32 %v4976_v9, %v161_v3  ;;  %vm176_vm2 = vweird.f32 %v4976_v9  ;;  %vm5530_vm10 = vmor %vm195_vm7, %vm196_vm8 }
 0x109   :  { %4977 = vrsqrt.f32 %v162_v10  ;;  %v128_v14 = vmul.f32 %v5494_v11, %v5494_v11  ;;  %v191_v18 = vmul.f32 %v5492_v8, %v190_v12  ;;  %vm177_vm4 = vmor %vm175_vm3, %vm176_vm2  ;;  %vm185_vm5 = vweird.f32 %v162_v10 }
 0x10a   :  { %v171_v15 = vmul.f32 %v4976_v9, %v170_v13  ;;  %vm225_vm2 = vweird.f32 %v5513_v38 }
 0x10b   :  { %v150_v17 = vsel %vm73_vm0, %v128_v14, 0.0  ;;  %v192_v31 = vmul.f32 0.5, %v191_v18 }
 0x10c   :  { %v172_v19 = vmul.f32 0.5, %v171_v15  ;;  %v140_v21 = vpop.xlane.xlu2 %139  ;;  %151 = vadd.xlane.f32.xlu0 %v150_v17  ;;  %v143_v22 = vpop.xlane.xlu0 %142 }
 0x10d   :  { %v156_v23 = vmul.f32 %v140_v21, %v5425_v20  ;;  %v157_v24 = vmul.f32 %v143_v22, %v5425_v20  ;;  %v193_v45 = vsub.f32 1.5, %v192_v31 }
 0x10e   :  { %v173_v25 = vsub.f32 1.5, %v172_v19 }
 0x10f   :  { %v4978_v28 = vpop.eup %4977  ;;  %v164_v30 = vadd.f32 1e-05, %v156_v23  ;;  %v5505_v34 = vadd.f32 1e-05, %v157_v24  ;;  %v194_v54 = vmul.f32 %v5492_v8, %v193_v45 }
 0x110   :  { %v174_v32 = vmul.f32 %v4976_v9, %v173_v25  ;;  %v180_v33 = vmul.f32 %v4978_v28, %v162_v10  ;;  %vm186_vm6 = vweird.f32 %v4978_v28 }
 0x111   :  { %4979 = vrsqrt.f32 %v164_v30  ;;  %vm187_vm9 = vmor %vm185_vm5, %vm186_vm6  ;;  %v198_v1 = vsel %vm5530_vm10, %v5492_v8, %v194_v54  ;;  %vm205_vm11 = vweird.f32 %v164_v30  ;;  %vm215_vm14 = vweird.f32 %v5505_v34  ;;  %v5589_v54 = vld [vmem:[%s7000_s5] ss:$0 sm:$0xff]  ;;  %s5283_s5 = smov 64  }
 0x112   :  { %v181_v36 = vmul.f32 %v4978_v28, %v180_v33  ;;  %4981 = vrsqrt.f32 %v5505_v34  ;;  %v178_v37 = vsel %vm177_vm4, %v4976_v9, %v174_v32  ;;  %v251_v6 = vmul.f32 %v198_v1, %v5429_v26 }
 0x113   :  { %v249_v40 = vmul.f32 %v178_v37, %v5431_v27  ;;  %4983 = vrsqrt.f32 %v5513_v38 }
 0x114   :  { %v182_v46 = vmul.f32 0.5, %v181_v36  ;;  %v149_v47 = vpop.xlane.xlu2 %148  ;;  %v262_v8 = vmul.f32 %v5510_v35, %v251_v6 }
 0x115   :  { %v260_v48 = vmul.f32 %v5510_v35, %v249_v40  ;;  %v159_v27 = vmul.f32 %v149_v47, %v5425_v20 }
 0x116   :  { %v183_v49 = vsub.f32 1.5, %v182_v46  ;;  %v5552_v15 = vadd.f32 %v5519_v42, %v262_v8 }
 0x117   :  { %v4980_v50 = vpop.eup %4979  ;;  %v5527_v51 = vadd.f32 %v5519_v42, %v260_v48  ;;  %v167_v61 = vadd.f32 1e-05, %v159_v27 }
 0x118   :  { %v4982_v52 = vpop.eup %4981  ;;  %v184_v55 = vmul.f32 %v4978_v28, %v183_v49  ;;  %v200_v56 = vmul.f32 %v4980_v50, %v164_v30  ;;  %vm206_vm12 = vweird.f32 %v4980_v50 }
 0x119   :  { %v210_v58 = vmul.f32 %v4982_v52, %v5505_v34  ;;  %4516 = vmatmul.msk.f32.vlgmr.msra.gmra.mxu0 %vm73_vm0, %v5527_v51  ;;  %v4984_v2 = vpop.eup %4983  ;;  %4985 = vrsqrt.f32 %v167_v61  ;;  %vm207_vm13 = vmor %vm205_vm11, %vm206_vm12  ;;  %vm216_vm15 = vweird.f32 %v4982_v52  ;;  %vm235_vm5 = vweird.f32 %v167_v61 }
 0x11a   :  { %v201_v59 = vmul.f32 %v4980_v50, %v200_v56  ;;  %v188_v60 = vsel %vm187_vm9, %v4978_v28, %v184_v55  ;;  %vm217_vm1 = vmor %vm215_vm14, %vm216_vm15  ;;  %vm226_vm3 = vweird.f32 %v4984_v2  ;;  %vm362_vm11 = vcmask 64512  }
 0x11b   :  { %v250_v62 = vmul.f32 %v188_v60, %v5448_v41  ;;  %v211_v0 = vmul.f32 %v4982_v52, %v210_v58  ;;  %v220_v41 = vmul.f32 %v4984_v2, %v5513_v38  ;;  %vm227_vm4 = vmor %vm225_vm2, %vm226_vm3  ;;  %vm505_vm12 = vcmask 130048  }
 0x11c   :  { %v202_v63 = vmul.f32 0.5, %v201_v59 }
 0x11d   :  { %v261_v3 = vmul.f32 %v5510_v35, %v250_v62  ;;  %v212_v9 = vmul.f32 0.5, %v211_v0  ;;  %v221_v10 = vmul.f32 %v4984_v2, %v220_v41 }
 0x11e   :  { %v203_v4 = vsub.f32 1.5, %v202_v63 }
 0x11f   :  { %v5543_v5 = vadd.f32 %v5519_v42, %v261_v3  ;;  %v213_v12 = vsub.f32 1.5, %v212_v9  ;;  %v4986_v14 = vpop.eup %4985  ;;  %v222_v16 = vmul.f32 0.5, %v221_v10 }
 0x120   :  { %v204_v7 = vmul.f32 %v4980_v50, %v203_v4  ;;  %v230_v18 = vmul.f32 %v4986_v14, %v167_v61  ;;  %vm236_vm6 = vweird.f32 %v4986_v14 }
 0x121   :  { %4517 = vmatmul.msk.f32.gmra.mxu0 %vm73_vm0, %v5543_v5  ;;  %v214_v17 = vmul.f32 %v4982_v52, %v213_v12  ;;  %v223_v21 = vsub.f32 1.5, %v222_v16  ;;  %vm237_vm7 = vmor %vm235_vm5, %vm236_vm6 }
 0x122   :  { %v208_v13 = vsel %vm207_vm13, %v4980_v50, %v204_v7  ;;  %v231_v22 = vmul.f32 %v4986_v14, %v230_v18 }
 0x123   :  { %v252_v26 = vmul.f32 %v208_v13, %v5454_v44  ;;  %v218_v23 = vsel %vm217_vm1, %v4982_v52, %v214_v17  ;;  %v224_v25 = vmul.f32 %v4984_v2, %v223_v21 }
 0x124   :  { %v253_v44 = vmul.f32 %v218_v23, %v5452_v43  ;;  %v232_v28 = vmul.f32 0.5, %v231_v22 }
 0x125   :  { %v263_v19 = vmul.f32 %v5510_v35, %v252_v26  ;;  %v228_v31 = vsel %vm227_vm4, %v4984_v2, %v224_v25 }
 0x126   :  { %v264_v29 = vmul.f32 %v5510_v35, %v253_v44  ;;  %v233_v30 = vsub.f32 1.5, %v232_v28  ;;  %v254_v33 = vmul.f32 %v228_v31, %v5443_v39 }
 0x127   :  { %v5560_v24 = vadd.f32 %v5519_v42, %v263_v19 }
 0x128   :  { %v5567_v32 = vadd.f32 %v5519_v42, %v264_v29  ;;  %v234_v34 = vmul.f32 %v4986_v14, %v233_v30  ;;  %v265_v43 = vmul.f32 %v5510_v35, %v254_v33 }
 0x129   :  { %4518 = vmatmul.msk.f32.gmra.mxu0 %vm73_vm0, %v5552_v15 }
 0x12a   :  { %v238_v36 = vsel %vm237_vm7, %v4986_v14, %v234_v34  ;;  %v5574_v37 = vadd.f32 %v5519_v42, %v265_v43 }
 0x12b   :  { %v255_v38 = vmul.f32 %v238_v36, %v5466_v53 }
 0x12d   :  { %v266_v40 = vmul.f32 %v5510_v35, %v255_v38 }
 0x12f   :  { %v5581_v39 = vadd.f32 %v5519_v42, %v266_v40 }
 0x131   :  { %4519 = vmatmul.msk.f32.gmra.mxu0 %vm73_vm0, %v5560_v24 }
 0x139   :  { %4520 = vmatmul.msk.f32.gmra.mxu0 %vm73_vm0, %v5567_v32 }
 0x141   :  { %4521 = vmatmul.msk.f32.gmra.mxu0 %vm73_vm0, %v5574_v37 }
 0x149   :  { %4522 = vmatmul.msk.f32.gmra.mxu0 %vm73_vm0, %v5581_v39 }
 0x17f   :  { %v152_v45 = vpop.xlane.xlu0 %151 }
 0x180   :  { %v160_v46 = vmul.f32 %v152_v45, %v5425_v20 }
 0x182   :  { %v168_v47 = vadd.f32 1e-05, %v160_v46 }
 0x184   :  { %4987 = vrsqrt.f32 %v168_v47  ;;  %vm245_vm9 = vweird.f32 %v168_v47 }
 0x18a   :  { %v4988_v48 = vpop.eup %4987 }
 0x18b   :  { %v240_v49 = vmul.f32 %v4988_v48, %v168_v47  ;;  %vm246_vm8 = vweird.f32 %v4988_v48 }
 0x18c   :  { %vm247_vm10 = vmor %vm245_vm9, %vm246_vm8 }
 0x18d   :  { %v241_v50 = vmul.f32 %v4988_v48, %v240_v49 }
 0x18f   :  { %v242_v53 = vmul.f32 0.5, %v241_v50 }
 0x191   :  { %v243_v27 = vsub.f32 1.5, %v242_v53 }
 0x193   :  { %v244_v52 = vmul.f32 %v4988_v48, %v243_v27 }
 0x195   :  { %v248_v55 = vsel %vm247_vm10, %v4988_v48, %v244_v52 }
 0x196   :  { %v328_v56 = vpop.f32.mrf.mxu0  ;;  %v256_v20 = vmul.f32 %v248_v55, %v5494_v11 }
 0x197   :  { %v5593_v57 = vadd.f32 %v5589_v54, %v328_v56 }
 0x198   :  { %v267_v58 = vmul.f32 %v5510_v35, %v256_v20 }
 0x199   :  { %358 = vrot.lane.b32.xlu2 %v5593_v57, %s5282_s20 }
 0x19a   :  { %v5599_v59 = vadd.f32 %v5519_v42, %v267_v58 }
 0x19c   :  { %4523 = vmatmul.msk.f32.gmra.mxu0 %vm73_vm0, %v5599_v59 }
 0x19e   :  { %v331_v60 = vpop.f32.mrf.mxu0 }
 0x19f   :  { %v5604_v61 = vadd.f32 %v5589_v54, %v331_v60 }
 0x1a1   :  { %360 = vrot.lane.b32.xlu1 %v5604_v61, %s5282_s20  ;;  %v5675_v38 = vpack.i.bf16 %v5593_v57, %v5604_v61 }
 0x1a6   :  { %v334_v11 = vpop.f32.mrf.mxu0 }
 0x1a7   :  { %v5632_v41 = vadd.f32 %v5589_v54, %v334_v11 }
 0x1ae   :  { %v337_v62 = vpop.f32.mrf.mxu0 }
 0x1af   :  { %v5609_v35 = vadd.f32 %v5589_v54, %v337_v62 }
 0x1b1   :  { %398 = vrot.lane.b32.xlu1 %v5609_v35, %s5282_s20 }
 0x1b6   :  { %v340_v42 = vpop.f32.mrf.mxu0 }
 0x1b7   :  { %v5665_v34 = vadd.f32 %v5589_v54, %v340_v42 }
 0x1be   :  { %v343_v63 = vpop.f32.mrf.mxu0 }
 0x1bf   :  { %v5653_v16 = vadd.f32 %v5589_v54, %v343_v63 }
 0x1c6   :  { %v346_v0 = vpop.f32.mrf.mxu0 }
 0x1c7   :  { %v5614_v1 = vadd.f32 %v5589_v54, %v346_v0 }
 0x1c9   :  { %470 = vrot.lane.b32.xlu2 %v5614_v1, %s5282_s20 }
 0x1f3   :  { %v359_v3 = vpop.permute.xlu2 %358 }
 0x213   :  { %v361_v2 = vpop.permute.xlu1 %360 }
 0x214   :  { %4524 = vmatpush.xpose.msk.msrb.mxu0 %vm362_vm11, %v361_v2  ;;  %4780 = vmatpush.xpose.msk.msra.mxu1 %vm362_vm11, %v361_v2 }
 0x218   :  { %4525 = vmatpush.xpose.msk.msrb.mxu0 %vm362_vm11, %v359_v3  ;;  %4781 = vmatpush.xpose.msk.msra.mxu1 %vm362_vm11, %v359_v3 }
 0x219   :  { %v349_v4 = vpop.f32.mrf.mxu0 }
 0x21a   :  { %v5623_v6 = vadd.f32 %v5589_v54, %v349_v4 }
 0x21b   :  { %4526 = vmatmul.msk.f32.vlgmr.msrb.gmra.mxu0 %vm362_vm11, %v5593_v57  ;;  %4527 = vmatmul.msk.f32.vlgmr.msra.gmra.mxu1 %vm362_vm11, %v5604_v61 }
 0x21c   :  { %472 = vrot.lane.b32.xlu0 %v5623_v6, %s5282_s20 }
 0x223   :  { %v399_v7 = vpop.permute.xlu1 %398  ;;  %v471_v8 = vpop.permute.xlu2 %470 }
 0x224   :  { %4528 = vmatpush.xpose.msk.msra.mxu2 %vm362_vm11, %v399_v7  ;;  %4782 = vmatpush.xpose.msk.msra.mxu3 %vm362_vm11, %v399_v7 }
 0x225   :  { %396 = vrot.lane.b32.xlu0 %v5632_v41, %s5282_s20 }
 0x28e   :  { %v473_v9 = vpop.permute.xlu0 %472 }
 0x28f   :  { %4536 = vmatpush.xpose.msk.msrb.mxu1 %vm362_vm11, %v473_v9 }
 0x293   :  { %4537 = vmatpush.xpose.msk.msrb.mxu1 %vm362_vm11, %v471_v8 }
 0x296   :  { %4538 = vmatmul.msk.f32.vlgmr.msrb.gmra.mxu1 %vm362_vm11, %v5614_v1 }
 0x297   :  { %v397_v10 = vpop.permute.xlu0 %396 }
 0x298   :  { %4529 = vmatpush.xpose.msk.msra.mxu2 %vm362_vm11, %v397_v10  ;;  %4783 = vmatpush.xpose.msk.msra.mxu3 %vm362_vm11, %v397_v10  ;;  %v388_v12 = vpop.f32.mrf.mxu0  ;;  %v391_v13 = vpop.f32.mrf.mxu1 }
 0x299   :  { %v509_v14 = vsel %vm505_vm12, %v391_v13, -inf  ;;  %v506_v26 = vsel %vm505_vm12, %v388_v12, -inf }
 0x29a   :  { %510 = vmax.xlane.f32.xlu1 %v509_v14  ;;  %507 = vmax.xlane.f32.xlu2 %v506_v26 }
 0x29b   :  { %4530 = vmatmul.msk.f32.vlgmr.msra.gmra.mxu2 %vm362_vm11, %v5632_v41  ;;  %4531 = vmatmul.msk.f32.vlgmr.msra.gmra.mxu3 %vm362_vm11, %v5609_v35 }
 0x29e   :  { %4539 = vmatmul.msk.f32.gmra.mxu1 %vm362_vm11, %v5623_v6 }
 0x2b3   :  { %435 = vrot.lane.b32.xlu1 %v5653_v16, %s5282_s20 }
 0x30d   :  { %v508_v17 = vpop.xlane.xlu2 %507  ;;  %v511_v23 = vpop.xlane.xlu1 %510 }
 0x30e   :  { %v530_v18 = vsub.f32 %v388_v12, %v508_v17  ;;  %v531_v44 = vsub.f32 %v391_v13, %v511_v23  ;;  %v5715_v17 = vpack.i.bf16 %v5614_v1, %v5623_v6 }
 0x310   :  { %v538_v22 = vmul.f32 1.442695, %v530_v18  ;;  %v540_v29 = vmul.f32 1.442695, %v531_v44 }
 0x312   :  { %4989 = vpow2.f32 %v538_v22 }
 0x313   :  { %v499_v19 = vpop.f32.mrf.mxu1  ;;  %4991 = vpow2.f32 %v540_v29 }
 0x314   :  { %v524_v21 = vsel %vm505_vm12, %v499_v19, -inf }
 0x315   :  { %525 = vmax.xlane.f32.xlu0 %v524_v21 }
 0x318   :  { %v5659_v30 = vpop.eup %4989 }
 0x319   :  { %v554_v31 = vsel %vm505_vm12, %v5659_v30, 0.0  ;;  %v5667_v43 = vpop.eup %4991 }
 0x31a   :  { %v557_v36 = vsel %vm505_vm12, %v5667_v43, 0.0 }
 0x31b   :  { %v502_v25 = vpop.f32.mrf.mxu1 }
 0x31c   :  { %v527_v28 = vsel %vm505_vm12, %v502_v25, -inf }
 0x31d   :  { %528 = vmax.xlane.f32.xlu2 %v527_v28 }
 0x31e   :  { %v5685_v40 = vpop.f32.mrf.mxu2 }
 0x31f   :  { %v512_v45 = vsel %vm505_vm12, %v5685_v40, -inf }
 0x325   :  { %v436_v33 = vpop.permute.xlu1 %435  ;;  %555 = vadd.xlane.f32.xlu2 %v554_v31  ;;  %v5726_v31 = vpop.f32.mrf.mxu3 }
 0x326   :  { %4532 = vmatpush.xpose.msk.msrb.mxu3 %vm362_vm11, %v436_v33  ;;  %v515_v33 = vsel %vm505_vm12, %v5726_v31, -inf }
 0x329   :  { %433 = vrot.lane.b32.xlu0 %v5665_v34, %s5282_s20 }
 0x32d   :  { %558 = vadd.xlane.f32.xlu2 %v557_v36 }
 0x331   :  { %4801 = vrot.lane.b32.xlu0 %v5675_v38, %s5283_s5 }
 0x339   :  { %922 = vrot.lane.b32.xlu0 %v5653_v16, %s5284_s21 }
 0x341   :  { %920 = vrot.lane.b32.xlu0 %v5665_v34, %s5284_s21 }
 0x349   :  { %916 = vrot.lane.b32.xlu0 %v5665_v34, %s5285_s1 }
 0x373   :  { %513 = vmax.xlane.f32.xlu0 %v512_v45 }
 0x387   :  { %844 = vrot.lane.b32.xlu0 %v5604_v61, %s5284_s21 }
 0x388   :  { %v526_v46 = vpop.xlane.xlu0 %525 }
 0x389   :  { %v536_v47 = vsub.f32 %v499_v19, %v526_v46 }
 0x38b   :  { %v550_v48 = vmul.f32 1.442695, %v536_v47 }
 0x38d   :  { %4993 = vpow2.f32 %v550_v48 }
 0x38f   :  { %840 = vrot.lane.b32.xlu0 %v5604_v61, %s5285_s1 }
 0x390   :  { %v529_v49 = vpop.xlane.xlu2 %528 }
 0x391   :  { %v537_v50 = vsub.f32 %v502_v25, %v529_v49 }
 0x393   :  { %v5693_v53 = vpop.eup %4993  ;;  %v552_v27 = vmul.f32 1.442695, %v537_v50 }
 0x394   :  { %v572_v52 = vsel %vm505_vm12, %v5693_v53, 0.0 }
 0x395   :  { %4995 = vpow2.f32 %v552_v27  ;;  %573 = vadd.xlane.f32.xlu2 %v572_v52 }
 0x397   :  { %961 = vrot.lane.b32.xlu0 %v5623_v6, %s5284_s21 }
 0x398   :  { %v556_v54 = vpop.xlane.xlu2 %555 }
 0x399   :  { %4997 = vrcp.f32 %v556_v54  ;;  %v589_v42 = vand.u32 2147483648, %v556_v54  ;;  %v587_v3 = vand.u32 2147483647, %v556_v54  ;;  %vm583_vm14 = vweird.f32 %v556_v54 }
 0x39b   :  { %v5699_v55 = vpop.eup %4995  ;;  %v434_v56 = vpop.permute.xlu0 %433  ;;  %v590_v8 = vor.u32 1.1754944e-38, %v589_v42  ;;  %vm588_vm1 = vcmp.eq.f32.partialorder %v587_v3, 8.507059e+37 }
 0x39c   :  { %4533 = vmatpush.xpose.msk.msrb.mxu3 %vm362_vm11, %v434_v56  ;;  %v575_v20 = vsel %vm505_vm12, %v5699_v55, 0.0 }
 0x39d   :  { %576 = vadd.xlane.f32.xlu1 %v575_v20 }
 0x39f   :  { %v4998_v58 = vpop.eup %4997  ;;  %959 = vrot.lane.b32.xlu0 %v5614_v1, %s5284_s21  ;;  %4534 = vmatmul.msk.f32.vlgmr.msrb.gmra.mxu3 %vm362_vm11, %v5665_v34 }
 0x3a0   :  { %v579_v60 = vmul.f32 %v4998_v58, %v556_v54  ;;  %v559_v11 = vpop.xlane.xlu2 %558  ;;  %vm584_vm13 = vweird.f32 %v4998_v58 }
 0x3a1   :  { %4999 = vrcp.f32 %v559_v11  ;;  %vm585_vm15 = vmor %vm583_vm14, %vm584_vm13  ;;  %v604_v18 = vand.u32 2147483648, %v559_v11  ;;  %v602_v21 = vand.u32 2147483647, %v559_v11  ;;  %vm598_vm3 = vweird.f32 %v559_v11 }
 0x3a2   :  { %v580_v62 = vsub.f32 1.0, %v579_v60 }
 0x3a3   :  { %v4802_v63 = vpop.permute.xlu0 %4801  ;;  %v605_v23 = vor.u32 1.1754944e-38, %v604_v18  ;;  %vm603_vm5 = vcmp.eq.f32.partialorder %v602_v21, 8.507059e+37 }
 0x3a4   :  { %v581_v0 = vmul.f32 %v4998_v58, %v580_v62  ;;  %v4803_v2 = vunpack.i.l.bf16 %v4802_v63  ;;  %v4804_v4 = vunpack.i.h.bf16 %v4802_v63 }
 0x3a6   :  { %724 = vmatpush.msrb.mxu2 %v4803_v2  ;;  %v582_v7 = vadd.f32 %v4998_v58, %v581_v0 }
 0x3a7   :  { %v5000_v9 = vpop.eup %4999  ;;  %955 = vrot.lane.b32.xlu0 %v5614_v1, %s5285_s1  ;;  %4535 = vmatmul.msk.f32.gmra.mxu3 %vm362_vm11, %v5653_v16 }
 0x3a8   :  { %v594_v10 = vmul.f32 %v5000_v9, %v559_v11  ;;  %725 = vmatpush.msrb.mxu2 %v4804_v4  ;;  %v586_v12 = vsel %vm585_vm15, %v4998_v58, %v582_v7  ;;  %vm599_vm2 = vweird.f32 %v5000_v9 }
 0x3a9   :  { %v591_v13 = vsel %vm588_vm1, %v590_v8, %v586_v12  ;;  %vm600_vm4 = vmor %vm598_vm3, %vm599_vm2 }
 0x3aa   :  { %v595_v14 = vsub.f32 1.0, %v594_v10  ;;  %v592_v26 = vmul.f32 %v5659_v30, %v591_v13 }
 0x3ab   :  { %v923_v29 = vpop.permute.xlu0 %922 }
 0x3ac   :  { %4540 = vmatmul.msk.f32.vlgmr.msrb.gmra.mxu2 %vm505_vm12, %v592_v26  ;;  %v596_v19 = vmul.f32 %v5000_v9, %v595_v14 }
 0x3ad   :  { %4806 = vrot.lane.b32.xlu2 %v5715_v17, %s5283_s5 }
 0x3ae   :  { %v597_v22 = vadd.f32 %v5000_v9, %v596_v19 }
 0x3af   :  { %957 = vrot.lane.b32.xlu0 %v5623_v6, %s5285_s1 }
 0x3b0   :  { %v601_v44 = vsel %vm600_vm4, %v5000_v9, %v597_v22 }
 0x3b1   :  { %v606_v25 = vsel %vm603_vm5, %v605_v23, %v601_v44 }
 0x3b2   :  { %v607_v28 = vmul.f32 %v5667_v43, %v606_v25 }
 0x3b3   :  { %v921_v30 = vpop.permute.xlu0 %920 }
 0x3b4   :  { %4541 = vmatmul.msk.f32.gmra.mxu2 %vm505_vm12, %v607_v28 }
 0x3b5   :  { %918 = vrot.lane.b32.xlu2 %v5653_v16, %s5285_s1 }
 0x3bb   :  { %v917_v36 = vpop.permute.xlu0 %916 }
 0x3de   :  { %516 = vmax.xlane.f32.xlu2 %v515_v33 }
 0x3e6   :  { %v514_v45 = vpop.xlane.xlu0 %513 }
 0x3e7   :  { %v532_v46 = vsub.f32 %v5685_v40, %v514_v45 }
 0x3e9   :  { %v542_v47 = vmul.f32 1.442695, %v532_v46 }
 0x3eb   :  { %5001 = vpow2.f32 %v542_v47 }
 0x3f1   :  { %v5731_v43 = vpop.eup %5001 }
 0x3f2   :  { %v560_v48 = vsel %vm505_vm12, %v5731_v43, 0.0 }
 0x3f3   :  { %561 = vadd.xlane.f32.xlu1 %v560_v48 }
 0x3f6   :  { %842 = vrot.lane.b32.xlu2 %v5593_v57, %s5284_s21 }
 0x408   :  { %v574_v49 = vpop.xlane.xlu2 %573 }
 0x409   :  { %5003 = vrcp.f32 %v574_v49  ;;  %v679_v20 = vand.u32 2147483648, %v574_v49  ;;  %v677_v11 = vand.u32 2147483647, %v574_v49  ;;  %vm673_vm7 = vweird.f32 %v574_v49 }
 0x40b   :  { %v680_v63 = vor.u32 1.1754944e-38, %v679_v20  ;;  %vm678_vm9 = vcmp.eq.f32.partialorder %v677_v11, 8.507059e+37 }
 0x40f   :  { %v5004_v50 = vpop.eup %5003 }
 0x410   :  { %v669_v27 = vmul.f32 %v5004_v50, %v574_v49  ;;  %v577_v52 = vpop.xlane.xlu1 %576  ;;  %v4807_v54 = vpop.permute.xlu2 %4806  ;;  %vm674_vm6 = vweird.f32 %v5004_v50 }
 0x411   :  { %5005 = vrcp.f32 %v577_v52  ;;  %v4808_v56 = vunpack.i.l.bf16 %v4807_v54  ;;  %v4809_v58 = vunpack.i.h.bf16 %v4807_v54  ;;  %vm675_vm8 = vmor %vm673_vm7, %vm674_vm6  ;;  %v694_v9 = vand.u32 2147483648, %v577_v52 }
 0x412   :  { %v670_v40 = vsub.f32 1.0, %v669_v27  ;;  %v692_v10 = vand.u32 2147483647, %v577_v52  ;;  %vm688_vm13 = vweird.f32 %v577_v52 }
 0x413   :  { %829 = vmatpush.msra.mxu2 %v4808_v56  ;;  %v695_v13 = vor.u32 1.1754944e-38, %v694_v9 }
 0x414   :  { %v671_v60 = vmul.f32 %v5004_v50, %v670_v40  ;;  %vm693_vm15 = vcmp.eq.f32.partialorder %v692_v10, 8.507059e+37  ;;  %v5787_v40 = vpack.i.bf16 %v5665_v34, %v5653_v16 }
 0x415   :  { %830 = vmatpush.msra.mxu2 %v4809_v58 }
 0x416   :  { %v672_v62 = vadd.f32 %v5004_v50, %v671_v60 }
 0x417   :  { %4556 = vmatpush.xpose.msk.msrb.mxu2 %vm362_vm11, %v923_v29  ;;  %v5006_v42 = vpop.eup %5005  ;;  %v5757_v29 = vpack.i.bf16 %v5632_v41, %v5609_v35 }
 0x418   :  { %v676_v0 = vsel %vm675_vm8, %v5004_v50, %v672_v62  ;;  %v684_v2 = vmul.f32 %v5006_v42, %v577_v52  ;;  %vm689_vm10 = vweird.f32 %v5006_v42  ;;  %v919_v22 = vpop.permute.xlu2 %918  ;;  %v845_v62 = vpop.permute.xlu0 %844 }
 0x419   :  { %v681_v3 = vsel %vm678_vm9, %v680_v63, %v676_v0  ;;  %vm690_vm14 = vmor %vm688_vm13, %vm689_vm10 }
 0x41a   :  { %v685_v4 = vsub.f32 1.0, %v684_v2  ;;  %v682_v7 = vmul.f32 %v5693_v53, %v681_v3 }
 0x41b   :  { %4557 = vmatpush.xpose.msk.msrb.mxu2 %vm362_vm11, %v921_v30 }
 0x41c   :  { %4546 = vmatmul.msk.f32.vlgmr.msra.gmra.mxu2 %vm505_vm12, %v682_v7  ;;  %v686_v8 = vmul.f32 %v5006_v42, %v685_v4 }
 0x41e   :  { %v687_v12 = vadd.f32 %v5006_v42, %v686_v8 }
 0x420   :  { %v691_v14 = vsel %vm690_vm14, %v5006_v42, %v687_v12  ;;  %v841_v7 = vpop.permute.xlu0 %840 }
 0x421   :  { %v696_v26 = vsel %vm693_vm15, %v695_v13, %v691_v14 }
 0x422   :  { %v5741_v18 = vpop.f32.mrf.mxu3  ;;  %v697_v19 = vmul.f32 %v5699_v55, %v696_v26 }
 0x423   :  { %v518_v49 = vsel %vm505_vm12, %v5741_v18, -inf }
 0x424   :  { %4547 = vmatmul.msk.f32.gmra.mxu2 %vm505_vm12, %v697_v19 }
 0x42a   :  { %v465_v53 = vpop.f32.mrf.mxu3 }
 0x42b   :  { %v521_v21 = vsel %vm505_vm12, %v465_v53, -inf }
 0x42c   :  { %522 = vmax.xlane.f32.xlu2 %v521_v21  ;;  %4558 = vmatmul.msk.f32.vlgmr.msrb.gmra.mxu2 %vm362_vm11, %v917_v36 }
 0x42f   :  { %v5763_v30 = vpop.f32.mrf.mxu2 }
 0x434   :  { %4559 = vmatmul.msk.f32.gmra.mxu2 %vm362_vm11, %v919_v22 }
 0x444   :  { %883 = vrot.lane.b32.xlu2 %v5609_v35, %s5284_s21 }
 0x451   :  { %v517_v23 = vpop.xlane.xlu2 %516 }
 0x452   :  { %v533_v44 = vsub.f32 %v5726_v31, %v517_v23  ;;  %v5765_v31 = vpop.f32.mrf.mxu2 }
 0x454   :  { %v544_v25 = vmul.f32 1.442695, %v533_v44 }
 0x456   :  { %5007 = vpow2.f32 %v544_v25  ;;  %v962_v25 = vpop.permute.xlu0 %961 }
 0x459   :  { %v5767_v33 = vpop.permute.xlu2 %842 }
 0x45c   :  { %v5751_v55 = vpop.eup %5007 }
 0x45d   :  { %v563_v28 = vsel %vm505_vm12, %v5751_v55, 0.0 }
 0x45e   :  { %564 = vadd.xlane.f32.xlu1 %v563_v28 }
 0x466   :  { %v562_v20 = vpop.xlane.xlu1 %561 }
 0x467   :  { %v619_v9 = vand.u32 2147483648, %v562_v20  ;;  %vm613_vm2 = vweird.f32 %v562_v20  ;;  %v617_v8 = vand.u32 2147483647, %v562_v20 }
 0x469   :  { %v620_v13 = vor.u32 1.1754944e-38, %v619_v9  ;;  %vm618_vm4 = vcmp.eq.f32.partialorder %v617_v8, 8.507059e+37 }
 0x477   :  { %4811 = vrot.lane.b32.xlu1 %v5757_v29, %s5283_s5 }
 0x47f   :  { %838 = vrot.lane.b32.xlu1 %v5593_v57, %s5285_s1 }
 0x49f   :  { %v523_v36 = vpop.xlane.xlu2 %522  ;;  %v5769_v45 = vpop.f32.mrf.mxu2 }
 0x4a0   :  { %v535_v46 = vsub.f32 %v465_v53, %v523_v36 }
 0x4a2   :  { %v548_v47 = vmul.f32 1.442695, %v535_v46 }
 0x4a4   :  { %5009 = vpow2.f32 %v548_v47 }
 0x4a5   :  { %5011 = vrcp.f32 %v562_v20 }
 0x4a7   :  { %v5771_v48 = vpop.f32.mrf.mxu2 }
 0x4a9   :  { %519 = vmax.xlane.f32.xlu1 %v518_v49  ;;  %v960_v49 = vpop.permute.xlu0 %959 }
 0x4aa   :  { %v5775_v50 = vpop.eup %5009 }
 0x4ab   :  { %v569_v52 = vsel %vm505_vm12, %v5775_v50, 0.0  ;;  %v5012_v60 = vpop.eup %5011 }
 0x4ac   :  { %v609_v11 = vmul.f32 %v5012_v60, %v562_v20  ;;  %vm614_vm1 = vweird.f32 %v5012_v60 }
 0x4ad   :  { %vm615_vm3 = vmor %vm613_vm2, %vm614_vm1 }
 0x4ae   :  { %v610_v42 = vsub.f32 1.0, %v609_v11 }
 0x4af   :  { %v5777_v27 = vpop.f32.mrf.mxu2 }
 0x4b0   :  { %v611_v0 = vmul.f32 %v5012_v60, %v610_v42  ;;  %v1006_v47 = vsel %vm505_vm12, %v5777_v27, -inf }
 0x4b1   :  { %570 = vadd.xlane.f32.xlu1 %v569_v52 }
 0x4b2   :  { %v612_v3 = vadd.f32 %v5012_v60, %v611_v0 }
 0x4b4   :  { %v616_v10 = vsel %vm615_vm3, %v5012_v60, %v612_v3  ;;  %v884_v60 = vpop.permute.xlu2 %883 }
 0x4b5   :  { %v621_v19 = vsel %vm618_vm4, %v620_v13, %v616_v10 }
 0x4b6   :  { %v622_v23 = vmul.f32 %v5731_v43, %v621_v19 }
 0x4b7   :  { %v5781_v54 = vpop.f32.mrf.mxu2 }
 0x4b8   :  { %v1009_v56 = vsel %vm505_vm12, %v5781_v54, -inf }
 0x4b9   :  { %1010 = vmax.xlane.f32.xlu2 %v1009_v56  ;;  %v956_v56 = vpop.permute.xlu0 %955 }
 0x4ca   :  { %4816 = vrot.lane.b32.xlu1 %v5787_v40, %s5283_s5 }
 0x4d1   :  { %879 = vrot.lane.b32.xlu2 %v5609_v35, %s5285_s1  ;;  %v565_v58 = vpop.xlane.xlu1 %564 }
 0x4d2   :  { %5013 = vrcp.f32 %v565_v58  ;;  %v634_v22 = vand.u32 2147483648, %v565_v58  ;;  %vm628_vm6 = vweird.f32 %v565_v58  ;;  %v632_v44 = vand.u32 2147483647, %v565_v58 }
 0x4d4   :  { %v635_v36 = vor.u32 1.1754944e-38, %v634_v22  ;;  %vm633_vm8 = vcmp.eq.f32.partialorder %v632_v44, 8.507059e+37 }
 0x4d8   :  { %v5014_v63 = vpop.eup %5013 }
 0x4d9   :  { %v624_v2 = vmul.f32 %v5014_v63, %v565_v58  ;;  %vm629_vm5 = vweird.f32 %v5014_v63 }
 0x4da   :  { %vm630_vm7 = vmor %vm628_vm6, %vm629_vm5 }
 0x4db   :  { %v625_v4 = vsub.f32 1.0, %v624_v2 }
 0x4dd   :  { %v626_v12 = vmul.f32 %v5014_v63, %v625_v4 }
 0x4df   :  { %v627_v53 = vadd.f32 %v5014_v63, %v626_v12 }
 0x4e1   :  { %v631_v28 = vsel %vm630_vm7, %v5014_v63, %v627_v53 }
 0x4e2   :  { %v636_v46 = vsel %vm633_vm8, %v635_v36, %v631_v28 }
 0x4e3   :  { %v637_v43 = vmul.f32 %v5751_v55, %v636_v46 }
 0x4e9   :  { %v4812_v14 = vpop.permute.xlu1 %4811 }
 0x4ea   :  { %v4813_v26 = vunpack.i.l.bf16 %v4812_v14  ;;  %v4814_v21 = vunpack.i.h.bf16 %v4812_v14 }
 0x4ec   :  { %759 = vmatpush.msra.mxu3 %v4813_v26 }
 0x4ee   :  { %760 = vmatpush.msra.mxu3 %v4814_v21 }
 0x4ef   :  { %4542 = vmatmul.msk.f32.vlgmr.msra.gmra.mxu3 %vm505_vm12, %v622_v23 }
 0x4f0   :  { %4548 = vmatpush.xpose.msk.msrb.mxu3 %vm362_vm11, %v845_v62 }
 0x4f1   :  { %v839_v52 = vpop.permute.xlu1 %838 }
 0x4f4   :  { %4549 = vmatpush.xpose.msk.msrb.mxu3 %vm362_vm11, %v5767_v33  ;;  %1007 = vmax.xlane.f32.xlu1 %v1006_v47  ;;  %v958_v33 = vpop.permute.xlu0 %957 }
 0x4f7   :  { %4543 = vmatmul.msk.f32.gmra.mxu3 %vm505_vm12, %v637_v43 }
 0x4f8   :  { %4560 = vmatpush.xpose.msk.msra.mxu3 %vm362_vm11, %v962_v25 }
 0x4fc   :  { %4561 = vmatpush.xpose.msk.msra.mxu3 %vm362_vm11, %v960_v49 }
 0x4ff   :  { %4550 = vmatmul.msk.f32.vlgmr.msrb.gmra.mxu3 %vm362_vm11, %v839_v52 }
 0x507   :  { %4551 = vmatmul.msk.f32.gmra.mxu3 %vm362_vm11, %v841_v7 }
 0x50d   :  { %877 = vrot.lane.b32.xlu1 %v5632_v41, %s5285_s1 }
 0x50f   :  { %4562 = vmatmul.msk.f32.vlgmr.msra.gmra.mxu3 %vm362_vm11, %v956_v56 }
 0x517   :  { %4563 = vmatmul.msk.f32.gmra.mxu3 %vm362_vm11, %v958_v33 }
 0x51c   :  { %v520_v55 = vpop.xlane.xlu1 %519 }
 0x51d   :  { %v534_v20 = vsub.f32 %v5741_v18, %v520_v55 }
 0x51f   :  { %v546_v58 = vmul.f32 1.442695, %v534_v20 }
 0x521   :  { %5015 = vpow2.f32 %v546_v58 }
 0x524   :  { %v5816_v2 = vpop.xlane.xlu1 %570 }
 0x525   :  { %vm658_vm1 = vweird.f32 %v5816_v2 }
 0x527   :  { %v5811_v11 = vpop.eup %5015 }
 0x528   :  { %v566_v62 = vsel %vm505_vm12, %v5811_v11, 0.0 }
 0x529   :  { %567 = vadd.xlane.f32.xlu0 %v566_v62 }
 0x52c   :  { %v1011_v42 = vpop.xlane.xlu2 %1010 }
 0x52d   :  { %v1023_v63 = vsub.f32 %v5781_v54, %v1011_v42 }
 0x52f   :  { %v1036_v0 = vmul.f32 1.442695, %v1023_v63  ;;  %v664_v63 = vand.u32 2147483648, %v5816_v2 }
 0x531   :  { %5017 = vpow2.f32 %v1036_v0 }
 0x537   :  { %v5818_v3 = vpop.eup %5017 }
 0x538   :  { %v1057_v18 = vsel %vm505_vm12, %v5818_v3, 0.0 }
 0x539   :  { %1058 = vadd.xlane.f32.xlu2 %v1057_v18  ;;  %v662_v18 = vand.u32 2147483647, %v5816_v2 }
 0x53b   :  { %vm663_vm3 = vcmp.eq.f32.partialorder %v662_v18, 8.507059e+37 }
 0x53c   :  { %v4817_v4 = vpop.permute.xlu1 %4816 }
 0x53d   :  { %v4818_v7 = vunpack.i.l.bf16 %v4817_v4  ;;  %881 = vrot.lane.b32.xlu0 %v5632_v41, %s5284_s21  ;;  %v4819_v9 = vunpack.i.h.bf16 %v4817_v4 }
 0x53f   :  { %794 = vmatpush.msra.mxu1 %v4818_v7 }
 0x541   :  { %795 = vmatpush.msra.mxu1 %v4819_v9  ;;  %v665_v9 = vor.u32 1.1754944e-38, %v664_v63 }
 0x543   :  { %4552 = vmatpush.xpose.msk.msrb.mxu1 %vm362_vm11, %v884_v60 }
 0x545   :  { %4821 = vrot.lane.b32.xlu0 %v5787_v40, %s5286_s22 }
 0x54d   :  { %1462 = vrot.lane.b32.xlu0 %v5604_v61, %s5287_s2 }
 0x551   :  { %1540 = vrot.lane.b32.xlu2 %v5653_v16, %s5287_s2 }
 0x555   :  { %1460 = vrot.lane.b32.xlu0 %v5593_v57, %s5287_s2 }
 0x55d   :  { %1456 = vrot.lane.b32.xlu0 %v5593_v57, %s5288_s23 }
 0x565   :  { %1538 = vrot.lane.b32.xlu0 %v5665_v34, %s5287_s2 }
 0x567   :  { %v1008_v54 = vpop.xlane.xlu1 %1007 }
 0x568   :  { %v1022_v8 = vsub.f32 %v5777_v27, %v1008_v54 }
 0x56a   :  { %v1034_v10 = vmul.f32 1.442695, %v1022_v8 }
 0x56c   :  { %5019 = vpow2.f32 %v1034_v10 }
 0x56d   :  { %1534 = vrot.lane.b32.xlu0 %v5665_v34, %s5288_s23  ;;  %5021 = vrcp.f32 %v5816_v2 }
 0x572   :  { %v5840_v12 = vpop.eup %5019  ;;  %v5842_v13 = vpop.f32.mrf.mxu3 }
 0x573   :  { %v1054_v14 = vsel %vm505_vm12, %v5840_v12, 0.0  ;;  %v5022_v25 = vpop.eup %5021 }
 0x574   :  { %1055 = vadd.xlane.f32.xlu1 %v1054_v14  ;;  %v654_v36 = vmul.f32 %v5022_v25, %v5816_v2  ;;  %vm659_vm15 = vweird.f32 %v5022_v25 }
 0x575   :  { %1536 = vrot.lane.b32.xlu0 %v5653_v16, %s5288_s23  ;;  %vm660_vm2 = vmor %vm658_vm1, %vm659_vm15 }
 0x576   :  { %v655_v47 = vsub.f32 1.0, %v654_v36 }
 0x578   :  { %v656_v55 = vmul.f32 %v5022_v25, %v655_v47 }
 0x57a   :  { %v5848_v26 = vpop.f32.mrf.mxu3  ;;  %v657_v62 = vadd.f32 %v5022_v25, %v656_v55 }
 0x57c   :  { %v661_v7 = vsel %vm660_vm2, %v5022_v25, %v657_v62 }
 0x57d   :  { %v666_v54 = vsel %vm663_vm3, %v665_v9, %v661_v7 }
 0x57e   :  { %v667_v10 = vmul.f32 %v5775_v50, %v666_v54 }
 0x582   :  { %v5850_v19 = vpop.f32.mrf.mxu3 }
 0x583   :  { %v994_v27 = vsel %vm505_vm12, %v5850_v19, -inf }
 0x584   :  { %995 = vmax.xlane.f32.xlu2 %v994_v27  ;;  %v878_v27 = vpop.permute.xlu1 %877 }
 0x58a   :  { %v5854_v53 = vpop.f32.mrf.mxu3 }
 0x58b   :  { %v997_v8 = vsel %vm505_vm12, %v5854_v53, -inf }
 0x58d   :  { %1458 = vrot.lane.b32.xlu1 %v5604_v61, %s5288_s23 }
 0x592   :  { %v5858_v21 = vpop.f32.mrf.mxu3 }
 0x593   :  { %v1012_v28 = vsel %vm505_vm12, %v5858_v21, -inf }
 0x59a   :  { %v5861_v22 = vpop.f32.mrf.mxu3 }
 0x59b   :  { %v1015_v23 = vsel %vm505_vm12, %v5861_v22, -inf }
 0x59c   :  { %v568_v44 = vpop.xlane.xlu0 %567  ;;  %1016 = vmax.xlane.f32.xlu2 %v1015_v23 }
 0x59d   :  { %5023 = vrcp.f32 %v568_v44  ;;  %v649_v52 = vand.u32 2147483648, %v568_v44  ;;  %v647_v33 = vand.u32 2147483647, %v568_v44  ;;  %vm643_vm10 = vweird.f32 %v568_v44 }
 0x59f   :  { %1013 = vmax.xlane.f32.xlu0 %v1012_v28  ;;  %v650_v58 = vor.u32 1.1754944e-38, %v649_v52  ;;  %vm648_vm14 = vcmp.eq.f32.partialorder %v647_v33, 8.507059e+37 }
 0x5a3   :  { %v5024_v46 = vpop.eup %5023 }
 0x5a4   :  { %v639_v43 = vmul.f32 %v5024_v46, %v568_v44  ;;  %vm644_vm9 = vweird.f32 %v5024_v46  ;;  %v880_v44 = vpop.permute.xlu2 %879 }
 0x5a5   :  { %vm645_vm13 = vmor %vm643_vm10, %vm644_vm9 }
 0x5a6   :  { %v640_v49 = vsub.f32 1.0, %v639_v43 }
 0x5a8   :  { %v641_v56 = vmul.f32 %v5024_v46, %v640_v49 }
 0x5aa   :  { %v642_v20 = vadd.f32 %v5024_v46, %v641_v56 }
 0x5ac   :  { %v646_v60 = vsel %vm645_vm13, %v5024_v46, %v642_v20  ;;  %v1059_v50 = vpop.xlane.xlu2 %1058 }
 0x5ad   :  { %v651_v42 = vsel %vm648_vm14, %v650_v58, %v646_v60  ;;  %5025 = vrcp.f32 %v1059_v50  ;;  %v1152_v54 = vand.u32 2147483648, %v1059_v50  ;;  %vm1146_vm9 = vweird.f32 %v1059_v50 }
 0x5ae   :  { %v652_v0 = vmul.f32 %v5811_v11, %v651_v42 }
 0x5af   :  { %v882_v4 = vpop.permute.xlu0 %881 }
 0x5b0   :  { %4544 = vmatmul.msk.f32.vlgmr.msra.gmra.mxu1 %vm505_vm12, %v652_v0 }
 0x5b1   :  { %4553 = vmatpush.xpose.msk.msrb.mxu1 %vm362_vm11, %v882_v4 }
 0x5b3   :  { %v5026_v36 = vpop.eup %5025 }
 0x5b4   :  { %v1142_v46 = vmul.f32 %v5026_v36, %v1059_v50  ;;  %v1541_v52 = vpop.permute.xlu2 %1540  ;;  %vm1147_vm8 = vweird.f32 %v5026_v36 }
 0x5b5   :  { %vm1148_vm10 = vmor %vm1146_vm9, %vm1147_vm8 }
 0x5b6   :  { %v1143_v49 = vsub.f32 1.0, %v1142_v46 }
 0x5b7   :  { %v4822_v11 = vpop.permute.xlu0 %4821  ;;  %998 = vmax.xlane.f32.xlu1 %v997_v8 }
 0x5b8   :  { %v4823_v14 = vunpack.i.l.bf16 %v4822_v11  ;;  %4545 = vmatmul.msk.f32.gmra.mxu1 %vm505_vm12, %v667_v10  ;;  %v4824_v2 = vunpack.i.h.bf16 %v4822_v11  ;;  %v1144_v60 = vmul.f32 %v5026_v36, %v1143_v49  ;;  %v1150_v10 = vand.u32 2147483647, %v1059_v50 }
 0x5ba   :  { %1282 = vmatpush.msra.mxu2 %v4823_v14  ;;  %v1145_v4 = vadd.f32 %v5026_v36, %v1144_v60  ;;  %vm1151_vm13 = vcmp.eq.f32.partialorder %v1150_v10, 8.507059e+37 }
 0x5bc   :  { %1283 = vmatpush.msra.mxu2 %v4824_v2  ;;  %v1149_v14 = vsel %vm1148_vm10, %v5026_v36, %v1145_v4  ;;  %v1153_v2 = vor.u32 1.1754944e-38, %v1152_v54 }
 0x5bf   :  { %v1463_v23 = vpop.permute.xlu0 %1462 }
 0x5c0   :  { %4554 = vmatmul.msk.f32.vlgmr.msrb.gmra.mxu1 %vm362_vm11, %v878_v27  ;;  %4588 = vmatpush.xpose.msk.msrb.mxu2 %vm362_vm11, %v1463_v23  ;;  %v1154_v27 = vsel %vm1151_vm13, %v1153_v2, %v1149_v14 }
 0x5c7   :  { %v1461_v25 = vpop.permute.xlu0 %1460 }
 0x5c8   :  { %4555 = vmatmul.msk.f32.gmra.mxu1 %vm362_vm11, %v880_v44  ;;  %4589 = vmatpush.xpose.msk.msrb.mxu2 %vm362_vm11, %v1461_v25 }
 0x5cf   :  { %v1457_v47 = vpop.permute.xlu0 %1456 }
 0x5d7   :  { %v1539_v42 = vpop.permute.xlu0 %1538 }
 0x5df   :  { %v1535_v23 = vpop.permute.xlu0 %1534 }
 0x5e7   :  { %v1056_v28 = vpop.xlane.xlu1 %1055  ;;  %v1537_v25 = vpop.permute.xlu0 %1536 }
 0x5e8   :  { %5027 = vrcp.f32 %v1056_v28  ;;  %v1137_v55 = vand.u32 2147483648, %v1056_v28  ;;  %v1135_v58 = vand.u32 2147483647, %v1056_v28  ;;  %vm1131_vm5 = vweird.f32 %v1056_v28 }
 0x5ea   :  { %v1138_v63 = vor.u32 1.1754944e-38, %v1137_v55  ;;  %vm1136_vm7 = vcmp.eq.f32.partialorder %v1135_v58, 8.507059e+37 }
 0x5ee   :  { %v5028_v43 = vpop.eup %5027 }
 0x5ef   :  { %v1127_v56 = vmul.f32 %v5028_v43, %v1056_v28  ;;  %vm1132_vm4 = vweird.f32 %v5028_v43 }
 0x5f0   :  { %vm1133_vm6 = vmor %vm1131_vm5, %vm1132_vm4 }
 0x5f1   :  { %v1128_v33 = vsub.f32 1.0, %v1127_v56 }
 0x5f3   :  { %v1129_v20 = vmul.f32 %v5028_v43, %v1128_v33 }
 0x5f5   :  { %v1130_v62 = vadd.f32 %v5028_v43, %v1129_v20 }
 0x5f7   :  { %v1134_v0 = vsel %vm1133_vm6, %v5028_v43, %v1130_v62  ;;  %v996_v18 = vpop.xlane.xlu2 %995 }
 0x5f8   :  { %v1139_v7 = vsel %vm1136_vm7, %v1138_v63, %v1134_v0  ;;  %v1018_v9 = vsub.f32 %v5850_v19, %v996_v18  ;;  %v1155_v19 = vmul.f32 %v5818_v3, %v1154_v27 }
 0x5f9   :  { %v1140_v8 = vmul.f32 %v5840_v12, %v1139_v7 }
 0x5fa   :  { %v1026_v11 = vmul.f32 1.442695, %v1018_v9 }
 0x5fb   :  { %4568 = vmatmul.msk.f32.vlgmr.msra.gmra.mxu2 %vm505_vm12, %v1140_v8 }
 0x5fc   :  { %5029 = vpow2.f32 %v1026_v11  ;;  %4596 = vmatpush.xpose.msk.msra.mxu2 %vm362_vm11, %v1541_v52 }
 0x5ff   :  { %v1459_v50 = vpop.permute.xlu1 %1458 }
 0x600   :  { %4597 = vmatpush.xpose.msk.msra.mxu2 %vm362_vm11, %v1539_v42 }
 0x602   :  { %v5888_v44 = vpop.eup %5029 }
 0x603   :  { %4569 = vmatmul.msk.f32.gmra.mxu2 %vm505_vm12, %v1155_v19  ;;  %v1042_v12 = vsel %vm505_vm12, %v5888_v44, 0.0 }
 0x604   :  { %1043 = vadd.xlane.f32.xlu1 %v1042_v12 }
 0x60b   :  { %4590 = vmatmul.msk.f32.vlgmr.msrb.gmra.mxu2 %vm362_vm11, %v1457_v47 }
 0x612   :  { %v1014_v28 = vpop.xlane.xlu0 %1013 }
 0x613   :  { %v1024_v36 = vsub.f32 %v5858_v21, %v1014_v28  ;;  %4591 = vmatmul.msk.f32.gmra.mxu2 %vm362_vm11, %v1459_v50  ;;  %v1017_v21 = vpop.xlane.xlu2 %1016 }
 0x614   :  { %v1025_v52 = vsub.f32 %v5861_v22, %v1017_v21 }
 0x615   :  { %v1038_v46 = vmul.f32 1.442695, %v1024_v36 }
 0x616   :  { %v1040_v55 = vmul.f32 1.442695, %v1025_v52 }
 0x617   :  { %5031 = vpow2.f32 %v1038_v46 }
 0x61b   :  { %4598 = vmatmul.msk.f32.vlgmr.msra.gmra.mxu2 %vm362_vm11, %v1535_v23 }
 0x61d   :  { %v5897_v3 = vpop.eup %5031  ;;  %4826 = vrot.lane.b32.xlu1 %v5675_v38, %s5286_s22 }
 0x61e   :  { %v1060_v43 = vsel %vm505_vm12, %v5897_v3, 0.0 }
 0x61f   :  { %1061 = vadd.xlane.f32.xlu2 %v1060_v43 }
 0x623   :  { %4599 = vmatmul.msk.f32.gmra.mxu2 %vm362_vm11, %v1537_v25 }
 0x625   :  { %1499 = vrot.lane.b32.xlu1 %v5632_v41, %s5287_s2 }
 0x62a   :  { %v999_v47 = vpop.xlane.xlu1 %998 }
 0x62b   :  { %v1019_v49 = vsub.f32 %v5854_v53, %v999_v47 }
 0x62d   :  { %v1028_v56 = vmul.f32 1.442695, %v1019_v49  ;;  %v5908_v33 = vpop.f32.mrf.mxu1  ;;  %1497 = vrot.lane.b32.xlu1 %v5609_v35, %s5288_s23 }
 0x62f   :  { %5033 = vpow2.f32 %v1028_v56 }
 0x630   :  { %5035 = vpow2.f32 %v1040_v55 }
 0x635   :  { %v5912_v20 = vpop.eup %5033  ;;  %v5914_v58 = vpop.f32.mrf.mxu1  ;;  %1577 = vrot.lane.b32.xlu1 %v5614_v1, %s5287_s2 }
 0x636   :  { %v1045_v53 = vsel %vm505_vm12, %v5912_v20, 0.0  ;;  %v5920_v22 = vpop.eup %5035 }
 0x637   :  { %1046 = vadd.xlane.f32.xlu0 %v1045_v53  ;;  %v1063_v42 = vsel %vm505_vm12, %v5920_v22, 0.0 }
 0x63d   :  { %v910_v60 = vpop.f32.mrf.mxu1 }
 0x63e   :  { %v1000_v62 = vsel %vm505_vm12, %v910_v60, -inf }
 0x63f   :  { %1001 = vmax.xlane.f32.xlu2 %v1000_v62  ;;  %1064 = vadd.xlane.f32.xlu0 %v1063_v42 }
 0x645   :  { %v5925_v63 = vpop.f32.mrf.mxu1 }
 0x646   :  { %v1003_v0 = vsel %vm505_vm12, %v5925_v63, -inf }
 0x647   :  { %1004 = vmax.xlane.f32.xlu2 %v1003_v0 }
 0x653   :  { %4831 = vrot.lane.b32.xlu0 %v5715_v17, %s5286_s22 }
 0x65b   :  { %1495 = vrot.lane.b32.xlu0 %v5632_v41, %s5288_s23 }
 0x65f   :  { %1501 = vrot.lane.b32.xlu2 %v5609_v35, %s5287_s2 }
 0x663   :  { %1579 = vrot.lane.b32.xlu0 %v5623_v6, %s5287_s2 }
 0x667   :  { %1575 = vrot.lane.b32.xlu2 %v5623_v6, %s5288_s23 }
 0x66b   :  { %1573 = vrot.lane.b32.xlu0 %v5614_v1, %s5288_s23 }
 0x677   :  { %v1044_v18 = vpop.xlane.xlu1 %1043 }
 0x678   :  { %5037 = vrcp.f32 %v1044_v18  ;;  %v1077_v14 = vand.u32 2147483648, %v1044_v18  ;;  %vm1071_vm15 = vweird.f32 %v1044_v18  ;;  %v1075_v2 = vand.u32 2147483647, %v1044_v18 }
 0x67a   :  { %v1078_v23 = vor.u32 1.1754944e-38, %v1077_v14  ;;  %vm1076_vm2 = vcmp.eq.f32.partialorder %v1075_v2, 8.507059e+37 }
 0x67e   :  { %v5038_v4 = vpop.eup %5037  ;;  %v5941_v7 = vpop.f32.mrf.mxu2 }
 0x67f   :  { %v1067_v9 = vmul.f32 %v5038_v4, %v1044_v18  ;;  %vm1072_vm14 = vweird.f32 %v5038_v4 }
 0x680   :  { %vm1073_vm1 = vmor %vm1071_vm15, %vm1072_vm14 }
 0x681   :  { %v1068_v54 = vsub.f32 1.0, %v1067_v9 }
 0x683   :  { %v1069_v8 = vmul.f32 %v5038_v4, %v1068_v54 }
 0x685   :  { %v1070_v11 = vadd.f32 %v5038_v4, %v1069_v8 }
 0x686   :  { %v5943_v10 = vpop.f32.mrf.mxu2 }
 0x687   :  { %v1074_v27 = vsel %vm1073_vm1, %v5038_v4, %v1070_v11 }
 0x688   :  { %v1079_v12 = vsel %vm1076_vm2, %v1078_v23, %v1074_v27 }
 0x689   :  { %v1080_v36 = vmul.f32 %v5888_v44, %v1079_v12 }
 0x68e   :  { %v5945_v50 = vpop.f32.mrf.mxu2 }
 0x68f   :  { %v4827_v19 = vpop.permute.xlu1 %4826  ;;  %v1612_v46 = vsel %vm505_vm12, %v5945_v50, -inf }
 0x690   :  { %v4828_v25 = vunpack.i.l.bf16 %v4827_v19  ;;  %v4829_v28 = vunpack.i.h.bf16 %v4827_v19 }
 0x692   :  { %1212 = vmatpush.msrb.mxu3 %v4828_v25  ;;  %v1062_v43 = vpop.xlane.xlu2 %1061 }
 0x693   :  { %5039 = vrcp.f32 %v1062_v43  ;;  %vm1161_vm8 = vweird.f32 %v1062_v43 }
 0x694   :  { %1213 = vmatpush.msrb.mxu3 %v4829_v28 }
 0x695   :  { %4564 = vmatmul.msk.f32.vlgmr.msrb.gmra.mxu3 %vm505_vm12, %v1080_v36  ;;  %1613 = vmax.xlane.f32.xlu0 %v1612_v46 }
 0x696   :  { %v5958_v54 = vpop.f32.mrf.mxu2 }
 0x699   :  { %v5040_v47 = vpop.eup %5039 }
 0x69a   :  { %v1157_v55 = vmul.f32 %v5040_v47, %v1062_v43  ;;  %vm1162_vm7 = vweird.f32 %v5040_v47 }
 0x69b   :  { %vm1163_vm9 = vmor %vm1161_vm8, %vm1162_vm7 }
 0x69c   :  { %v1158_v9 = vsub.f32 1.0, %v1157_v55 }
 0x69e   :  { %v1159_v27 = vmul.f32 %v5040_v47, %v1158_v9 }
 0x6a9   :  { %4836 = vrot.lane.b32.xlu0 %v5757_v29, %s5286_s22 }
 0x6aa   :  { %v1047_v21 = vpop.xlane.xlu0 %1046 }
 0x6ab   :  { %5041 = vrcp.f32 %v1047_v21  ;;  %v1092_v0 = vand.u32 2147483648, %v1047_v21  ;;  %v1090_v4 = vand.u32 2147483647, %v1047_v21  ;;  %vm1086_vm4 = vweird.f32 %v1047_v21 }
 0x6ad   :  { %vm1091_vm6 = vcmp.eq.f32.partialorder %v1090_v4, 8.507059e+37 }
 0x6b1   :  { %v5042_v49 = vpop.eup %5041  ;;  %4841 = vrot.lane.b32.xlu0 %v5675_v38, %s5289_s24 }
 0x6b2   :  { %v1082_v44 = vmul.f32 %v5042_v49, %v1047_v21  ;;  %v5955_v52 = vpop.xlane.xlu0 %1064  ;;  %v1002_v56 = vpop.xlane.xlu2 %1001  ;;  %vm1087_vm3 = vweird.f32 %v5042_v49  ;;  %v1160_v21 = vadd.f32 %v5040_v47, %v1159_v27 }
 0x6b3   :  { %5043 = vrcp.f32 %v5955_v52  ;;  %v1020_v53 = vsub.f32 %v910_v60, %v1002_v56  ;;  %vm1088_vm5 = vmor %vm1086_vm4, %vm1087_vm3  ;;  %v1093_v60 = vor.u32 1.1754944e-38, %v1092_v0  ;;  %v1165_v56 = vand.u32 2147483647, %v1062_v43 }
 0x6b4   :  { %v1083_v62 = vsub.f32 1.0, %v1082_v44  ;;  %v1167_v44 = vand.u32 2147483648, %v1062_v43  ;;  %v1615_v43 = vsel %vm505_vm12, %v5958_v54, -inf  ;;  %vm1176_vm14 = vweird.f32 %v5955_v52 }
 0x6b5   :  { %v1030_v42 = vmul.f32 1.442695, %v1020_v53  ;;  %vm1166_vm10 = vcmp.eq.f32.partialorder %v1165_v56, 8.507059e+37 }
 0x6b6   :  { %v1084_v18 = vmul.f32 %v5042_v49, %v1083_v62  ;;  %v1168_v53 = vor.u32 1.1754944e-38, %v1167_v44  ;;  %v353_v44 = vld [vmem:[%s7001_s6 + $0x8] sm:$0xff] }
 0x6b7   :  { %5045 = vpow2.f32 %v1030_v42  ;;  %v1500_v42 = vpop.permute.xlu1 %1499  ;;  %1365 = vmatpush.msra.mxu0 %v353_v44 }
 0x6b8   :  { %v1085_v8 = vadd.f32 %v5042_v49, %v1084_v18 }
 0x6b9   :  { %v5960_v11 = vpop.eup %5043  ;;  %2023 = vrot.lane.b32.xlu0 %v5604_v61, %s5290_s25 }
 0x6ba   :  { %v1005_v14 = vpop.xlane.xlu2 %1004  ;;  %v1089_v2 = vsel %vm1088_vm5, %v5042_v49, %v1085_v8  ;;  %v1172_v23 = vmul.f32 %v5960_v11, %v5955_v52  ;;  %vm1177_vm13 = vweird.f32 %v5960_v11 }
 0x6bb   :  { %v1021_v19 = vsub.f32 %v5925_v63, %v1005_v14  ;;  %v1094_v12 = vsel %vm1091_vm6, %v1093_v60, %v1089_v2  ;;  %v5973_v63 = vpop.f32.mrf.mxu2  ;;  %v1182_v60 = vand.u32 2147483648, %v5955_v52  ;;  %v1180_v2 = vand.u32 2147483647, %v5955_v52  ;;  %vm1178_vm15 = vmor %vm1176_vm14, %vm1177_vm13 }
 0x6bc   :  { %v1095_v25 = vmul.f32 %v5912_v20, %v1094_v12  ;;  %v1173_v49 = vsub.f32 1.0, %v1172_v23  ;;  %v1164_v20 = vsel %vm1163_vm9, %v5040_v47, %v1160_v21  ;;  %v1624_v52 = vsel %vm505_vm12, %v5973_v63, -inf }
 0x6bd   :  { %v5968_v28 = vpop.eup %5045  ;;  %v1032_v36 = vmul.f32 1.442695, %v1021_v19  ;;  %v1169_v9 = vsel %vm1166_vm10, %v1168_v53, %v1164_v20  ;;  %v1183_v12 = vor.u32 1.1754944e-38, %v1182_v60  ;;  %vm1181_vm1 = vcmp.eq.f32.partialorder %v1180_v2, 8.507059e+37 }
 0x6be   :  { %4565 = vmatmul.msk.f32.gmra.mxu3 %vm505_vm12, %v1095_v25  ;;  %v1048_v46 = vsel %vm505_vm12, %v5968_v28, 0.0  ;;  %v1174_v55 = vmul.f32 %v5960_v11, %v1173_v49  ;;  %v1170_v14 = vmul.f32 %v5897_v3, %v1169_v9 }
 0x6bf   :  { %5047 = vpow2.f32 %v1032_v36  ;;  %1049 = vadd.xlane.f32.xlu1 %v1048_v46  ;;  %v1498_v46 = vpop.permute.xlu1 %1497 }
 0x6c0   :  { %v1175_v47 = vadd.f32 %v5960_v11, %v1174_v55 }
 0x6c1   :  { %2017 = vrot.lane.b32.xlu0 %v5593_v57, %s5291_s4 }
 0x6c2   :  { %v1502_v23 = vpop.permute.xlu2 %1501  ;;  %v1179_v19 = vsel %vm1178_vm15, %v5960_v11, %v1175_v47 }
 0x6c3   :  { %v5992_v27 = vpop.f32.mrf.mxu2  ;;  %v1184_v36 = vsel %vm1181_vm1, %v1183_v12, %v1179_v19 }
 0x6c4   :  { %v1627_v3 = vsel %vm505_vm12, %v5992_v27, -inf  ;;  %v1185_v11 = vmul.f32 %v5920_v22, %v1184_v36 }
 0x6c5   :  { %v5978_v62 = vpop.eup %5047  ;;  %v4832_v0 = vpop.permute.xlu0 %4831 }
 0x6c6   :  { %v4833_v18 = vunpack.i.l.bf16 %v4832_v0  ;;  %v1051_v4 = vsel %vm505_vm12, %v5978_v62, 0.0  ;;  %v4834_v8 = vunpack.i.h.bf16 %v4832_v0 }
 0x6c7   :  { %1616 = vmax.xlane.f32.xlu1 %v1615_v43  ;;  %1052 = vadd.xlane.f32.xlu2 %v1051_v4  ;;  %v1578_v49 = vpop.permute.xlu1 %1577 }
 0x6c8   :  { %1317 = vmatpush.msra.mxu3 %v4833_v18 }
 0x6c9   :  { %2062 = vrot.lane.b32.xlu0 %v5609_v35, %s5290_s25 }
 0x6ca   :  { %1318 = vmatpush.msra.mxu3 %v4834_v8  ;;  %v1576_v22 = vpop.permute.xlu2 %1575 }
 0x6cb   :  { %4570 = vmatmul.msk.f32.vlgmr.msra.gmra.mxu3 %vm505_vm12, %v1170_v14 }
 0x6cc   :  { %4592 = vmatpush.xpose.msk.msrb.mxu3 %vm362_vm11, %v1502_v23 }
 0x6cd   :  { %v1496_v25 = vpop.permute.xlu0 %1495 }
 0x6cf   :  { %1628 = vmax.xlane.f32.xlu1 %v1627_v3  ;;  %1625 = vmax.xlane.f32.xlu2 %v1624_v52 }
 0x6d0   :  { %4593 = vmatpush.xpose.msk.msrb.mxu3 %vm362_vm11, %v1500_v42 }
 0x6d1   :  { %2019 = vrot.lane.b32.xlu0 %v5604_v61, %s5291_s4 }
 0x6d3   :  { %4571 = vmatmul.msk.f32.gmra.mxu3 %vm505_vm12, %v1185_v11 }
 0x6d5   :  { %v1580_v21 = vpop.permute.xlu0 %1579 }
 0x6d6   :  { %4600 = vmatpush.xpose.msk.msra.mxu3 %vm362_vm11, %v1580_v21 }
 0x6da   :  { %4601 = vmatpush.xpose.msk.msra.mxu3 %vm362_vm11, %v1578_v49 }
 0x6db   :  { %4594 = vmatmul.msk.f32.vlgmr.msrb.gmra.mxu3 %vm362_vm11, %v1496_v25 }
 0x6dd   :  { %v1574_v61 = vpop.permute.xlu0 %1573 }
 0x6e3   :  { %4595 = vmatmul.msk.f32.gmra.mxu3 %vm362_vm11, %v1498_v46 }
 0x6e7   :  { %4846 = vrot.lane.b32.xlu2 %v5787_v40, %s5289_s24 }
 0x6e8   :  { %2021 = vrot.lane.b32.xlu1 %v5593_v57, %s5290_s25 }
 0x6eb   :  { %4602 = vmatmul.msk.f32.vlgmr.msra.gmra.mxu3 %vm362_vm11, %v1574_v61 }
 0x6f3   :  { %4603 = vmatmul.msk.f32.gmra.mxu3 %vm362_vm11, %v1576_v22 }
 0x708   :  { %v1614_v56 = vpop.xlane.xlu0 %1613 }
 0x709   :  { %v1636_v20 = vsub.f32 %v5945_v50, %v1614_v56  ;;  %v352_v50 = vld [vmem:[%s7001_s6] sm:$0xff] }
 0x70b   :  { %v1644_v55 = vmul.f32 1.442695, %v1636_v20 }
 0x70d   :  { %5049 = vpow2.f32 %v1644_v55 }
 0x713   :  { %v6020_v53 = vpop.eup %5049 }
 0x714   :  { %v1660_v57 = vsel %vm505_vm12, %v6020_v53, 0.0 }
 0x715   :  { %1661 = vadd.xlane.f32.xlu2 %v1660_v57 }
 0x718   :  { %v1215_v42 = vpop.f32.mrf.mxu3 }
 0x719   :  { %4572 = vmatmul.msk.f32.vlgmr.msra.gmra.mxu0 %vm362_vm11, %v1215_v42 }
 0x71b   :  { %v4837_v0 = vpop.permute.xlu0 %4836 }
 0x71c   :  { %v4838_v18 = vunpack.i.l.bf16 %v4837_v0  ;;  %v4839_v43 = vunpack.i.h.bf16 %v4837_v0 }
 0x71e   :  { %1247 = vmatpush.msra.mxu1 %v4838_v18 }
 0x720   :  { %1248 = vmatpush.msra.mxu1 %v4839_v43 }
 0x722   :  { %1430 = vmatpush.msrb.mxu1 %v352_v50 }
 0x723   :  { %v4842_v4 = vpop.permute.xlu0 %4841 }
 0x724   :  { %v4843_v9 = vunpack.i.l.bf16 %v4842_v4  ;;  %v4844_v47 = vunpack.i.h.bf16 %v4842_v4 }
 0x726   :  { %1830 = vmatpush.msrb.mxu2 %v4843_v9 }
 0x728   :  { %1831 = vmatpush.msrb.mxu2 %v4844_v47 }
 0x72b   :  { %v2024_v9 = vpop.permute.xlu0 %2023 }
 0x732   :  { %v1050_v8 = vpop.xlane.xlu1 %1049 }
 0x733   :  { %5051 = vrcp.f32 %v1050_v8  ;;  %v1107_v25 = vand.u32 2147483648, %v1050_v8  ;;  %v1105_v36 = vand.u32 2147483647, %v1050_v8  ;;  %vm1101_vm3 = vweird.f32 %v1050_v8 }
 0x735   :  { %v1108_v21 = vor.u32 1.1754944e-38, %v1107_v25  ;;  %vm1106_vm5 = vcmp.eq.f32.partialorder %v1105_v36, 8.507059e+37 }
 0x739   :  { %v5052_v60 = vpop.eup %5051 }
 0x73a   :  { %v1097_v14 = vmul.f32 %v5052_v60, %v1050_v8  ;;  %v1617_v2 = vpop.xlane.xlu1 %1616  ;;  %v1053_v23 = vpop.xlane.xlu2 %1052  ;;  %vm1102_vm2 = vweird.f32 %v5052_v60 }
 0x73b   :  { %v1637_v19 = vsub.f32 %v5958_v54, %v1617_v2  ;;  %5053 = vrcp.f32 %v1053_v23  ;;  %vm1103_vm4 = vmor %vm1101_vm3, %vm1102_vm2  ;;  %v1122_v4 = vand.u32 2147483648, %v1053_v23  ;;  %v1120_v8 = vand.u32 2147483647, %v1053_v23 }
 0x73c   :  { %v1098_v12 = vsub.f32 1.0, %v1097_v14  ;;  %vm1116_vm7 = vweird.f32 %v1053_v23 }
 0x73d   :  { %v1646_v3 = vmul.f32 1.442695, %v1637_v19  ;;  %vm1121_vm9 = vcmp.eq.f32.partialorder %v1120_v8, 8.507059e+37 }
 0x73e   :  { %v1099_v52 = vmul.f32 %v5052_v60, %v1098_v12 }
 0x73f   :  { %5055 = vpow2.f32 %v1646_v3 }
 0x740   :  { %v1100_v46 = vadd.f32 %v5052_v60, %v1099_v52 }
 0x741   :  { %v5054_v11 = vpop.eup %5053  ;;  %v1218_v49 = vpop.f32.mrf.mxu3 }
 0x742   :  { %v1104_v61 = vsel %vm1103_vm4, %v5052_v60, %v1100_v46  ;;  %v1112_v22 = vmul.f32 %v5054_v11, %v1053_v23  ;;  %4573 = vmatmul.msk.f32.gmra.mxu0 %vm362_vm11, %v1218_v49  ;;  %v1629_v54 = vpop.xlane.xlu1 %1628  ;;  %v1626_v44 = vpop.xlane.xlu2 %1625  ;;  %vm1117_vm6 = vweird.f32 %v5054_v11 }
 0x743   :  { %v1109_v56 = vsel %vm1106_vm5, %v1108_v21, %v1104_v61  ;;  %v1641_v20 = vsub.f32 %v5992_v27, %v1629_v54  ;;  %v1640_v55 = vsub.f32 %v5973_v63, %v1626_v44  ;;  %vm1118_vm8 = vmor %vm1116_vm7, %vm1117_vm6  ;;  %v1123_v63 = vor.u32 1.1754944e-38, %v1122_v4 }
 0x744   :  { %v1113_v57 = vsub.f32 1.0, %v1112_v22  ;;  %v1110_v42 = vmul.f32 %v5968_v28, %v1109_v56 }
 0x745   :  { %v6033_v0 = vpop.eup %5055  ;;  %v1654_v18 = vmul.f32 1.442695, %v1641_v20  ;;  %v1652_v43 = vmul.f32 1.442695, %v1640_v55 }
 0x746   :  { %4566 = vmatmul.msk.f32.vlgmr.msra.gmra.mxu1 %vm505_vm12, %v1110_v42  ;;  %v1663_v50 = vsel %vm505_vm12, %v6033_v0, 0.0  ;;  %v1114_v47 = vmul.f32 %v5054_v11, %v1113_v57 }
 0x747   :  { %5057 = vpow2.f32 %v1654_v18  ;;  %4620 = vmatpush.xpose.msk.msra.mxu1 %vm362_vm11, %v2024_v9  ;;  %1664 = vadd.xlane.f32.xlu1 %v1663_v50 }
 0x748   :  { %5059 = vpow2.f32 %v1652_v43  ;;  %v1115_v28 = vadd.f32 %v5054_v11, %v1114_v47 }
 0x74a   :  { %v4847_v27 = vpop.permute.xlu2 %4846  ;;  %v1119_v60 = vsel %vm1118_vm8, %v5054_v11, %v1115_v28 }
 0x74b   :  { %v4848_v14 = vunpack.i.l.bf16 %v4847_v27  ;;  %v1124_v2 = vsel %vm1121_vm9, %v1123_v63, %v1119_v60  ;;  %v4849_v25 = vunpack.i.h.bf16 %v4847_v27 }
 0x74c   :  { %v1125_v19 = vmul.f32 %v5978_v62, %v1124_v2 }
 0x74d   :  { %v6040_v12 = vpop.eup %5057  ;;  %1900 = vmatpush.msra.mxu2 %v4848_v14 }
 0x74e   :  { %v6042_v3 = vpop.eup %5059  ;;  %4567 = vmatmul.msk.f32.gmra.mxu1 %vm505_vm12, %v1125_v19  ;;  %v6045_v52 = vpop.f32.mrf.mxu3  ;;  %v1675_v23 = vsel %vm505_vm12, %v6040_v12, 0.0 }
 0x74f   :  { %1676 = vadd.xlane.f32.xlu1 %v1675_v23  ;;  %v1672_v36 = vsel %vm505_vm12, %v6042_v3, 0.0  ;;  %1901 = vmatpush.msra.mxu2 %v4849_v25 }
 0x750   :  { %1673 = vadd.xlane.f32.xlu2 %v1672_v36 }
 0x756   :  { %v6051_v62 = vpop.f32.mrf.mxu3  ;;  %4580 = vmatmul.msk.f32.vlgmr.msrb.gmra.mxu1 %vm362_vm11, %v5763_v30 }
 0x75a   :  { %v2022_v46 = vpop.permute.xlu1 %2021 }
 0x75b   :  { %4621 = vmatpush.xpose.msk.msra.mxu1 %vm362_vm11, %v2022_v46 }
 0x75e   :  { %4581 = vmatmul.msk.f32.gmra.mxu1 %vm362_vm11, %v5765_v31  ;;  %v6058_v11 = vpop.f32.mrf.mxu3 }
 0x75f   :  { %v1618_v21 = vsel %vm505_vm12, %v6058_v11, -inf }
 0x760   :  { %1619 = vmax.xlane.f32.xlu0 %v1618_v21 }
 0x766   :  { %4582 = vmatmul.msk.f32.gmra.mxu1 %vm362_vm11, %v5842_v13  ;;  %v6064_v49 = vpop.f32.mrf.mxu3 }
 0x767   :  { %v1621_v61 = vsel %vm505_vm12, %v6064_v49, -inf }
 0x768   :  { %2060 = vrot.lane.b32.xlu2 %v5632_v41, %s5290_s25  ;;  %2056 = vrot.lane.b32.xlu1 %v5632_v41, %s5291_s4 }
 0x76e   :  { %4583 = vmatmul.msk.f32.gmra.mxu1 %vm362_vm11, %v5848_v26  ;;  %v6072_v30 = vpop.f32.mrf.mxu3  ;;  %v2018_v26 = vpop.permute.xlu0 %2017 }
 0x770   :  { %2058 = vrot.lane.b32.xlu2 %v5609_v35, %s5291_s4 }
 0x776   :  { %4584 = vmatmul.msk.f32.gmra.mxu1 %vm362_vm11, %v5908_v33  ;;  %v6078_v31 = vpop.f32.mrf.mxu3  ;;  %v2063_v54 = vpop.permute.xlu0 %2062 }
 0x777   :  { %v1633_v13 = vsel %vm505_vm12, %v6078_v31, -inf }
 0x778   :  { %1634 = vmax.xlane.f32.xlu0 %v1633_v13 }
 0x77e   :  { %4585 = vmatmul.msk.f32.gmra.mxu1 %vm362_vm11, %v5914_v58  ;;  %v2020_v18 = vpop.permute.xlu0 %2019 }
 0x786   :  { %4586 = vmatmul.msk.f32.gmra.mxu1 %vm362_vm11, %v5769_v45 }
 0x788   :  { %v1662_v41 = vpop.xlane.xlu2 %1661 }
 0x789   :  { %5061 = vrcp.f32 %v1662_v41  ;;  %v1695_v44 = vand.u32 2147483648, %v1662_v41  ;;  %v1693_v58 = vand.u32 2147483647, %v1662_v41  ;;  %vm1689_vm13 = vweird.f32 %v1662_v41 }
 0x78b   :  { %v1696_v45 = vor.u32 1.1754944e-38, %v1695_v44  ;;  %vm1694_vm15 = vcmp.eq.f32.partialorder %v1693_v58, 8.507059e+37 }
 0x78e   :  { %4587 = vmatmul.msk.f32.gmra.mxu1 %vm362_vm11, %v5771_v48  ;;  %v1630_v48 = vsel %vm505_vm12, %v6072_v30, -inf }
 0x78f   :  { %v5062_v35 = vpop.eup %5061 }
 0x790   :  { %v1685_v33 = vmul.f32 %v5062_v35, %v1662_v41  ;;  %vm1690_vm10 = vweird.f32 %v5062_v35 }
 0x791   :  { %vm1691_vm14 = vmor %vm1689_vm13, %vm1690_vm10 }
 0x792   :  { %v1686_v22 = vsub.f32 1.0, %v1685_v33  ;;  %1622 = vmax.xlane.f32.xlu1 %v1621_v61 }
 0x794   :  { %v1687_v56 = vmul.f32 %v5062_v35, %v1686_v22 }
 0x796   :  { %v1688_v20 = vadd.f32 %v5062_v35, %v1687_v56  ;;  %4622 = vmatmul.msk.f32.vlgmr.msra.gmra.mxu1 %vm362_vm11, %v2018_v26 }
 0x798   :  { %v1692_v55 = vsel %vm1691_vm14, %v5062_v35, %v1688_v20 }
 0x799   :  { %1631 = vmax.xlane.f32.xlu2 %v1630_v48  ;;  %v1697_v57 = vsel %vm1694_vm15, %v1696_v45, %v1692_v55 }
 0x79a   :  { %v1698_v42 = vmul.f32 %v6020_v53, %v1697_v57 }
 0x79c   :  { %4604 = vmatmul.msk.f32.vlgmr.msrb.gmra.mxu2 %vm505_vm12, %v1698_v42 }
 0x79d   :  { %4624 = vmatpush.xpose.msk.msrb.mxu2 %vm362_vm11, %v2063_v54 }
 0x79e   :  { %4623 = vmatmul.msk.f32.gmra.mxu1 %vm362_vm11, %v2020_v18 }
 0x7ba   :  { %v1665_v43 = vpop.xlane.xlu1 %1664 }
 0x7bb   :  { %5063 = vrcp.f32 %v1665_v43  ;;  %v1710_v53 = vand.u32 2147483648, %v1665_v43  ;;  %v1708_v27 = vand.u32 2147483647, %v1665_v43  ;;  %vm1704_vm2 = vweird.f32 %v1665_v43 }
 0x7bd   :  { %v1711_v2 = vor.u32 1.1754944e-38, %v1710_v53  ;;  %vm1709_vm4 = vcmp.eq.f32.partialorder %v1708_v27, 8.507059e+37 }
 0x7c1   :  { %v5064_v4 = vpop.eup %5063 }
 0x7c2   :  { %v1700_v9 = vmul.f32 %v5064_v4, %v1665_v43  ;;  %v1677_v50 = vpop.xlane.xlu1 %1676  ;;  %vm1705_vm1 = vweird.f32 %v5064_v4 }
 0x7c3   :  { %5065 = vrcp.f32 %v1677_v50  ;;  %v1674_v47 = vpop.xlane.xlu2 %1673  ;;  %v1250_v8 = vpop.f32.mrf.mxu1  ;;  %vm1706_vm3 = vmor %vm1704_vm2, %vm1705_vm1  ;;  %v1770_v55 = vand.u32 2147483648, %v1677_v50  ;;  %vm1764_vm10 = vweird.f32 %v1677_v50  ;;  %v1768_v42 = vand.u32 2147483647, %v1677_v50 }
 0x7c4   :  { %v1701_v28 = vsub.f32 1.0, %v1700_v9  ;;  %5067 = vrcp.f32 %v1674_v47  ;;  %4574 = vmatmul.msk.f32.gmra.mxu0 %vm362_vm11, %v1250_v8  ;;  %v1755_v33 = vand.u32 2147483648, %v1674_v47  ;;  %v1753_v54 = vand.u32 2147483647, %v1674_v47 }
 0x7c5   :  { %vm1749_vm6 = vweird.f32 %v1674_v47  ;;  %vm1769_vm14 = vcmp.eq.f32.partialorder %v1768_v42, 8.507059e+37 }
 0x7c6   :  { %v1702_v63 = vmul.f32 %v5064_v4, %v1701_v28  ;;  %v1756_v56 = vor.u32 1.1754944e-38, %v1755_v33  ;;  %vm1754_vm8 = vcmp.eq.f32.partialorder %v1753_v54, 8.507059e+37 }
 0x7c8   :  { %v1703_v60 = vadd.f32 %v5064_v4, %v1702_v63 }
 0x7c9   :  { %v5066_v14 = vpop.eup %5065 }
 0x7ca   :  { %v5068_v19 = vpop.eup %5067  ;;  %v1760_v25 = vmul.f32 %v5066_v14, %v1677_v50  ;;  %v1707_v23 = vsel %vm1706_vm3, %v5064_v4, %v1703_v60  ;;  %vm1765_vm9 = vweird.f32 %v5066_v14  ;;  %v1771_v4 = vor.u32 1.1754944e-38, %v1770_v55 }
 0x7cb   :  { %v1745_v36 = vmul.f32 %v5068_v19, %v1674_v47  ;;  %v2061_v46 = vpop.permute.xlu2 %2060  ;;  %v1253_v21 = vpop.f32.mrf.mxu1  ;;  %v1712_v13 = vsel %vm1709_vm4, %v1711_v2, %v1707_v23  ;;  %vm1750_vm5 = vweird.f32 %v5068_v19  ;;  %vm1766_vm13 = vmor %vm1764_vm10, %vm1765_vm9 }
 0x7cc   :  { %v1761_v41 = vsub.f32 1.0, %v1760_v25  ;;  %4625 = vmatpush.xpose.msk.msrb.mxu2 %vm362_vm11, %v2061_v46  ;;  %4575 = vmatmul.msk.f32.gmra.mxu0 %vm362_vm11, %v1253_v21  ;;  %v1713_v26 = vmul.f32 %v6033_v0, %v1712_v13  ;;  %vm1751_vm7 = vmor %vm1749_vm6, %vm1750_vm5 }
 0x7cd   :  { %v1746_v35 = vsub.f32 1.0, %v1745_v36 }
 0x7ce   :  { %4605 = vmatmul.msk.f32.gmra.mxu2 %vm505_vm12, %v1713_v26  ;;  %v1762_v61 = vmul.f32 %v5066_v14, %v1761_v41 }
 0x7cf   :  { %v1747_v22 = vmul.f32 %v5068_v19, %v1746_v35 }
 0x7d0   :  { %v1763_v45 = vadd.f32 %v5066_v14, %v1762_v61 }
 0x7d1   :  { %v1748_v44 = vadd.f32 %v5068_v19, %v1747_v22 }
 0x7d2   :  { %v1767_v43 = vsel %vm1766_vm13, %v5066_v14, %v1763_v45 }
 0x7d3   :  { %v1752_v58 = vsel %vm1751_vm7, %v5068_v19, %v1748_v44  ;;  %v1620_v20 = vpop.xlane.xlu0 %1619  ;;  %v1772_v9 = vsel %vm1769_vm14, %v1771_v4, %v1767_v43 }
 0x7d4   :  { %v1638_v0 = vsub.f32 %v6058_v11, %v1620_v20  ;;  %4576 = vmatmul.msk.f32.gmra.mxu0 %vm362_vm11, %v5941_v7  ;;  %v1757_v48 = vsel %vm1754_vm8, %v1756_v56, %v1752_v58  ;;  %v6109_v11 = vpop.f32.mrf.mxu1  ;;  %v1773_v7 = vmul.f32 %v6040_v12, %v1772_v9 }
 0x7d5   :  { %v1758_v57 = vmul.f32 %v6042_v3, %v1757_v48 }
 0x7d6   :  { %v1648_v18 = vmul.f32 1.442695, %v1638_v0 }
 0x7d7   :  { %4608 = vmatmul.msk.f32.vlgmr.msra.gmra.mxu2 %vm505_vm12, %v1758_v57 }
 0x7d8   :  { %5069 = vpow2.f32 %v1648_v18 }
 0x7da   :  { %v2057_v50 = vpop.permute.xlu1 %2056 }
 0x7dc   :  { %4577 = vmatmul.msk.f32.gmra.mxu0 %vm362_vm11, %v5943_v10  ;;  %v6119_v8 = vpop.f32.mrf.mxu1  ;;  %v2059_v10 = vpop.permute.xlu2 %2058 }
 0x7de   :  { %v6112_v47 = vpop.eup %5069 }
 0x7df   :  { %4609 = vmatmul.msk.f32.gmra.mxu2 %vm505_vm12, %v1773_v7  ;;  %v1666_v3 = vsel %vm505_vm12, %v6112_v47, 0.0 }
 0x7e0   :  { %1667 = vadd.xlane.f32.xlu1 %v1666_v3 }
 0x7e4   :  { %4578 = vmatmul.msk.f32.gmra.mxu0 %vm362_vm11, %v6045_v52  ;;  %v6125_v12 = vpop.f32.mrf.mxu1  ;;  %v354_v52 = vld [vmem:[%s7001_s6 + $0x10] sm:$0xff] }
 0x7e5   :  { %1983 = vmatpush.msrb.mxu0 %v354_v52 }
 0x7e7   :  { %4626 = vmatmul.msk.f32.vlgmr.msrb.gmra.mxu2 %vm362_vm11, %v2057_v50 }
 0x7eb   :  { %v1635_v53 = vpop.xlane.xlu0 %1634 }
 0x7ec   :  { %4579 = vmatmul.msk.f32.gmra.mxu0 %vm362_vm11, %v6051_v62  ;;  %v6129_v28 = vpop.f32.mrf.mxu1  ;;  %v1643_v60 = vsub.f32 %v6078_v31, %v1635_v53 }
 0x7ee   :  { %v1658_v2 = vmul.f32 1.442695, %v1643_v60 }
 0x7ef   :  { %4627 = vmatmul.msk.f32.gmra.mxu2 %vm362_vm11, %v2059_v10 }
 0x7f4   :  { %v6136_v62 = vpop.f32.mrf.mxu1 }
 0x7f9   :  { %4851 = vrot.lane.b32.xlu1 %v5757_v29, %s5289_s24 }
 0x7fc   :  { %v6143_v23 = vpop.f32.mrf.mxu1 }
 0x801   :  { %2099 = vrot.lane.b32.xlu1 %v5665_v34, %s5290_s25 }
 0x804   :  { %v6157_v13 = vpop.f32.mrf.mxu1 }
 0x805   :  { %v1623_v63 = vpop.xlane.xlu1 %1622 }
 0x806   :  { %v1639_v27 = vsub.f32 %v6064_v49, %v1623_v63 }
 0x808   :  { %v1650_v14 = vmul.f32 1.442695, %v1639_v27 }
 0x809   :  { %2097 = vrot.lane.b32.xlu1 %v5653_v16, %s5291_s4 }
 0x80a   :  { %5071 = vpow2.f32 %v1650_v14 }
 0x80b   :  { %5073 = vpow2.f32 %v1658_v2 }
 0x80c   :  { %v1632_v19 = vpop.xlane.xlu2 %1631  ;;  %v6162_v35 = vpop.f32.mrf.mxu1 }
 0x80d   :  { %v1642_v25 = vsub.f32 %v6072_v30, %v1632_v19 }
 0x80f   :  { %v1656_v36 = vmul.f32 1.442695, %v1642_v25 }
 0x810   :  { %v6145_v46 = vpop.eup %5071 }
 0x811   :  { %5075 = vpow2.f32 %v1656_v36  ;;  %2134 = vrot.lane.b32.xlu1 %v5614_v1, %s5291_s4  ;;  %v1669_v49 = vsel %vm505_vm12, %v6145_v46, 0.0  ;;  %v6151_v31 = vpop.eup %5073 }
 0x812   :  { %1670 = vadd.xlane.f32.xlu2 %v1669_v49  ;;  %v1681_v41 = vsel %vm505_vm12, %v6151_v31, 0.0 }
 0x814   :  { %v6164_v33 = vpop.f32.mrf.mxu1 }
 0x815   :  { %v2173_v55 = vsel %vm505_vm12, %v6164_v33, -inf }
 0x817   :  { %v6153_v21 = vpop.eup %5075 }
 0x818   :  { %v1678_v30 = vsel %vm505_vm12, %v6153_v21, 0.0 }
 0x819   :  { %1679 = vadd.xlane.f32.xlu0 %v1678_v30 }
 0x81a   :  { %1682 = vadd.xlane.f32.xlu2 %v1681_v41 }
 0x81c   :  { %v6172_v61 = vpop.f32.mrf.mxu1 }
 0x81d   :  { %v2176_v22 = vsel %vm505_vm12, %v6172_v61, -inf }
 0x81f   :  { %v1833_v26 = vpop.f32.mrf.mxu2 }
 0x820   :  { %4612 = vmatmul.msk.f32.vlgmr.msrb.gmra.mxu0 %vm362_vm11, %v1833_v26 }
 0x82d   :  { %4856 = vrot.lane.b32.xlu0 %v5715_v17, %s5289_s24 }
 0x832   :  { %2101 = vrot.lane.b32.xlu2 %v5653_v16, %s5290_s25 }
 0x835   :  { %2095 = vrot.lane.b32.xlu0 %v5665_v34, %s5291_s4 }
 0x83a   :  { %2140 = vrot.lane.b32.xlu2 %v5623_v6, %s5290_s25 }
 0x83b   :  { %2177 = vmax.xlane.f32.xlu1 %v2176_v22 }
 0x83d   :  { %2138 = vrot.lane.b32.xlu0 %v5614_v1, %s5290_s25 }
 0x845   :  { %2136 = vrot.lane.b32.xlu0 %v5623_v6, %s5291_s4 }
 0x851   :  { %v1836_v54 = vpop.f32.mrf.mxu2 }
 0x852   :  { %4613 = vmatmul.msk.f32.gmra.mxu0 %vm362_vm11, %v1836_v54 }
 0x853   :  { %v1668_v16 = vpop.xlane.xlu1 %1667 }
 0x854   :  { %5077 = vrcp.f32 %v1668_v16  ;;  %v1725_v6 = vand.u32 2147483648, %v1668_v16  ;;  %vm1719_vm1 = vweird.f32 %v1668_v16  ;;  %v1723_v0 = vand.u32 2147483647, %v1668_v16 }
 0x856   :  { %v1726_v57 = vor.u32 1.1754944e-38, %v1725_v6  ;;  %vm1724_vm3 = vcmp.eq.f32.partialorder %v1723_v0, 8.507059e+37 }
 0x85a   :  { %v5078_v34 = vpop.eup %5077  ;;  %v6183_v44 = vpop.f32.mrf.mxu2 }
 0x85b   :  { %v1715_v56 = vmul.f32 %v5078_v34, %v1668_v16  ;;  %vm1720_vm15 = vweird.f32 %v5078_v34 }
 0x85c   :  { %vm1721_vm2 = vmor %vm1719_vm1, %vm1720_vm15 }
 0x85d   :  { %v1716_v58 = vsub.f32 1.0, %v1715_v56 }
 0x85f   :  { %v1717_v20 = vmul.f32 %v5078_v34, %v1716_v58 }
 0x861   :  { %v1718_v1 = vadd.f32 %v5078_v34, %v1717_v20 }
 0x862   :  { %v6185_v45 = vpop.f32.mrf.mxu2 }
 0x863   :  { %2174 = vmax.xlane.f32.xlu2 %v2173_v55  ;;  %v1722_v48 = vsel %vm1721_vm2, %v5078_v34, %v1718_v1 }
 0x864   :  { %v1727_v43 = vsel %vm1724_vm3, %v1726_v57, %v1722_v48 }
 0x865   :  { %v1728_v3 = vmul.f32 %v6112_v47, %v1727_v43 }
 0x86a   :  { %v6189_v42 = vpop.f32.mrf.mxu2 }
 0x86b   :  { %v4852_v18 = vpop.permute.xlu1 %4851  ;;  %v2179_v7 = vsel %vm505_vm12, %v6189_v42, -inf }
 0x86c   :  { %v4853_v4 = vunpack.i.l.bf16 %v4852_v18  ;;  %v4854_v9 = vunpack.i.h.bf16 %v4852_v18 }
 0x86e   :  { %1865 = vmatpush.msrb.mxu3 %v4853_v4 }
 0x86f   :  { %2180 = vmax.xlane.f32.xlu0 %v2179_v7 }
 0x870   :  { %1866 = vmatpush.msrb.mxu3 %v4854_v9 }
 0x871   :  { %4606 = vmatmul.msk.f32.vlgmr.msrb.gmra.mxu3 %vm505_vm12, %v1728_v3 }
 0x872   :  { %v6195_v50 = vpop.f32.mrf.mxu2 }
 0x873   :  { %v2182_v10 = vsel %vm505_vm12, %v6195_v50, -inf  ;;  %v2100_v25 = vpop.permute.xlu1 %2099 }
 0x874   :  { %2183 = vmax.xlane.f32.xlu2 %v2182_v10 }
 0x87b   :  { %v2098_v48 = vpop.permute.xlu1 %2097 }
 0x885   :  { %v1671_v52 = vpop.xlane.xlu2 %1670 }
 0x886   :  { %5079 = vrcp.f32 %v1671_v52  ;;  %v1740_v2 = vand.u32 2147483648, %v1671_v52  ;;  %v1738_v19 = vand.u32 2147483647, %v1671_v52  ;;  %vm1734_vm5 = vweird.f32 %v1671_v52 }
 0x888   :  { %v1741_v41 = vor.u32 1.1754944e-38, %v1740_v2  ;;  %vm1739_vm7 = vcmp.eq.f32.partialorder %v1738_v19, 8.507059e+37 }
 0x88c   :  { %v5080_v53 = vpop.eup %5079  ;;  %v1680_v63 = vpop.xlane.xlu0 %1679 }
 0x88d   :  { %v1730_v27 = vmul.f32 %v5080_v53, %v1671_v52  ;;  %5081 = vrcp.f32 %v1680_v63  ;;  %v1683_v60 = vpop.xlane.xlu2 %1682  ;;  %vm1735_vm4 = vweird.f32 %v5080_v53  ;;  %v1785_v6 = vand.u32 2147483648, %v1680_v63 }
 0x88e   :  { %5083 = vrcp.f32 %v1683_v60  ;;  %vm1736_vm6 = vmor %vm1734_vm5, %vm1735_vm4  ;;  %vm1779_vm9 = vweird.f32 %v1680_v63  ;;  %v1783_v0 = vand.u32 2147483647, %v1680_v63  ;;  %v1800_v10 = vand.u32 2147483648, %v1683_v60 }
 0x88f   :  { %v1731_v14 = vsub.f32 1.0, %v1730_v27  ;;  %v1786_v4 = vor.u32 1.1754944e-38, %v1785_v6  ;;  %vm1794_vm15 = vweird.f32 %v1683_v60 }
 0x890   :  { %vm1784_vm13 = vcmp.eq.f32.partialorder %v1783_v0, 8.507059e+37  ;;  %v1801_v2 = vor.u32 1.1754944e-38, %v1800_v10 }
 0x891   :  { %v1732_v47 = vmul.f32 %v5080_v53, %v1731_v14  ;;  %v2135_v14 = vpop.permute.xlu1 %2134 }
 0x893   :  { %v5082_v36 = vpop.eup %5081  ;;  %v1733_v49 = vadd.f32 %v5080_v53, %v1732_v47 }
 0x894   :  { %v5084_v30 = vpop.eup %5083  ;;  %v1775_v26 = vmul.f32 %v5082_v36, %v1680_v63  ;;  %vm1780_vm8 = vweird.f32 %v5082_v36  ;;  %v1798_v63 = vand.u32 2147483647, %v1683_v60 }
 0x895   :  { %v1790_v22 = vmul.f32 %v5084_v30, %v1683_v60  ;;  %v2102_v54 = vpop.permute.xlu2 %2101  ;;  %v1737_v16 = vsel %vm1736_vm6, %v5080_v53, %v1733_v49  ;;  %vm1781_vm10 = vmor %vm1779_vm9, %vm1780_vm8  ;;  %vm1795_vm14 = vweird.f32 %v5084_v30 }
 0x896   :  { %v1776_v34 = vsub.f32 1.0, %v1775_v26  ;;  %v1742_v56 = vsel %vm1739_vm7, %v1741_v41, %v1737_v16  ;;  %vm1796_vm1 = vmor %vm1794_vm15, %vm1795_vm14  ;;  %vm1799_vm2 = vcmp.eq.f32.partialorder %v1798_v63, 8.507059e+37 }
 0x897   :  { %v1743_v58 = vmul.f32 %v6145_v46, %v1742_v56  ;;  %v1791_v55 = vsub.f32 1.0, %v1790_v22 }
 0x898   :  { %v1777_v20 = vmul.f32 %v5082_v36, %v1776_v34 }
 0x899   :  { %4607 = vmatmul.msk.f32.gmra.mxu3 %vm505_vm12, %v1743_v58  ;;  %v1792_v18 = vmul.f32 %v5084_v30, %v1791_v55 }
 0x89a   :  { %v1778_v1 = vadd.f32 %v5082_v36, %v1777_v20 }
 0x89b   :  { %v1793_v3 = vadd.f32 %v5084_v30, %v1792_v18 }
 0x89c   :  { %v1782_v57 = vsel %vm1781_vm10, %v5082_v36, %v1778_v1 }
 0x89d   :  { %v2141_v43 = vpop.permute.xlu2 %2140  ;;  %v1787_v46 = vsel %vm1784_vm13, %v1786_v4, %v1782_v57  ;;  %v1797_v27 = vsel %vm1796_vm1, %v5084_v30, %v1793_v3 }
 0x89e   :  { %4632 = vmatpush.xpose.msk.msrb.mxu1 %vm362_vm11, %v2141_v43  ;;  %v1788_v53 = vmul.f32 %v6153_v21, %v1787_v46  ;;  %v1802_v19 = vsel %vm1799_vm2, %v1801_v2, %v1797_v27 }
 0x89f   :  { %v4857_v9 = vpop.permute.xlu0 %4856  ;;  %v1803_v36 = vmul.f32 %v6151_v31, %v1802_v19 }
 0x8a0   :  { %v4858_v7 = vunpack.i.l.bf16 %v4857_v9  ;;  %v4859_v52 = vunpack.i.h.bf16 %v4857_v9 }
 0x8a2   :  { %1935 = vmatpush.msra.mxu3 %v4858_v7 }
 0x8a4   :  { %1936 = vmatpush.msra.mxu3 %v4859_v52 }
 0x8a5   :  { %4610 = vmatmul.msk.f32.vlgmr.msra.gmra.mxu3 %vm505_vm12, %v1788_v53 }
 0x8a6   :  { %4628 = vmatpush.xpose.msk.msrb.mxu3 %vm362_vm11, %v2102_v54 }
 0x8a7   :  { %v2096_v47 = vpop.permute.xlu0 %2095 }
 0x8aa   :  { %4629 = vmatpush.xpose.msk.msrb.mxu3 %vm362_vm11, %v2100_v25 }
 0x8ad   :  { %4611 = vmatmul.msk.f32.gmra.mxu3 %vm505_vm12, %v1803_v36 }
 0x8ae   :  { %v2178_v21 = vpop.xlane.xlu1 %2177 }
 0x8af   :  { %v2198_v60 = vsub.f32 %v6172_v61, %v2178_v21  ;;  %v2139_v49 = vpop.permute.xlu0 %2138 }
 0x8b0   :  { %4633 = vmatpush.xpose.msk.msrb.mxu1 %vm362_vm11, %v2139_v49 }
 0x8b1   :  { %v2207_v30 = vmul.f32 1.442695, %v2198_v60 }
 0x8b3   :  { %5085 = vpow2.f32 %v2207_v30  ;;  %4634 = vmatmul.msk.f32.vlgmr.msrb.gmra.mxu1 %vm362_vm11, %v2135_v14 }
 0x8b5   :  { %4630 = vmatmul.msk.f32.vlgmr.msrb.gmra.mxu3 %vm362_vm11, %v2096_v47 }
 0x8b7   :  { %v2137_v26 = vpop.permute.xlu0 %2136 }
 0x8b9   :  { %v6212_v41 = vpop.eup %5085 }
 0x8ba   :  { %v2224_v31 = vsel %vm505_vm12, %v6212_v41, 0.0 }
 0x8bb   :  { %4635 = vmatmul.msk.f32.gmra.mxu1 %vm362_vm11, %v2137_v26  ;;  %2225 = vadd.xlane.f32.xlu2 %v2224_v31 }
 0x8bd   :  { %4631 = vmatmul.msk.f32.gmra.mxu3 %vm362_vm11, %v2098_v48 }
 0x8d6   :  { %v2175_v61 = vpop.xlane.xlu2 %2174 }
 0x8d7   :  { %v2197_v25 = vsub.f32 %v6164_v33, %v2175_v61 }
 0x8d9   :  { %v2205_v22 = vmul.f32 1.442695, %v2197_v25 }
 0x8db   :  { %5087 = vpow2.f32 %v2205_v22 }
 0x8e1   :  { %v6219_v54 = vpop.eup %5087 }
 0x8e2   :  { %v2181_v16 = vpop.xlane.xlu0 %2180  ;;  %v2221_v34 = vsel %vm505_vm12, %v6219_v54, 0.0 }
 0x8e3   :  { %v2199_v56 = vsub.f32 %v6189_v42, %v2181_v16  ;;  %2222 = vadd.xlane.f32.xlu1 %v2221_v34 }
 0x8e5   :  { %v2209_v58 = vmul.f32 1.442695, %v2199_v56 }
 0x8e7   :  { %5089 = vpow2.f32 %v2209_v58  ;;  %v2184_v20 = vpop.xlane.xlu2 %2183 }
 0x8e8   :  { %v2200_v55 = vsub.f32 %v6195_v50, %v2184_v20 }
 0x8ea   :  { %v2211_v1 = vmul.f32 1.442695, %v2200_v55 }
 0x8ec   :  { %5091 = vpow2.f32 %v2211_v1 }
 0x8ed   :  { %v6225_v6 = vpop.eup %5089 }
 0x8ee   :  { %v2227_v33 = vsel %vm505_vm12, %v6225_v6, 0.0 }
 0x8ef   :  { %2228 = vadd.xlane.f32.xlu0 %v2227_v33 }
 0x8f2   :  { %v6229_v0 = vpop.eup %5091 }
 0x8f3   :  { %v2230_v48 = vsel %vm505_vm12, %v6229_v0, 0.0 }
 0x8f4   :  { %2231 = vadd.xlane.f32.xlu2 %v2230_v48  ;;  %v1868_v42 = vpop.f32.mrf.mxu3 }
 0x8f5   :  { %4614 = vmatmul.msk.f32.gmra.mxu0 %vm362_vm11, %v1868_v42 }
 0x8fc   :  { %4861 = vrot.lane.b32.xlu1 %v5675_v38, %s5292_s30 }
 0x903   :  { %4866 = vrot.lane.b32.xlu0 %v5757_v29, %s5292_s30 }
 0x91c   :  { %v1871_v50 = vpop.f32.mrf.mxu3 }
 0x91d   :  { %4615 = vmatmul.msk.f32.gmra.mxu0 %vm362_vm11, %v1871_v50 }
 0x925   :  { %4616 = vmatmul.msk.f32.gmra.mxu0 %vm362_vm11, %v6183_v44 }
 0x928   :  { %v1938_v57 = vpop.f32.mrf.mxu3 }
 0x92d   :  { %4617 = vmatmul.msk.f32.gmra.mxu0 %vm362_vm11, %v6185_v45 }
 0x92e   :  { %v2226_v3 = vpop.xlane.xlu2 %2225 }
 0x92f   :  { %v2271_v16 = vand.u32 2147483648, %v2226_v3  ;;  %vm2265_vm10 = vweird.f32 %v2226_v3 }
 0x930   :  { %v1941_v18 = vpop.f32.mrf.mxu3  ;;  %v6243_v43 = vpop.f32.mrf.mxu1 }
 0x931   :  { %v2191_v4 = vsel %vm505_vm12, %v6243_v43, -inf }
 0x932   :  { %2192 = vmax.xlane.f32.xlu0 %v2191_v4  ;;  %v2269_v4 = vand.u32 2147483647, %v2226_v3 }
 0x934   :  { %vm2270_vm1 = vcmp.eq.f32.partialorder %v2269_v4, 8.507059e+37 }
 0x935   :  { %4618 = vmatmul.msk.f32.gmra.mxu0 %vm362_vm11, %v1938_v57 }
 0x938   :  { %v6248_v38 = vpop.f32.mrf.mxu3  ;;  %v6257_v9 = vpop.f32.mrf.mxu1 }
 0x939   :  { %v2185_v29 = vsel %vm505_vm12, %v6248_v38, -inf  ;;  %v2194_v46 = vsel %vm505_vm12, %v6257_v9, -inf }
 0x93a   :  { %2186 = vmax.xlane.f32.xlu2 %v2185_v29 }
 0x93d   :  { %4619 = vmatmul.msk.f32.gmra.mxu0 %vm362_vm11, %v1941_v18 }
 0x940   :  { %v6253_v44 = vpop.f32.mrf.mxu3 }
 0x941   :  { %v2188_v45 = vsel %vm505_vm12, %v6253_v44, -inf }
 0x942   :  { %2189 = vmax.xlane.f32.xlu2 %v2188_v45 }
 0x94a   :  { %2195 = vmax.xlane.f32.xlu2 %v2194_v46 }
 0x956   :  { %v2223_v7 = vpop.xlane.xlu1 %2222 }
 0x957   :  { %5093 = vrcp.f32 %v2223_v7  ;;  %v2256_v60 = vand.u32 2147483648, %v2223_v7  ;;  %vm2250_vm4 = vweird.f32 %v2223_v7  ;;  %v2254_v49 = vand.u32 2147483647, %v2223_v7 }
 0x958   :  { %5095 = vrcp.f32 %v2226_v3 }
 0x959   :  { %v2257_v25 = vor.u32 1.1754944e-38, %v2256_v60  ;;  %vm2255_vm6 = vcmp.eq.f32.partialorder %v2254_v49, 8.507059e+37 }
 0x95d   :  { %v5094_v10 = vpop.eup %5093 }
 0x95e   :  { %v2246_v52 = vmul.f32 %v5094_v10, %v2223_v7  ;;  %v5096_v63 = vpop.eup %5095  ;;  %vm2251_vm3 = vweird.f32 %v5094_v10 }
 0x95f   :  { %v2261_v14 = vmul.f32 %v5096_v63, %v2226_v3  ;;  %vm2252_vm5 = vmor %vm2250_vm4, %vm2251_vm3  ;;  %vm2266_vm8 = vweird.f32 %v5096_v63 }
 0x960   :  { %v2247_v53 = vsub.f32 1.0, %v2246_v52  ;;  %vm2267_vm14 = vmor %vm2265_vm10, %vm2266_vm8 }
 0x961   :  { %v2262_v19 = vsub.f32 1.0, %v2261_v14 }
 0x962   :  { %v2229_v27 = vpop.xlane.xlu0 %2228  ;;  %v2248_v2 = vmul.f32 %v5094_v10, %v2247_v53 }
 0x963   :  { %5097 = vrcp.f32 %v2229_v27  ;;  %v2263_v26 = vmul.f32 %v5096_v63, %v2262_v19  ;;  %v2286_v33 = vand.u32 2147483648, %v2229_v27  ;;  %vm2280_vm9 = vweird.f32 %v2229_v27 }
 0x964   :  { %v2249_v36 = vadd.f32 %v5094_v10, %v2248_v2  ;;  %v2284_v42 = vand.u32 2147483647, %v2229_v27 }
 0x965   :  { %v2264_v48 = vadd.f32 %v5096_v63, %v2263_v26  ;;  %v2287_v46 = vor.u32 1.1754944e-38, %v2286_v33 }
 0x966   :  { %v2253_v31 = vsel %vm2252_vm5, %v5094_v10, %v2249_v36  ;;  %v2272_v10 = vor.u32 1.1754944e-38, %v2271_v16  ;;  %vm2285_vm15 = vcmp.eq.f32.partialorder %v2284_v42, 8.507059e+37 }
 0x967   :  { %v6261_v47 = vpop.xlane.xlu2 %2231  ;;  %v2258_v58 = vsel %vm2255_vm6, %v2257_v25, %v2253_v31  ;;  %v2268_v7 = vsel %vm2267_vm14, %v5096_v63, %v2264_v48 }
 0x968   :  { %5099 = vrcp.f32 %v6261_v47  ;;  %v2259_v18 = vmul.f32 %v6219_v54, %v2258_v58  ;;  %v2273_v2 = vsel %vm2270_vm1, %v2272_v10, %v2268_v7  ;;  %v2301_v54 = vand.u32 2147483648, %v6261_v47 }
 0x969   :  { %v5098_v21 = vpop.eup %5097  ;;  %vm2295_vm3 = vweird.f32 %v6261_v47  ;;  %v2299_v19 = vand.u32 2147483647, %v6261_v47  ;;  %v2274_v63 = vmul.f32 %v6212_v41, %v2273_v2 }
 0x96a   :  { %v2276_v30 = vmul.f32 %v5098_v21, %v2229_v27  ;;  %vm2281_vm7 = vweird.f32 %v5098_v21  ;;  %v2302_v60 = vor.u32 1.1754944e-38, %v2301_v54 }
 0x96b   :  { %vm2282_vm13 = vmor %vm2280_vm9, %vm2281_vm7  ;;  %vm2300_vm5 = vcmp.eq.f32.partialorder %v2299_v19, 8.507059e+37 }
 0x96c   :  { %v2277_v61 = vsub.f32 1.0, %v2276_v30 }
 0x96e   :  { %v5100_v22 = vpop.eup %5099  ;;  %v2278_v34 = vmul.f32 %v5098_v21, %v2277_v61  ;;  %v4862_v56 = vpop.permute.xlu1 %4861 }
 0x96f   :  { %v2291_v20 = vmul.f32 %v5100_v22, %v6261_v47  ;;  %v4863_v55 = vunpack.i.l.bf16 %v4862_v56  ;;  %v4864_v57 = vunpack.i.h.bf16 %v4862_v56  ;;  %vm2296_vm2 = vweird.f32 %v5100_v22 }
 0x970   :  { %v2279_v1 = vadd.f32 %v5098_v21, %v2278_v34  ;;  %vm2297_vm4 = vmor %vm2295_vm3, %vm2296_vm2 }
 0x971   :  { %v2292_v50 = vsub.f32 1.0, %v2291_v20  ;;  %2391 = vmatpush.msra.mxu2 %v4863_v55 }
 0x972   :  { %v2283_v29 = vsel %vm2282_vm13, %v5098_v21, %v2279_v1 }
 0x973   :  { %v2293_v45 = vmul.f32 %v5100_v22, %v2292_v50  ;;  %2392 = vmatpush.msra.mxu2 %v4864_v57  ;;  %v2288_v53 = vsel %vm2285_vm15, %v2287_v46, %v2283_v29 }
 0x974   :  { %4636 = vmatmul.msk.f32.vlgmr.msra.gmra.mxu2 %vm505_vm12, %v2259_v18  ;;  %v2289_v36 = vmul.f32 %v6225_v6, %v2288_v53 }
 0x975   :  { %v4867_v52 = vpop.permute.xlu0 %4866  ;;  %v2294_v14 = vadd.f32 %v5100_v22, %v2293_v45 }
 0x976   :  { %v4868_v27 = vunpack.i.l.bf16 %v4867_v52  ;;  %v4869_v3 = vunpack.i.h.bf16 %v4867_v52 }
 0x977   :  { %v2298_v21 = vsel %vm2297_vm4, %v5100_v22, %v2294_v14 }
 0x978   :  { %2426 = vmatpush.msra.mxu3 %v4868_v27  ;;  %v2303_v49 = vsel %vm2300_vm5, %v2302_v60, %v2298_v21 }
 0x979   :  { %v2304_v30 = vmul.f32 %v6229_v0, %v2303_v49 }
 0x97a   :  { %2427 = vmatpush.msra.mxu3 %v4869_v3 }
 0x97b   :  { %4638 = vmatmul.msk.f32.vlgmr.msra.gmra.mxu3 %vm505_vm12, %v2289_v36 }
 0x97c   :  { %4637 = vmatmul.msk.f32.gmra.mxu2 %vm505_vm12, %v2274_v63 }
 0x983   :  { %4639 = vmatmul.msk.f32.gmra.mxu3 %vm505_vm12, %v2304_v30 }
 0x9a5   :  { %v2193_v31 = vpop.xlane.xlu0 %2192 }
 0x9a6   :  { %v2203_v22 = vsub.f32 %v6243_v43, %v2193_v31 }
 0x9a8   :  { %v2217_v0 = vmul.f32 1.442695, %v2203_v22 }
 0x9ad   :  { %v2187_v26 = vpop.xlane.xlu2 %2186 }
 0x9ae   :  { %v2201_v47 = vsub.f32 %v6248_v38, %v2187_v26 }
 0x9b0   :  { %v2213_v6 = vmul.f32 1.442695, %v2201_v47 }
 0x9b2   :  { %5101 = vpow2.f32 %v2213_v6 }
 0x9b5   :  { %v2190_v61 = vpop.xlane.xlu2 %2189 }
 0x9b6   :  { %v2202_v41 = vsub.f32 %v6253_v44, %v2190_v61 }
 0x9b8   :  { %v6278_v25 = vpop.eup %5101  ;;  %v2215_v16 = vmul.f32 1.442695, %v2202_v41 }
 0x9b9   :  { %v2233_v34 = vsel %vm505_vm12, %v6278_v25, 0.0 }
 0x9ba   :  { %5103 = vpow2.f32 %v2215_v16  ;;  %2234 = vadd.xlane.f32.xlu1 %v2233_v34 }
 0x9bb   :  { %5105 = vpow2.f32 %v2217_v0 }
 0x9bd   :  { %v2196_v56 = vpop.xlane.xlu2 %2195 }
 0x9be   :  { %v2204_v38 = vsub.f32 %v6257_v9, %v2196_v56  ;;  %v355_v9 = vld [vmem:[%s7001_s6 + $0x18] sm:$0xff] }
 0x9bf   :  { %2544 = vmatpush.msrb.mxu3 %v355_v9 }
 0x9c0   :  { %v6284_v58 = vpop.eup %5103  ;;  %v2219_v20 = vmul.f32 1.442695, %v2204_v38 }
 0x9c1   :  { %v2236_v44 = vsel %vm505_vm12, %v6284_v58, 0.0  ;;  %v6288_v43 = vpop.eup %5105 }
 0x9c2   :  { %5107 = vpow2.f32 %v2219_v20  ;;  %2237 = vadd.xlane.f32.xlu2 %v2236_v44  ;;  %v2239_v1 = vsel %vm505_vm12, %v6288_v43, 0.0 }
 0x9c8   :  { %v6290_v55 = vpop.eup %5107 }
 0x9c9   :  { %v2242_v33 = vsel %vm505_vm12, %v6290_v55, 0.0 }
 0x9ca   :  { %2240 = vadd.xlane.f32.xlu2 %v2239_v1  ;;  %2243 = vadd.xlane.f32.xlu0 %v2242_v33 }
 0x9d3   :  { %4876 = vrot.lane.b32.xlu1 %v5715_v17, %s5292_s30  ;;  %v6307_v17 = vpop.f32.mrf.mxu0 }
 0x9db   :  { %v6309_v29 = vpop.f32.mrf.mxu0 }
 0x9e2   :  { %4871 = vrot.lane.b32.xlu2 %v5787_v40, %s5292_s30 }
 0x9e3   :  { %v6313_v10 = vpop.f32.mrf.mxu0 }
 0x9eb   :  { %v6321_v61 = vpop.f32.mrf.mxu0 }
 0x9f7   :  { %v2394_v48 = vpop.f32.mrf.mxu2 }
 0x9f8   :  { %4644 = vmatmul.msk.f32.vlgmr.msrb.gmra.mxu3 %vm362_vm11, %v2394_v48 }
 0x9fe   :  { %v2429_v50 = vpop.f32.mrf.mxu3 }
 0x9ff   :  { %v2397_v42 = vpop.f32.mrf.mxu2 }
 0xa00   :  { %4645 = vmatmul.msk.f32.gmra.mxu3 %vm362_vm11, %v2397_v42 }
 0xa06   :  { %v2432_v57 = vpop.f32.mrf.mxu3 }
 0xa08   :  { %4646 = vmatmul.msk.f32.gmra.mxu3 %vm362_vm11, %v2429_v50 }
 0xa10   :  { %4647 = vmatmul.msk.f32.gmra.mxu3 %vm362_vm11, %v2432_v57 }
 0xa2d   :  { %v2235_v18 = vpop.xlane.xlu1 %2234 }
 0xa2e   :  { %5109 = vrcp.f32 %v2235_v18  ;;  %v2316_v3 = vand.u32 2147483648, %v2235_v18  ;;  %vm2310_vm7 = vweird.f32 %v2235_v18  ;;  %v2314_v19 = vand.u32 2147483647, %v2235_v18 }
 0xa30   :  { %v2317_v49 = vor.u32 1.1754944e-38, %v2316_v3  ;;  %vm2315_vm9 = vcmp.eq.f32.partialorder %v2314_v19, 8.507059e+37 }
 0xa34   :  { %v5110_v4 = vpop.eup %5109 }
 0xa35   :  { %v2306_v40 = vmul.f32 %v5110_v4, %v2235_v18  ;;  %v2238_v45 = vpop.xlane.xlu2 %2237  ;;  %vm2311_vm6 = vweird.f32 %v5110_v4 }
 0xa36   :  { %5111 = vrcp.f32 %v2238_v45  ;;  %vm2312_vm8 = vmor %vm2310_vm7, %vm2311_vm6  ;;  %vm2325_vm10 = vweird.f32 %v2238_v45  ;;  %v2331_v22 = vand.u32 2147483648, %v2238_v45  ;;  %v2329_v33 = vand.u32 2147483647, %v2238_v45 }
 0xa37   :  { %v2307_v46 = vsub.f32 1.0, %v2306_v40 }
 0xa38   :  { %vm2330_vm3 = vcmp.eq.f32.partialorder %v2329_v33, 8.507059e+37 }
 0xa39   :  { %v2308_v52 = vmul.f32 %v5110_v4, %v2307_v46 }
 0xa3b   :  { %v2309_v2 = vadd.f32 %v5110_v4, %v2308_v52 }
 0xa3c   :  { %v6311_v7 = vpop.eup %5111 }
 0xa3d   :  { %v2321_v53 = vmul.f32 %v6311_v7, %v2238_v45  ;;  %v6316_v27 = vpop.xlane.xlu0 %2243  ;;  %v2241_v14 = vpop.xlane.xlu2 %2240  ;;  %v2313_v63 = vsel %vm2312_vm8, %v5110_v4, %v2309_v2  ;;  %vm2326_vm13 = vweird.f32 %v6311_v7  ;;  %v2332_v4 = vor.u32 1.1754944e-38, %v2331_v22 }
 0xa3e   :  { %5113 = vrcp.f32 %v6316_v27  ;;  %v2318_v41 = vsel %vm2315_vm9, %v2317_v49, %v2313_v63  ;;  %v2344_v20 = vand.u32 2147483647, %v2241_v14  ;;  %v2346_v44 = vand.u32 2147483648, %v2241_v14  ;;  %vm6327_vm15 = vmor %vm2325_vm10, %vm2326_vm13 }
 0xa3f   :  { %5115 = vrcp.f32 %v2241_v14  ;;  %v2322_v54 = vsub.f32 1.0, %v2321_v53  ;;  %v2319_v42 = vmul.f32 %v6278_v25, %v2318_v41  ;;  %vm2340_vm1 = vweird.f32 %v2241_v14 }
 0xa40   :  { %v2347_v40 = vor.u32 1.1754944e-38, %v2346_v44  ;;  %vm2345_vm4 = vcmp.eq.f32.partialorder %v2344_v20, 8.507059e+37  ;;  %v2361_v45 = vand.u32 2147483648, %v6316_v27  ;;  %vm2355_vm6 = vweird.f32 %v6316_v27 }
 0xa41   :  { %v2323_v21 = vmul.f32 %v6311_v7, %v2322_v54  ;;  %v2359_v2 = vand.u32 2147483647, %v6316_v27  ;;  %v6339_v54 = vpop.f32.mrf.mxu0  ;;  %v1439_v44 = vadd.f32 %v6125_v12, %v6313_v10 }
 0xa42   :  { %v2362_v19 = vor.u32 1.1754944e-38, %v2361_v45 }
 0xa43   :  { %v2324_v38 = vadd.f32 %v6311_v7, %v2323_v21  ;;  %vm2360_vm8 = vcmp.eq.f32.partialorder %v2359_v2, 8.507059e+37 }
 0xa44   :  { %v5114_v36 = vpop.eup %5113 }
 0xa45   :  { %v5116_v60 = vpop.eup %5115  ;;  %v2351_v30 = vmul.f32 %v5114_v36, %v6316_v27  ;;  %v4877_v26 = vpop.permute.xlu1 %4876  ;;  %v2328_v18 = vsel %vm6327_vm15, %v6311_v7, %v2324_v38  ;;  %vm2356_vm5 = vweird.f32 %v5114_v36  ;;  %v2601_v27 = vld [vmem:[%s7003_s8 + $0x18] sm:$0xff] }
 0xa46   :  { %v4872_v47 = vpop.permute.xlu2 %4871  ;;  %v2336_v6 = vmul.f32 %v5116_v60, %v2241_v14  ;;  %v4878_v31 = vunpack.i.l.bf16 %v4877_v26  ;;  %v4879_v56 = vunpack.i.h.bf16 %v4877_v26  ;;  %vm2341_vm14 = vweird.f32 %v5116_v60  ;;  %vm2357_vm7 = vmor %vm2355_vm6, %vm2356_vm5 }
 0xa47   :  { %v2352_v16 = vsub.f32 1.0, %v2351_v30  ;;  %v4873_v34 = vunpack.i.l.bf16 %v4872_v47  ;;  %v4874_v1 = vunpack.i.h.bf16 %v4872_v47  ;;  %vm2342_vm2 = vmor %vm2340_vm1, %vm2341_vm14  ;;  %v2333_v53 = vsel %vm2330_vm3, %v2332_v4, %v2328_v18 }
 0xa48   :  { %v2337_v0 = vsub.f32 1.0, %v2336_v6  ;;  %2496 = vmatpush.msrb.mxu2 %v4878_v31  ;;  %v2334_v7 = vmul.f32 %v6284_v58, %v2333_v53  ;;  %v2600_v58 = vld [vmem:[%s7003_s8 + $0x10] sm:$0xff]  ;;  %v1433_v26 = vadd.f32 %v6109_v11, %v6307_v17  ;;  %v6369_v6 = vld [vmem:[%s7002_s7] ss:$0 sm:$0xff] }
 0xa49   :  { %2461 = vmatpush.msra.mxu1 %v4873_v34  ;;  %v2353_v9 = vmul.f32 %v5114_v36, %v2352_v16  ;;  %v1436_v34 = vadd.f32 %v6119_v8, %v6309_v29 }
 0xa4a   :  { %v2338_v48 = vmul.f32 %v5116_v60, %v2337_v0  ;;  %2497 = vmatpush.msrb.mxu2 %v4879_v56 }
 0xa4b   :  { %2462 = vmatpush.msra.mxu1 %v4874_v1  ;;  %v2354_v25 = vadd.f32 %v5114_v36, %v2353_v9 }
 0xa4c   :  { %v2339_v57 = vadd.f32 %v5116_v60, %v2338_v48  ;;  %4640 = vmatmul.msk.f32.vlgmr.msra.gmra.mxu1 %vm505_vm12, %v2319_v42  ;;  %v1442_v48 = vadd.f32 %v6129_v28, %v6321_v61  ;;  %v2606_v61 = vld [vmem:[%s7005_s10 + $0x18] sm:$0xff] }
 0xa4d   :  { %v2358_v3 = vsel %vm2357_vm7, %v5114_v36, %v2354_v25  ;;  %2647 = vmatpush.msrb.mxu1 %v2601_v27  ;;  %v2599_v36 = vld [vmem:[%s7003_s8 + $0x8] sm:$0xff]  ;;  %2875 = vmatpush.msra.mxu2 %v2606_v61 }
 0xa4e   :  { %v2343_v46 = vsel %vm2342_vm2, %v5116_v60, %v2339_v57  ;;  %v2363_v63 = vsel %vm2360_vm8, %v2362_v19, %v2358_v3  ;;  %v2604_v25 = vld [vmem:[%s7005_s10 + $0x8] sm:$0xff] }
 0xa4f   :  { %v2348_v52 = vsel %vm2345_vm4, %v2347_v40, %v2343_v46  ;;  %v2364_v21 = vmul.f32 %v6290_v55, %v2363_v63  ;;  %2648 = vmatpush.msrb.mxu1 %v2600_v58  ;;  %v2598_v55 = vld [vmem:[%s7003_s8] sm:$0xff]  ;;  %v2605_v40 = vld [vmem:[%s7005_s10 + $0x10] sm:$0xff] }
 0xa50   :  { %v2349_v14 = vmul.f32 %v6288_v43, %v2348_v52  ;;  %v6346_v43 = vpop.f32.mrf.mxu0  ;;  %2876 = vmatpush.msra.mxu2 %v2605_v40  ;;  %v2603_v52 = vld [vmem:[%s7005_s10] sm:$0xff] }
 0xa51   :  { %2649 = vmatpush.msrb.mxu1 %v2599_v36 }
 0xa52   :  { %4642 = vmatmul.msk.f32.vlgmr.msrb.gmra.mxu2 %vm505_vm12, %v2349_v14 }
 0xa53   :  { %2650 = vmatpush.msrb.mxu1 %v2598_v55  ;;  %2877 = vmatpush.msra.mxu2 %v2604_v25 }
 0xa54   :  { %4641 = vmatmul.msk.f32.gmra.mxu1 %vm505_vm12, %v2334_v7 }
 0xa55   :  { %2878 = vmatpush.msra.mxu2 %v2603_v52 }
 0xa58   :  { %v6360_v60 = vpop.f32.mrf.mxu0 }
 0xa5a   :  { %4643 = vmatmul.msk.f32.gmra.mxu2 %vm505_vm12, %v2364_v21 }
 0xa60   :  { %v6362_v49 = vpop.f32.mrf.mxu0 }
 0xa68   :  { %v1985_v30 = vpop.f32.mrf.mxu0 }
 0xa69   :  { %v2009_v47 = vadd.f32 %v1985_v30, %v1433_v26 }
 0xa70   :  { %v1988_v16 = vpop.f32.mrf.mxu0 }
 0xa71   :  { %v2010_v56 = vadd.f32 %v1988_v16, %v1436_v34 }
 0xa78   :  { %v1991_v20 = vpop.f32.mrf.mxu0 }
 0xa79   :  { %v2011_v33 = vadd.f32 %v1991_v20, %v1439_v44 }
 0xa7b   :  { %v2546_v31 = vpop.f32.mrf.mxu3 }
 0xa7c   :  { %v2570_v41 = vadd.f32 %v2546_v31, %v2009_v47 }
 0xa7e   :  { %v2582_v22 = vadd.f32 %v6369_v6, %v2570_v41 }
 0xa80   :  { %v2590_v0 = vadd.f32 %v2582_v22, %v5527_v51  ;;  %v1994_v29 = vpop.f32.mrf.mxu0 }
 0xa81   :  { %v2012_v50 = vadd.f32 %v1994_v29, %v1442_v48 }
 0xa82   :  { %4652 = vmatmul.msk.f32.vlgmr.msrb.gmra.mxu1 %vm73_vm0, %v2590_v0 }
 0xa83   :  { %v2549_v11 = vpop.f32.mrf.mxu3 }
 0xa84   :  { %v2571_v17 = vadd.f32 %v2549_v11, %v2010_v56 }
 0xa86   :  { %v2583_v38 = vadd.f32 %v6369_v6, %v2571_v17 }
 0xa88   :  { %v2591_v1 = vadd.f32 %v2583_v38, %v5543_v5 }
 0xa8a   :  { %4653 = vmatmul.msk.f32.gmra.mxu1 %vm73_vm0, %v2591_v1 }
 0xa8b   :  { %v2552_v9 = vpop.f32.mrf.mxu3 }
 0xa8c   :  { %v2572_v8 = vadd.f32 %v2552_v9, %v2011_v33 }
 0xa8e   :  { %v2584_v51 = vadd.f32 %v6369_v6, %v2572_v8 }
 0xa90   :  { %v2592_v42 = vadd.f32 %v2584_v51, %v5552_v15 }
 0xa92   :  { %4654 = vmatmul.msk.f32.gmra.mxu1 %vm73_vm0, %v2592_v42 }
 0xa93   :  { %v2555_v57 = vpop.f32.mrf.mxu3 }
 0xa94   :  { %v2573_v12 = vadd.f32 %v2555_v57, %v2012_v50 }
 0xa96   :  { %v2585_v5 = vadd.f32 %v6369_v6, %v2573_v12 }
 0xa98   :  { %v2593_v10 = vadd.f32 %v2585_v5, %v5560_v24  ;;  %v6399_v24 = vld [vmem:[%s7004_s9] ss:$0 sm:$0xff] }
 0xa9a   :  { %4655 = vmatmul.msk.f32.gmra.mxu1 %vm73_vm0, %v2593_v10 }
 0xac9   :  { %v2464_v18 = vpop.f32.mrf.mxu1 }
 0xaca   :  { %4648 = vmatmul.msk.f32.gmra.mxu3 %vm362_vm11, %v2464_v18 }
 0xad1   :  { %v2467_v4 = vpop.f32.mrf.mxu1 }
 0xad2   :  { %4649 = vmatmul.msk.f32.gmra.mxu3 %vm362_vm11, %v2467_v4 }
 0xad5   :  { %v2499_v28 = vpop.f32.mrf.mxu2 }
 0xada   :  { %4650 = vmatmul.msk.f32.gmra.mxu3 %vm362_vm11, %v2499_v28 }
 0xadd   :  { %v2502_v15 = vpop.f32.mrf.mxu2 }
 0xae2   :  { %4651 = vmatmul.msk.f32.gmra.mxu3 %vm362_vm11, %v2502_v15 }
 0xaff   :  { %v2652_v46 = vpop.f32.mrf.mxu1 }
 0xb00   :  { %v2653_v45 = vadd.f32 %v6399_v24, %v2652_v46 }
 0xb02   :  { %v4660_v53 = vmul.f32 -1.442695, %v2653_v45 }
 0xb04   :  { %5117 = vpow2.f32 %v4660_v53 }
 0xb07   :  { %v2655_v14 = vpop.f32.mrf.mxu1 }
 0xb08   :  { %v2656_v2 = vadd.f32 %v6399_v24, %v2655_v14 }
 0xb0a   :  { %v5118_v7 = vpop.eup %5117  ;;  %v4661_v3 = vmul.f32 -1.442695, %v2656_v2 }
 0xb0b   :  { %v2700_v19 = vadd.f32 1.0, %v5118_v7 }
 0xb0c   :  { %5119 = vpow2.f32 %v4661_v3 }
 0xb0d   :  { %5121 = vrcp.f32 %v2700_v19  ;;  %v2719_v47 = vand.u32 2147483648, %v2700_v19  ;;  %v2717_v22 = vand.u32 2147483647, %v2700_v19  ;;  %vm2713_vm9 = vweird.f32 %v2700_v19 }
 0xb0f   :  { %v2658_v63 = vpop.f32.mrf.mxu1  ;;  %v2720_v17 = vor.u32 1.1754944e-38, %v2719_v47  ;;  %vm2718_vm13 = vcmp.eq.f32.partialorder %v2717_v22, 8.507059e+37 }
 0xb10   :  { %v6413_v21 = vadd.f32 %v6399_v24, %v2658_v63 }
 0xb12   :  { %v5120_v27 = vpop.eup %5119  ;;  %v4662_v58 = vmul.f32 -1.442695, %v6413_v21 }
 0xb13   :  { %v5122_v36 = vpop.eup %5121  ;;  %v2701_v55 = vadd.f32 1.0, %v5120_v27 }
 0xb14   :  { %v2709_v30 = vmul.f32 %v5122_v36, %v2700_v19  ;;  %5123 = vpow2.f32 %v4662_v58  ;;  %vm2714_vm12 = vweird.f32 %v5122_v36 }
 0xb15   :  { %5125 = vrcp.f32 %v2701_v55  ;;  %vm2715_vm10 = vmor %vm2713_vm9, %vm2714_vm12  ;;  %v2734_v8 = vand.u32 2147483648, %v2701_v55  ;;  %v2732_v29 = vand.u32 2147483647, %v2701_v55  ;;  %vm2728_vm15 = vweird.f32 %v2701_v55 }
 0xb16   :  { %v2710_v26 = vsub.f32 1.0, %v2709_v30 }
 0xb17   :  { %v2661_v31 = vpop.f32.mrf.mxu1  ;;  %v2735_v57 = vor.u32 1.1754944e-38, %v2734_v8  ;;  %vm2733_vm2 = vcmp.eq.f32.partialorder %v2732_v29, 8.507059e+37 }
 0xb18   :  { %v2711_v41 = vmul.f32 %v5122_v36, %v2710_v26  ;;  %v6417_v16 = vadd.f32 %v6399_v24, %v2661_v31  ;;  %v1997_v26 = vpop.f32.mrf.mxu0  ;;  %v2915_v31 = vld [vmem:[%s7007_s12 + $0x18] sm:$0xff] }
 0xb19   :  { %2944 = vmatpush.msra.mxu0 %v2915_v31  ;;  %v6519_v31 = vld [vmem:[%s7008_s13] ss:$0 sm:$0xff] }
 0xb1a   :  { %v5124_v34 = vpop.eup %5123  ;;  %v2712_v0 = vadd.f32 %v5122_v36, %v2711_v41  ;;  %v4663_v56 = vmul.f32 -1.442695, %v6417_v16  ;;  %v2914_v41 = vld [vmem:[%s7007_s12 + $0x10] sm:$0xff] }
 0xb1b   :  { %v5126_v11 = vpop.eup %5125  ;;  %v2702_v38 = vadd.f32 1.0, %v5124_v34  ;;  %2945 = vmatpush.msra.mxu0 %v2914_v41 }
 0xb1c   :  { %v2716_v20 = vsel %vm2715_vm10, %v5122_v36, %v2712_v0  ;;  %v2724_v44 = vmul.f32 %v5126_v11, %v2701_v55  ;;  %5127 = vpow2.f32 %v4663_v56  ;;  %vm2729_vm14 = vweird.f32 %v5126_v11  ;;  %v2908_v56 = vld [vmem:[%s7028_s29] sm:$0xff] }
 0xb1d   :  { %v2721_v1 = vsel %vm2718_vm13, %v2720_v17, %v2716_v20  ;;  %5129 = vrcp.f32 %v2702_v38  ;;  %vm2730_vm1 = vmor %vm2728_vm15, %vm2729_vm14  ;;  %v2749_v15 = vand.u32 2147483648, %v2702_v38  ;;  %v2747_v40 = vand.u32 2147483647, %v2702_v38 }
 0xb1e   :  { %v2828_v33 = vmul.f32 %v2721_v1, %v2653_v45  ;;  %v2725_v9 = vsub.f32 1.0, %v2724_v44  ;;  %vm2743_vm4 = vweird.f32 %v2702_v38  ;;  %v2963_v44 = vld [vmem:[%s7009_s14 + $0x10] sm:$0xff] }
 0xb1f   :  { %v2750_v45 = vor.u32 1.1754944e-38, %v2749_v15  ;;  %vm2748_vm6 = vcmp.eq.f32.partialorder %v2747_v40, 8.507059e+37 }
 0xb20   :  { %v2726_v51 = vmul.f32 %v5126_v11, %v2725_v9  ;;  %4668 = vmatmul.msk.f32.vlgmr.msra.gmra.mxu2 %vm73_vm0, %v2828_v33  ;;  %v2000_v22 = vpop.f32.mrf.mxu0  ;;  %v1451_v9 = vadd.f32 %v6157_v13, %v6360_v60 }
 0xb22   :  { %v5128_v48 = vpop.eup %5127  ;;  %v2727_v42 = vadd.f32 %v5126_v11, %v2726_v51 }
 0xb23   :  { %v5130_v50 = vpop.eup %5129  ;;  %v2703_v12 = vadd.f32 1.0, %v5128_v48 }
 0xb24   :  { %v2731_v5 = vsel %vm2730_vm1, %v5126_v11, %v2727_v42  ;;  %v2739_v10 = vmul.f32 %v5130_v50, %v2702_v38  ;;  %vm2744_vm3 = vweird.f32 %v5130_v50  ;;  %v1448_v11 = vadd.f32 %v6143_v23, %v6346_v43  ;;  %v2964_v38 = vld [vmem:[%s7009_s14 + $0x18] sm:$0xff]  ;;  %v2909_v43 = vld [vmem:[%s7028_s29 + $0x8] sm:$0xff] }
 0xb25   :  { %v2736_v18 = vsel %vm2733_vm2, %v2735_v57, %v2731_v5  ;;  %5131 = vrcp.f32 %v2703_v12  ;;  %vm2745_vm5 = vmor %vm2743_vm4, %vm2744_vm3  ;;  %v2762_v63 = vand.u32 2147483647, %v2703_v12  ;;  %vm2758_vm8 = vweird.f32 %v2703_v12  ;;  %v2910_v57 = vld [vmem:[%s7028_s29 + $0x10] sm:$0xff] }
 0xb26   :  { %v2829_v4 = vmul.f32 %v2736_v18, %v2656_v2  ;;  %v2740_v28 = vsub.f32 1.0, %v2739_v10  ;;  %v2764_v2 = vand.u32 2147483648, %v2703_v12  ;;  %v2014_v20 = vadd.f32 %v2000_v22, %v1448_v11  ;;  %v2911_v18 = vld [vmem:[%s7028_s29 + $0x18] sm:$0xff] }
 0xb27   :  { %vm2763_vm9 = vcmp.eq.f32.partialorder %v2762_v63, 8.507059e+37 }
 0xb28   :  { %v2741_v61 = vmul.f32 %v5130_v50, %v2740_v28  ;;  %4669 = vmatmul.msk.f32.gmra.mxu2 %vm73_vm0, %v2829_v4  ;;  %v2765_v58 = vor.u32 1.1754944e-38, %v2764_v2  ;;  %v2003_v23 = vpop.f32.mrf.mxu0 }
 0xb29   :  { %v2015_v51 = vadd.f32 %v2003_v23, %v1451_v9 }
 0xb2a   :  { %v2742_v46 = vadd.f32 %v5130_v50, %v2741_v61 }
 0xb2b   :  { %v5132_v25 = vpop.eup %5131 }
 0xb2c   :  { %v2746_v52 = vsel %vm2745_vm5, %v5130_v50, %v2742_v46  ;;  %v2754_v53 = vmul.f32 %v5132_v25, %v2703_v12  ;;  %vm2759_vm7 = vweird.f32 %v5132_v25  ;;  %v1454_v12 = vadd.f32 %v6162_v35, %v6362_v49  ;;  %v2961_v35 = vld [vmem:[%s7009_s14] sm:$0xff] }
 0xb2d   :  { %v2751_v14 = vsel %vm2748_vm6, %v2750_v45, %v2746_v52  ;;  %vm2760_vm12 = vmor %vm2758_vm8, %vm2759_vm7  ;;  %v6489_v49 = vld [vmem:[%s7006_s11] ss:$0 sm:$0xff] }
 0xb2e   :  { %v2830_v7 = vmul.f32 %v2751_v14, %v6413_v21  ;;  %v2755_v3 = vsub.f32 1.0, %v2754_v53  ;;  %v1445_v21 = vadd.f32 %v6136_v62, %v6339_v54  ;;  %v2912_v54 = vld [vmem:[%s7007_s12] sm:$0xff] }
 0xb30   :  { %v2756_v19 = vmul.f32 %v5132_v25, %v2755_v3  ;;  %4670 = vmatmul.msk.f32.gmra.mxu2 %vm73_vm0, %v2830_v7  ;;  %v2013_v47 = vadd.f32 %v1997_v26, %v1445_v21  ;;  %v2006_v50 = vpop.f32.mrf.mxu0 }
 0xb32   :  { %v2757_v27 = vadd.f32 %v5132_v25, %v2756_v19 }
 0xb34   :  { %v2761_v36 = vsel %vm2760_vm12, %v5132_v25, %v2757_v27 }
 0xb35   :  { %v2766_v55 = vsel %vm2763_vm9, %v2765_v58, %v2761_v36 }
 0xb36   :  { %v2831_v30 = vmul.f32 %v2766_v55, %v6417_v16  ;;  %v2913_v16 = vld [vmem:[%s7007_s12 + $0x8] sm:$0xff] }
 0xb37   :  { %2946 = vmatpush.msra.mxu0 %v2913_v16 }
 0xb38   :  { %4671 = vmatmul.msk.f32.gmra.mxu2 %vm73_vm0, %v2831_v30 }
 0xb39   :  { %2947 = vmatpush.msra.mxu0 %v2912_v54 }
 0xb3a   :  { %4676 = vmatmul.msk.f32.vlgmr.msra.gmra.mxu0 %vm73_vm0, %v2908_v56 }
 0xb3b   :  { %3005 = vmatpush.msrb.mxu0 %v2964_v38 }
 0xb3d   :  { %3006 = vmatpush.msrb.mxu0 %v2963_v44 }
 0xb42   :  { %4677 = vmatmul.msk.f32.gmra.mxu0 %vm73_vm0, %v2909_v43 }
 0xb4a   :  { %4678 = vmatmul.msk.f32.gmra.mxu0 %vm73_vm0, %v2910_v57 }
 0xb4d   :  { %v2558_v34 = vpop.f32.mrf.mxu3 }
 0xb4e   :  { %v2574_v0 = vadd.f32 %v2558_v34, %v2013_v47 }
 0xb50   :  { %v2586_v62 = vadd.f32 %v6369_v6, %v2574_v0 }
 0xb52   :  { %v2594_v17 = vadd.f32 %v2586_v62, %v5567_v32  ;;  %4679 = vmatmul.msk.f32.gmra.mxu0 %vm73_vm0, %v2911_v18 }
 0xb54   :  { %4656 = vmatmul.msk.f32.gmra.mxu1 %vm73_vm0, %v2594_v17 }
 0xb55   :  { %v2561_v1 = vpop.f32.mrf.mxu3 }
 0xb56   :  { %v2575_v33 = vadd.f32 %v2561_v1, %v2014_v20 }
 0xb58   :  { %v2587_v32 = vadd.f32 %v6369_v6, %v2575_v33 }
 0xb5a   :  { %v2595_v8 = vadd.f32 %v2587_v32, %v5574_v37  ;;  %v2016_v37 = vadd.f32 %v2006_v50, %v1454_v12 }
 0xb5c   :  { %4657 = vmatmul.msk.f32.gmra.mxu1 %vm73_vm0, %v2595_v8 }
 0xb5d   :  { %v2564_v29 = vpop.f32.mrf.mxu3 }
 0xb5e   :  { %v2576_v48 = vadd.f32 %v2564_v29, %v2015_v51 }
 0xb60   :  { %v2588_v42 = vadd.f32 %v6369_v6, %v2576_v48 }
 0xb62   :  { %v2596_v13 = vadd.f32 %v2588_v42, %v5581_v39  ;;  %v2962_v39 = vld [vmem:[%s7009_s14 + $0x8] sm:$0xff] }
 0xb63   :  { %3007 = vmatpush.msrb.mxu0 %v2962_v39 }
 0xb64   :  { %4658 = vmatmul.msk.f32.gmra.mxu1 %vm73_vm0, %v2596_v13 }
 0xb65   :  { %v2567_v60 = vpop.f32.mrf.mxu3  ;;  %3008 = vmatpush.msrb.mxu0 %v2961_v35 }
 0xb66   :  { %v2577_v5 = vadd.f32 %v2567_v60, %v2016_v37 }
 0xb68   :  { %v2589_v10 = vadd.f32 %v6369_v6, %v2577_v5 }
 0xb6a   :  { %v2597_v4 = vadd.f32 %v2589_v10, %v5599_v59 }
 0xb6c   :  { %4659 = vmatmul.msk.f32.gmra.mxu1 %vm73_vm0, %v2597_v4 }
 0xba3   :  { %v2880_v59 = vpop.f32.mrf.mxu2 }
 0xba4   :  { %v6492_v6 = vadd.f32 %v6489_v49, %v2880_v59 }
 0xba6   :  { %4680 = vmatmul.msk.f32.vlgmr.msrb.gmra.mxu0 %vm73_vm0, %v6492_v6 }
 0xbab   :  { %v2883_v28 = vpop.f32.mrf.mxu2 }
 0xbac   :  { %v6497_v15 = vadd.f32 %v6489_v49, %v2883_v28 }
 0xbae   :  { %4681 = vmatmul.msk.f32.gmra.mxu0 %vm73_vm0, %v6497_v15 }
 0xbb3   :  { %v2886_v61 = vpop.f32.mrf.mxu2 }
 0xbb4   :  { %v2887_v40 = vadd.f32 %v6489_v49, %v2886_v61 }
 0xbb6   :  { %2904 = vst.msk [vmem:[#allocation4] sm:$0xff] %vm73_vm0, %v2887_v40  ;;  %4682 = vmatmul.msk.f32.gmra.mxu0 %vm73_vm0, %v2887_v40 }
 0xbb7   :  { %v2949_v21 = vpop.f32.mrf.mxu0 }
 0xbb8   :  { %v6525_v62 = vadd.f32 %v6519_v31, %v2949_v21 }
 0xbba   :  { %3298 = vrot.lane.b32.xlu1 %v6525_v62, %s5285_s1 }
 0xbbb   :  { %v2889_v46 = vpop.f32.mrf.mxu2 }
 0xbbc   :  { %v2890_v25 = vadd.f32 %v6489_v49, %v2889_v46 }
 0xbbe   :  { %2905 = vst.msk [vmem:[#allocation4 + $0x8] sm:$0xff] %vm73_vm0, %v2890_v25  ;;  %4683 = vmatmul.msk.f32.gmra.mxu0 %vm73_vm0, %v2890_v25 }
 0xbd1   :  { %v2664_v45 = vpop.f32.mrf.mxu1 }
 0xbd2   :  { %v2665_v52 = vadd.f32 %v6399_v24, %v2664_v45 }
 0xbd4   :  { %v4664_v53 = vmul.f32 -1.442695, %v2665_v52 }
 0xbd6   :  { %5133 = vpow2.f32 %v4664_v53 }
 0xbd9   :  { %v2667_v14 = vpop.f32.mrf.mxu1 }
 0xbda   :  { %v6509_v7 = vadd.f32 %v6399_v24, %v2667_v14 }
 0xbdc   :  { %v5134_v3 = vpop.eup %5133  ;;  %v4665_v2 = vmul.f32 -1.442695, %v6509_v7 }
 0xbdd   :  { %v2704_v19 = vadd.f32 1.0, %v5134_v3 }
 0xbde   :  { %5135 = vpow2.f32 %v4665_v2 }
 0xbdf   :  { %5137 = vrcp.f32 %v2704_v19  ;;  %v2777_v41 = vand.u32 2147483647, %v2704_v19  ;;  %v2779_v22 = vand.u32 2147483648, %v2704_v19  ;;  %vm2773_vm13 = vweird.f32 %v2704_v19 }
 0xbe1   :  { %v2670_v63 = vpop.f32.mrf.mxu1  ;;  %v2780_v38 = vor.u32 1.1754944e-38, %v2779_v22  ;;  %vm2778_vm15 = vcmp.eq.f32.partialorder %v2777_v41, 8.507059e+37 }
 0xbe2   :  { %v6513_v27 = vadd.f32 %v6399_v24, %v2670_v63 }
 0xbe4   :  { %v5136_v58 = vpop.eup %5135  ;;  %v4666_v36 = vmul.f32 -1.442695, %v6513_v27 }
 0xbe5   :  { %v5138_v55 = vpop.eup %5137  ;;  %v2705_v30 = vadd.f32 1.0, %v5136_v58 }
 0xbe6   :  { %v2769_v26 = vmul.f32 %v5138_v55, %v2704_v19  ;;  %5139 = vpow2.f32 %v4666_v36  ;;  %vm2774_vm10 = vweird.f32 %v5138_v55 }
 0xbe7   :  { %5141 = vrcp.f32 %v2705_v30  ;;  %vm2775_vm14 = vmor %vm2773_vm13, %vm2774_vm10  ;;  %v2794_v9 = vand.u32 2147483648, %v2705_v30  ;;  %v2792_v51 = vand.u32 2147483647, %v2705_v30  ;;  %vm2788_vm2 = vweird.f32 %v2705_v30 }
 0xbe8   :  { %v2770_v47 = vsub.f32 1.0, %v2769_v26 }
 0xbe9   :  { %v2673_v34 = vpop.f32.mrf.mxu1  ;;  %v2795_v50 = vor.u32 1.1754944e-38, %v2794_v9  ;;  %vm2793_vm4 = vcmp.eq.f32.partialorder %v2792_v51, 8.507059e+37 }
 0xbea   :  { %v2771_v0 = vmul.f32 %v5138_v55, %v2770_v47  ;;  %v6522_v16 = vadd.f32 %v6399_v24, %v2673_v34  ;;  %v2952_v24 = vpop.f32.mrf.mxu0 }
 0xbeb   :  { %v6531_v43 = vadd.f32 %v6519_v31, %v2952_v24 }
 0xbec   :  { %v5140_v54 = vpop.eup %5139  ;;  %v2772_v56 = vadd.f32 %v5138_v55, %v2771_v0  ;;  %v4667_v11 = vmul.f32 -1.442695, %v6522_v16 }
 0xbed   :  { %v5142_v17 = vpop.eup %5141  ;;  %v2706_v20 = vadd.f32 1.0, %v5140_v54  ;;  %3300 = vrot.lane.b32.xlu2 %v6531_v43, %s5285_s1 }
 0xbee   :  { %v2776_v44 = vsel %vm2775_vm14, %v5138_v55, %v2772_v56  ;;  %v2784_v1 = vmul.f32 %v5142_v17, %v2705_v30  ;;  %5143 = vpow2.f32 %v4667_v11  ;;  %vm2789_vm1 = vweird.f32 %v5142_v17 }
 0xbef   :  { %v2781_v33 = vsel %vm2778_vm15, %v2780_v38, %v2776_v44  ;;  %5145 = vrcp.f32 %v2706_v20  ;;  %vm2790_vm3 = vmor %vm2788_vm2, %vm2789_vm1  ;;  %v2809_v4 = vand.u32 2147483648, %v2706_v20  ;;  %v2807_v35 = vand.u32 2147483647, %v2706_v20 }
 0xbf0   :  { %v2832_v23 = vmul.f32 %v2781_v33, %v2665_v52  ;;  %v2785_v32 = vsub.f32 1.0, %v2784_v1  ;;  %vm2803_vm6 = vweird.f32 %v2706_v20 }
 0xbf1   :  { %v2810_v61 = vor.u32 1.1754944e-38, %v2809_v4  ;;  %vm2808_vm8 = vcmp.eq.f32.partialorder %v2807_v35, 8.507059e+37 }
 0xbf2   :  { %v2786_v8 = vmul.f32 %v5142_v17, %v2785_v32  ;;  %4672 = vmatmul.msk.f32.gmra.mxu2 %vm73_vm0, %v2832_v23  ;;  %v2955_v37 = vpop.f32.mrf.mxu0 }
 0xbf3   :  { %v6538_v18 = vadd.f32 %v6519_v31, %v2955_v37 }
 0xbf4   :  { %v5144_v29 = vpop.eup %5143  ;;  %v2787_v48 = vadd.f32 %v5142_v17, %v2786_v8 }
 0xbf5   :  { %v5146_v42 = vpop.eup %5145  ;;  %v2707_v57 = vadd.f32 1.0, %v5144_v29 }
 0xbf6   :  { %v2791_v12 = vsel %vm2790_vm3, %v5142_v17, %v2787_v48  ;;  %v2799_v13 = vmul.f32 %v5146_v42, %v2706_v20  ;;  %vm2804_vm5 = vweird.f32 %v5146_v42 }
 0xbf7   :  { %v2796_v60 = vsel %vm2793_vm4, %v2795_v50, %v2791_v12  ;;  %5147 = vrcp.f32 %v2707_v57  ;;  %vm2805_vm7 = vmor %vm2803_vm6, %vm2804_vm5  ;;  %v2822_v2 = vand.u32 2147483647, %v2707_v57  ;;  %vm2818_vm9 = vweird.f32 %v2707_v57 }
 0xbf8   :  { %v2833_v5 = vmul.f32 %v2796_v60, %v6509_v7  ;;  %v2800_v10 = vsub.f32 1.0, %v2799_v13  ;;  %v2824_v7 = vand.u32 2147483648, %v2707_v57 }
 0xbf9   :  { %vm2823_vm13 = vcmp.eq.f32.partialorder %v2822_v2, 8.507059e+37 }
 0xbfa   :  { %v2801_v39 = vmul.f32 %v5146_v42, %v2800_v10  ;;  %4673 = vmatmul.msk.f32.gmra.mxu2 %vm73_vm0, %v2833_v5  ;;  %v2958_v25 = vpop.f32.mrf.mxu0  ;;  %v2825_v63 = vor.u32 1.1754944e-38, %v2824_v7 }
 0xbfb   :  { %v6542_v52 = vadd.f32 %v6519_v31, %v2958_v25 }
 0xbfc   :  { %v2802_v59 = vadd.f32 %v5146_v42, %v2801_v39 }
 0xbfd   :  { %v5148_v28 = vpop.eup %5147 }
 0xbfe   :  { %v2806_v40 = vsel %vm2805_vm7, %v5146_v42, %v2802_v59  ;;  %v2814_v46 = vmul.f32 %v5148_v28, %v2707_v57  ;;  %vm2819_vm12 = vweird.f32 %v5148_v28 }
 0xbff   :  { %v2811_v45 = vsel %vm2808_vm8, %v2810_v61, %v2806_v40  ;;  %vm2820_vm10 = vmor %vm2818_vm9, %vm2819_vm12 }
 0xc00   :  { %v2834_v53 = vmul.f32 %v2811_v45, %v6513_v27  ;;  %v2815_v14 = vsub.f32 1.0, %v2814_v46  ;;  %v4967_v27 = vld [vmem:[%s7010_s15] ss:$0 sm:$0xff] }
 0xc02   :  { %v2816_v3 = vmul.f32 %v5148_v28, %v2815_v14  ;;  %4674 = vmatmul.msk.f32.gmra.mxu2 %vm73_vm0, %v2834_v53 }
 0xc04   :  { %v2817_v19 = vadd.f32 %v5148_v28, %v2816_v3 }
 0xc06   :  { %v2821_v58 = vsel %vm2820_vm10, %v5148_v28, %v2817_v19 }
 0xc07   :  { %v2826_v36 = vsel %vm2823_vm13, %v2825_v63, %v2821_v58 }
 0xc08   :  { %v2835_v55 = vmul.f32 %v2826_v36, %v6522_v16 }
 0xc0a   :  { %4675 = vmatmul.msk.f32.gmra.mxu2 %vm73_vm0, %v2835_v55 }
 0xc23   :  { %v3010_v30 = vpop.f32.mrf.mxu0 }
 0xc24   :  { %v6551_v26 = vadd.f32 %v4967_v27, %v3010_v30 }
 0xc26   :  { %3302 = vrot.lane.b32.xlu0 %v6551_v26, %s5285_s1 }
 0xc2b   :  { %v3013_v21 = vpop.f32.mrf.mxu0 }
 0xc2c   :  { %v6555_v47 = vadd.f32 %v4967_v27, %v3013_v21  ;;  %v3299_v4 = vpop.permute.xlu1 %3298 }
 0xc2e   :  { %3304 = vrot.lane.b32.xlu0 %v6555_v47, %s5285_s1  ;;  %v6561_v41 = vpack.i.bf16 %v6551_v26, %v6555_v47 }
 0xc33   :  { %v3016_v31 = vpop.f32.mrf.mxu0 }
 0xc34   :  { %v6565_v34 = vadd.f32 %v4967_v27, %v3016_v31 }
 0xc36   :  { %4881 = vrot.lane.b32.xlu0 %v6561_v41, %s5282_s20 }
 0xc3b   :  { %v3019_v22 = vpop.f32.mrf.mxu0 }
 0xc3c   :  { %v6567_v0 = vadd.f32 %v4967_v27, %v3019_v22 }
 0xc3e   :  { %4688 = vmatpush.xpose.msk.msra.mxu3 %vm362_vm11, %v6567_v0  ;;  %3306 = vrot.lane.b32.xlu0 %v6565_v34, %s5285_s1  ;;  %v6575_v16 = vpack.i.bf16 %v6565_v34, %v6567_v0 }
 0xc40   :  { %4886 = vrot.lane.b32.xlu2 %v6575_v16, %s5282_s20 }
 0xc42   :  { %4689 = vmatpush.xpose.msk.msra.mxu3 %vm362_vm11, %v6565_v34 }
 0xc46   :  { %4690 = vmatpush.xpose.msk.msra.mxu3 %vm362_vm11, %v6555_v47  ;;  %3308 = vrot.lane.b32.xlu0 %v6567_v0, %s5285_s1 }
 0xc47   :  { %v3301_v24 = vpop.permute.xlu2 %3300 }
 0xc4a   :  { %4691 = vmatpush.xpose.msk.msra.mxu3 %vm362_vm11, %v6551_v26 }
 0xc4d   :  { %4692 = vmatmul.msk.f32.vlgmr.msra.gmra.mxu3 %vm362_vm11, %v6525_v62 }
 0xc55   :  { %4693 = vmatmul.msk.f32.gmra.mxu3 %vm362_vm11, %v6531_v43 }
 0xc75   :  { %v2892_v54 = vpop.f32.mrf.mxu2 }
 0xc76   :  { %v6592_v56 = vadd.f32 %v6489_v49, %v2892_v54 }
 0xc78   :  { %4684 = vmatmul.msk.f32.gmra.mxu0 %vm73_vm0, %v6592_v56 }
 0xc7d   :  { %v2895_v11 = vpop.f32.mrf.mxu2 }
 0xc7e   :  { %v6597_v17 = vadd.f32 %v6489_v49, %v2895_v11 }
 0xc80   :  { %4685 = vmatmul.msk.f32.gmra.mxu0 %vm73_vm0, %v6597_v17 }
 0xc85   :  { %v2898_v38 = vpop.f32.mrf.mxu2 }
 0xc86   :  { %v2899_v20 = vadd.f32 %v6489_v49, %v2898_v38 }
 0xc88   :  { %2906 = vst.msk [vmem:[#allocation4 + $0x10] sm:$0xff] %vm73_vm0, %v2899_v20  ;;  %4686 = vmatmul.msk.f32.gmra.mxu0 %vm73_vm0, %v2899_v20 }
 0xc8d   :  { %v2901_v44 = vpop.f32.mrf.mxu2 }
 0xc8e   :  { %v2902_v1 = vadd.f32 %v6489_v49, %v2901_v44 }
 0xc90   :  { %2907 = vst.msk [vmem:[#allocation4 + $0x18] sm:$0xff] %vm73_vm0, %v2902_v1  ;;  %4687 = vmatmul.msk.f32.gmra.mxu0 %vm73_vm0, %v2902_v1 }
 0xc98   :  { %v3303_v33 = vpop.permute.xlu0 %3302 }
 0xc9a   :  { %v4887_v23 = vpop.permute.xlu2 %4886 }
 0xc9b   :  { %v4888_v32 = vunpack.i.l.bf16 %v4887_v23  ;;  %v4889_v9 = vunpack.i.h.bf16 %v4887_v23 }
 0xc9d   :  { %3246 = vmatpush.msrb.mxu2 %v4888_v32 }
 0xc9f   :  { %3247 = vmatpush.msrb.mxu2 %v4889_v9 }
 0xca0   :  { %v3305_v8 = vpop.permute.xlu0 %3304 }
 0xca8   :  { %v4882_v51 = vpop.permute.xlu0 %4881 }
 0xca9   :  { %v4883_v29 = vunpack.i.l.bf16 %v4882_v51  ;;  %v4884_v48 = vunpack.i.h.bf16 %v4882_v51 }
 0xcab   :  { %3248 = vmatpush.msrb.mxu2 %v4883_v29 }
 0xcad   :  { %3249 = vmatpush.msrb.mxu2 %v4884_v48 }
 0xcb0   :  { %v3307_v37 = vpop.permute.xlu0 %3306 }
 0xcb8   :  { %v3309_v10 = vpop.permute.xlu0 %3308 }
 0xcd0   :  { %v3073_v39 = vpop.f32.mrf.mxu3 }
 0xcd1   :  { %v3120_v35 = vsel %vm73_vm0, %v3073_v39, -inf }
 0xcd8   :  { %v3076_v59 = vpop.f32.mrf.mxu3 }
 0xcd9   :  { %v3123_v28 = vsel %vm73_vm0, %v3076_v59, -inf }
 0xcf5   :  { %v3022_v42 = vpop.f32.mrf.mxu0 }
 0xcf6   :  { %v6619_v60 = vadd.f32 %v4967_v27, %v3022_v42 }
 0xcfd   :  { %v3025_v50 = vpop.f32.mrf.mxu0 }
 0xcfe   :  { %v6621_v5 = vadd.f32 %v4967_v27, %v3025_v50 }
 0xd00   :  { %v6682_v38 = vpack.i.bf16 %v6619_v60, %v6621_v5 }
 0xd05   :  { %v3028_v49 = vpop.f32.mrf.mxu0 }
 0xd06   :  { %v6607_v57 = vadd.f32 %v4967_v27, %v3028_v49 }
 0xd08   :  { %3353 = vrot.lane.b32.xlu0 %v6607_v57, %s5285_s1 }
 0xd0d   :  { %v3031_v12 = vpop.f32.mrf.mxu0 }
 0xd0e   :  { %v6611_v13 = vadd.f32 %v4967_v27, %v3031_v12 }
 0xd10   :  { %3355 = vrot.lane.b32.xlu2 %v6611_v13, %s5285_s1  ;;  %4694 = vmatpush.xpose.msk.msra.mxu1 %vm362_vm11, %v6611_v13  ;;  %v6690_v44 = vpack.i.bf16 %v6607_v57, %v6611_v13 }
 0xd14   :  { %4695 = vmatpush.xpose.msk.msra.mxu1 %vm362_vm11, %v6607_v57 }
 0xd18   :  { %3349 = vrot.lane.b32.xlu2 %v6619_v60, %s5285_s1  ;;  %4696 = vmatpush.xpose.msk.msra.mxu1 %vm362_vm11, %v6621_v5 }
 0xd1c   :  { %4697 = vmatpush.xpose.msk.msra.mxu1 %vm362_vm11, %v6619_v60 }
 0xd1f   :  { %4698 = vmatmul.msk.f32.vlgmr.msra.gmra.mxu1 %vm362_vm11, %v6538_v18 }
 0xd20   :  { %4704 = vmatpush.xpose.msk.msrb.mxu1 %vm362_vm11, %v3309_v10 }
 0xd24   :  { %4705 = vmatpush.xpose.msk.msrb.mxu1 %vm362_vm11, %v3307_v37 }
 0xd27   :  { %4699 = vmatmul.msk.f32.gmra.mxu1 %vm362_vm11, %v6542_v52 }
 0xd28   :  { %4706 = vmatpush.xpose.msk.msrb.mxu1 %vm362_vm11, %v3305_v8 }
 0xd2c   :  { %4707 = vmatpush.xpose.msk.msrb.mxu1 %vm362_vm11, %v3303_v33 }
 0xd2f   :  { %4708 = vmatmul.msk.f32.vlgmr.msrb.gmra.mxu1 %vm362_vm11, %v3299_v4 }
 0xd32   :  { %3121 = vmax.xlane.f32.xlu0 %v3120_v35 }
 0xd37   :  { %4709 = vmatmul.msk.f32.gmra.mxu1 %vm362_vm11, %v3301_v24 }
 0xd41   :  { %3124 = vmax.xlane.f32.xlu2 %v3123_v28 }
 0xd46   :  { %3351 = vrot.lane.b32.xlu0 %v6621_v5, %s5285_s1 }
 0xd59   :  { %3662 = vrot.lane.b32.xlu2 %v6567_v0, %s5288_s23 }
 0xd61   :  { %3656 = vrot.lane.b32.xlu2 %v6551_v26, %s5288_s23 }
 0xd6a   :  { %v3356_v61 = vpop.permute.xlu2 %3355 }
 0xd6b   :  { %4710 = vmatpush.xpose.msk.msra.mxu2 %vm362_vm11, %v3356_v61 }
 0xd72   :  { %v3350_v3 = vpop.permute.xlu2 %3349 }
 0xd7a   :  { %v3354_v40 = vpop.permute.xlu0 %3353 }
 0xd7b   :  { %4711 = vmatpush.xpose.msk.msra.mxu2 %vm362_vm11, %v3354_v40 }
 0xd9c   :  { %v6649_v46 = vpop.f32.mrf.mxu1 }
 0xd9d   :  { %v3126_v25 = vsel %vm73_vm0, %v6649_v46, -inf }
 0xd9e   :  { %3127 = vmax.xlane.f32.xlu2 %v3126_v25 }
 0xda4   :  { %v6653_v45 = vpop.f32.mrf.mxu1 }
 0xda5   :  { %v3122_v53 = vpop.xlane.xlu0 %3121  ;;  %v3129_v20 = vsel %vm73_vm0, %v6653_v45, -inf }
 0xda6   :  { %v3132_v14 = vsub.f32 %v3073_v39, %v3122_v53 }
 0xda8   :  { %v3136_v7 = vmul.f32 1.442695, %v3132_v14 }
 0xdaa   :  { %5149 = vpow2.f32 %v3136_v7 }
 0xdac   :  { %v6655_v2 = vpop.f32.mrf.mxu1 }
 0xdad   :  { %v3392_v19 = vsel %vm73_vm0, %v6655_v2, -inf }
 0xdae   :  { %3393 = vmax.xlane.f32.xlu2 %v3392_v19 }
 0xdb0   :  { %v5150_v63 = vpop.eup %5149 }
 0xdb1   :  { %v3144_v58 = vsel %vm73_vm0, %v5150_v63, 0.0 }
 0xdb2   :  { %3145 = vadd.xlane.f32.xlu0 %v3144_v58 }
 0xdb4   :  { %v3125_v36 = vpop.xlane.xlu2 %3124  ;;  %v6660_v55 = vpop.f32.mrf.mxu1 }
 0xdb5   :  { %v3133_v27 = vsub.f32 %v3076_v59, %v3125_v36  ;;  %v3395_v30 = vsel %vm73_vm0, %v6660_v55, -inf }
 0xdb6   :  { %3396 = vmax.xlane.f32.xlu2 %v3395_v30 }
 0xdb7   :  { %v3138_v21 = vmul.f32 1.442695, %v3133_v27 }
 0xdb8   :  { %v3352_v31 = vpop.permute.xlu0 %3351 }
 0xdb9   :  { %5151 = vpow2.f32 %v3138_v21  ;;  %4712 = vmatpush.xpose.msk.msra.mxu2 %vm362_vm11, %v3352_v31 }
 0xdbc   :  { %v3663_v22 = vpop.permute.xlu2 %3662 }
 0xdbd   :  { %4713 = vmatpush.xpose.msk.msra.mxu2 %vm362_vm11, %v3350_v3  ;;  %4728 = vmatpush.xpose.msk.msra.mxu0 %vm362_vm11, %v3663_v22 }
 0xdbf   :  { %v5152_v54 = vpop.eup %5151 }
 0xdc0   :  { %v3147_v11 = vsel %vm73_vm0, %v5152_v54, 0.0 }
 0xdc1   :  { %3148 = vadd.xlane.f32.xlu1 %v3147_v11 }
 0xdc4   :  { %v3657_v19 = vpop.permute.xlu2 %3656 }
 0xdc6   :  { %3345 = vrot.lane.b32.xlu0 %v6538_v18, %s5285_s1 }
 0xdce   :  { %3660 = vrot.lane.b32.xlu0 %v6565_v34, %s5288_s23 }
 0xdd6   :  { %3652 = vrot.lane.b32.xlu0 %v6525_v62, %s5288_s23 }
 0xdda   :  { %3347 = vrot.lane.b32.xlu1 %v6542_v52, %s5285_s1 }
 0xde2   :  { %3658 = vrot.lane.b32.xlu1 %v6555_v47, %s5288_s23 }
 0xdea   :  { %3654 = vrot.lane.b32.xlu1 %v6531_v43, %s5288_s23 }
 0xdf2   :  { %4896 = vrot.lane.b32.xlu1 %v6682_v38, %s5282_s20 }
 0xe00   :  { %3130 = vmax.xlane.f32.xlu0 %v3129_v20 }
 0xe14   :  { %4891 = vrot.lane.b32.xlu0 %v6690_v44, %s5282_s20 }
 0xe1c   :  { %4906 = vrot.lane.b32.xlu0 %v6561_v41, %s5284_s21 }
 0xe24   :  { %4916 = vrot.lane.b32.xlu0 %v6682_v38, %s5284_s21 }
 0xe25   :  { %v3146_v1 = vpop.xlane.xlu0 %3145 }
 0xe26   :  { %5153 = vrcp.f32 %v3146_v1  ;;  %v3167_v32 = vand.u32 2147483648, %v3146_v1  ;;  %v3165_v8 = vand.u32 2147483647, %v3146_v1  ;;  %vm3161_vm15 = vweird.f32 %v3146_v1 }
 0xe28   :  { %v3168_v48 = vor.u32 1.1754944e-38, %v3167_v32  ;;  %vm3166_vm2 = vcmp.eq.f32.partialorder %v3165_v8, 8.507059e+37 }
 0xe2c   :  { %3709 = vrot.lane.b32.xlu0 %v6611_v13, %s5288_s23  ;;  %v5154_v24 = vpop.eup %5153 }
 0xe2d   :  { %v3157_v33 = vmul.f32 %v5154_v24, %v3146_v1  ;;  %vm3162_vm14 = vweird.f32 %v5154_v24  ;;  %v3128_v1 = vpop.xlane.xlu2 %3127 }
 0xe2e   :  { %vm3163_vm1 = vmor %vm3161_vm15, %vm3162_vm14 }
 0xe2f   :  { %v3158_v23 = vsub.f32 1.0, %v3157_v33 }
 0xe31   :  { %v3159_v9 = vmul.f32 %v5154_v24, %v3158_v23 }
 0xe33   :  { %v3160_v51 = vadd.f32 %v5154_v24, %v3159_v9 }
 0xe34   :  { %v3149_v29 = vpop.xlane.xlu1 %3148  ;;  %3707 = vrot.lane.b32.xlu0 %v6607_v57, %s5288_s23 }
 0xe35   :  { %5155 = vrcp.f32 %v3149_v29  ;;  %v3164_v42 = vsel %vm3163_vm1, %v5154_v24, %v3160_v51  ;;  %v3182_v39 = vand.u32 2147483648, %v3149_v29  ;;  %v3180_v59 = vand.u32 2147483647, %v3149_v29 }
 0xe36   :  { %v3169_v50 = vsel %vm3166_vm2, %v3168_v48, %v3164_v42  ;;  %vm3176_vm4 = vweird.f32 %v3149_v29  ;;  %v3134_v24 = vsub.f32 %v6649_v46, %v3128_v1 }
 0xe37   :  { %v3170_v49 = vmul.f32 %v5150_v63, %v3169_v50  ;;  %v3183_v40 = vor.u32 1.1754944e-38, %v3182_v39  ;;  %vm3181_vm6 = vcmp.eq.f32.partialorder %v3180_v59, 8.507059e+37  ;;  %v3394_v50 = vpop.xlane.xlu2 %3393 }
 0xe38   :  { %v3346_v12 = vpop.permute.xlu0 %3345  ;;  %v3140_v32 = vmul.f32 1.442695, %v3134_v24 }
 0xe39   :  { %4700 = vmatmul.msk.f32.vlgmr.msrb.gmra.mxu2 %vm73_vm0, %v3170_v49 }
 0xe3a   :  { %5157 = vpow2.f32 %v3140_v32 }
 0xe3b   :  { %v5156_v37 = vpop.eup %5155 }
 0xe3c   :  { %v3172_v10 = vmul.f32 %v5156_v37, %v3149_v29  ;;  %3705 = vrot.lane.b32.xlu0 %v6621_v5, %s5288_s23  ;;  %vm3177_vm3 = vweird.f32 %v5156_v37 }
 0xe3d   :  { %vm3178_vm5 = vmor %vm3176_vm4, %vm3177_vm3 }
 0xe3e   :  { %v3173_v4 = vsub.f32 1.0, %v3172_v10 }
 0xe3f   :  { %v3397_v10 = vpop.xlane.xlu2 %3396 }
 0xe40   :  { %v3174_v35 = vmul.f32 %v5156_v37, %v3173_v4  ;;  %v3661_v28 = vpop.permute.xlu0 %3660  ;;  %v6723_v51 = vpop.eup %5157 }
 0xe41   :  { %4729 = vmatpush.xpose.msk.msra.mxu0 %vm362_vm11, %v3661_v28  ;;  %v3150_v48 = vsel %vm73_vm0, %v6723_v51, 0.0 }
 0xe42   :  { %v3175_v61 = vadd.f32 %v5156_v37, %v3174_v35 }
 0xe44   :  { %v3179_v25 = vsel %vm3178_vm5, %v5156_v37, %v3175_v61 }
 0xe45   :  { %v3184_v53 = vsel %vm3181_vm6, %v3183_v40, %v3179_v25 }
 0xe46   :  { %v3185_v14 = vmul.f32 %v5152_v54, %v3184_v53 }
 0xe48   :  { %4701 = vmatmul.msk.f32.gmra.mxu2 %vm73_vm0, %v3185_v14  ;;  %v3653_v63 = vpop.permute.xlu0 %3652 }
 0xe4c   :  { %v3348_v7 = vpop.permute.xlu1 %3347 }
 0xe50   :  { %4714 = vmatmul.msk.f32.vlgmr.msra.gmra.mxu2 %vm362_vm11, %v3346_v12  ;;  %v3404_v12 = vsub.f32 %v6655_v2, %v3394_v50 }
 0xe52   :  { %v3408_v37 = vmul.f32 1.442695, %v3404_v12 }
 0xe54   :  { %v3659_v3 = vpop.permute.xlu1 %3658 }
 0xe55   :  { %4730 = vmatpush.xpose.msk.msra.mxu0 %vm362_vm11, %v3659_v3 }
 0xe58   :  { %4715 = vmatmul.msk.f32.gmra.mxu2 %vm362_vm11, %v3348_v7 }
 0xe59   :  { %4731 = vmatpush.xpose.msk.msra.mxu0 %vm362_vm11, %v3657_v19 }
 0xe5c   :  { %4732 = vmatmul.msk.f32.vlgmr.msra.gmra.mxu0 %vm362_vm11, %v3653_v63  ;;  %v3655_v58 = vpop.permute.xlu1 %3654 }
 0xe64   :  { %4733 = vmatmul.msk.f32.gmra.mxu0 %vm362_vm11, %v3655_v58  ;;  %v4897_v21 = vpop.permute.xlu1 %4896 }
 0xe65   :  { %v4898_v22 = vunpack.i.l.bf16 %v4897_v21  ;;  %v4899_v54 = vunpack.i.h.bf16 %v4897_v21 }
 0xe73   :  { %v3131_v36 = vpop.xlane.xlu0 %3130 }
 0xe74   :  { %v3135_v42 = vsub.f32 %v6653_v45, %v3131_v36 }
 0xe76   :  { %v3142_v49 = vmul.f32 1.442695, %v3135_v42 }
 0xe78   :  { %5159 = vpow2.f32 %v3142_v49 }
 0xe79   :  { %5161 = vpow2.f32 %v3408_v37 }
 0xe7e   :  { %v6736_v4 = vpop.eup %5159 }
 0xe7f   :  { %v3153_v39 = vsel %vm73_vm0, %v6736_v4, 0.0  ;;  %v6741_v59 = vpop.eup %5161 }
 0xe80   :  { %v3416_v45 = vsel %vm73_vm0, %v6741_v59, 0.0 }
 0xe86   :  { %v4892_v27 = vpop.permute.xlu0 %4891 }
 0xe87   :  { %v4893_v30 = vunpack.i.l.bf16 %v4892_v27  ;;  %v4894_v31 = vunpack.i.h.bf16 %v4892_v27 }
 0xe89   :  { %3287 = vmatpush.msrb.mxu3 %v4893_v30 }
 0xe8b   :  { %3288 = vmatpush.msrb.mxu3 %v4894_v31 }
 0xe8d   :  { %3289 = vmatpush.msrb.mxu3 %v4898_v22 }
 0xe8e   :  { %v4907_v14 = vpop.permute.xlu0 %4906 }
 0xe8f   :  { %3290 = vmatpush.msrb.mxu3 %v4899_v54 }
 0xe96   :  { %v4917_v21 = vpop.permute.xlu0 %4916 }
 0xe9e   :  { %v3710_v50 = vpop.permute.xlu0 %3709 }
 0xebc   :  { %v6713_v11 = vpop.f32.mrf.mxu2 }
 0xecb   :  { %v6715_v20 = vpop.f32.mrf.mxu2 }
 0xed3   :  { %v6718_v33 = vpop.f32.mrf.mxu2 }
 0xed4   :  { %v3398_v23 = vsel %vm73_vm0, %v6718_v33, -inf }
 0xed5   :  { %3399 = vmax.xlane.f32.xlu0 %v3398_v23  ;;  %v4908_v23 = vunpack.i.l.bf16 %v4907_v14 }
 0xed9   :  { %v3693_v9 = vpop.f32.mrf.mxu0 }
 0xeda   :  { %v3746_v8 = vsel %vm73_vm0, %v3693_v9, -inf }
 0xedb   :  { %3747 = vmax.xlane.f32.xlu1 %v3746_v8  ;;  %v4909_v8 = vunpack.i.h.bf16 %v4907_v14 }
 0xee1   :  { %v3696_v29 = vpop.f32.mrf.mxu0 }
 0xee2   :  { %v3749_v46 = vsel %vm73_vm0, %v3696_v29, -inf }
 0xee3   :  { %3151 = vadd.xlane.f32.xlu1 %v3150_v48  ;;  %3750 = vmax.xlane.f32.xlu2 %v3749_v46 }
 0xee9   :  { %3979 = vrot.lane.b32.xlu0 %v6567_v0, %s5291_s4  ;;  %v3405_v0 = vsub.f32 %v6660_v55, %v3397_v10  ;;  %v4918_v10 = vunpack.i.l.bf16 %v4917_v21 }
 0xeeb   :  { %v3410_v35 = vmul.f32 1.442695, %v3405_v0  ;;  %v3708_v0 = vpop.permute.xlu0 %3707 }
 0xeed   :  { %5163 = vpow2.f32 %v3410_v35 }
 0xef3   :  { %v6745_v2 = vpop.eup %5163 }
 0xef4   :  { %v3419_v28 = vsel %vm73_vm0, %v6745_v2, 0.0 }
 0xefb   :  { %4901 = vrot.lane.b32.xlu2 %v6575_v16, %s5284_s21 }
 0xefc   :  { %4911 = vrot.lane.b32.xlu1 %v6690_v44, %s5284_s21 }
 0xf24   :  { %3154 = vadd.xlane.f32.xlu2 %v3153_v39  ;;  %v6778_v39 = vpop.f32.mrf.mxu2 }
 0xf2c   :  { %3417 = vadd.xlane.f32.xlu2 %v3416_v45 }
 0xf34   :  { %3420 = vadd.xlane.f32.xlu2 %v3419_v28  ;;  %v3401_v28 = vsel %vm73_vm0, %v6778_v39, -inf }
 0xf4c   :  { %3703 = vrot.lane.b32.xlu2 %v6619_v60, %s5288_s23 }
 0xf4e   :  { %v3748_v55 = vpop.xlane.xlu1 %3747 }
 0xf4f   :  { %v3758_v61 = vsub.f32 %v3693_v9, %v3748_v55 }
 0xf51   :  { %v3762_v40 = vmul.f32 1.442695, %v3758_v61  ;;  %v3034_v61 = vld [vmem:[%s7011_s16] sm:$0xff] }
 0xf53   :  { %5165 = vpow2.f32 %v3762_v40 }
 0xf54   :  { %3977 = vrot.lane.b32.xlu2 %v6565_v34, %s5291_s4 }
 0xf56   :  { %v3152_v25 = vpop.xlane.xlu1 %3151  ;;  %v3751_v53 = vpop.xlane.xlu2 %3750 }
 0xf57   :  { %5167 = vrcp.f32 %v3152_v25  ;;  %v3759_v7 = vsub.f32 %v3696_v29, %v3751_v53  ;;  %v3197_v31 = vand.u32 2147483648, %v3152_v25  ;;  %v3195_v24 = vand.u32 2147483647, %v3152_v25 }
 0xf58   :  { %vm3191_vm8 = vweird.f32 %v3152_v25 }
 0xf59   :  { %v6753_v3 = vpop.eup %5165  ;;  %v3764_v19 = vmul.f32 1.442695, %v3759_v7  ;;  %v3198_v29 = vor.u32 1.1754944e-38, %v3197_v31  ;;  %vm3196_vm9 = vcmp.eq.f32.partialorder %v3195_v24, 8.507059e+37 }
 0xf5a   :  { %v3770_v63 = vsel %vm73_vm0, %v6753_v3, 0.0 }
 0xf5b   :  { %3771 = vadd.xlane.f32.xlu1 %v3770_v63  ;;  %5169 = vpow2.f32 %v3764_v19 }
 0xf5c   :  { %4921 = vrot.lane.b32.xlu2 %v6575_v16, %s5287_s2 }
 0xf5d   :  { %v5168_v58 = vpop.eup %5167 }
 0xf5e   :  { %v3187_v36 = vmul.f32 %v5168_v58, %v3152_v25  ;;  %v4902_v27 = vpop.permute.xlu2 %4901  ;;  %vm3192_vm7 = vweird.f32 %v5168_v58 }
 0xf5f   :  { %v4903_v34 = vunpack.i.l.bf16 %v4902_v27  ;;  %v4904_v22 = vunpack.i.h.bf16 %v4902_v27  ;;  %vm3193_vm12 = vmor %vm3191_vm8, %vm3192_vm7 }
 0xf60   :  { %v3188_v30 = vsub.f32 1.0, %v3187_v36 }
 0xf61   :  { %3518 = vmatpush.msra.mxu3 %v4903_v34  ;;  %v6759_v54 = vpop.eup %5169 }
 0xf62   :  { %v3189_v1 = vmul.f32 %v5168_v58, %v3188_v30  ;;  %v3773_v32 = vsel %vm73_vm0, %v6759_v54, 0.0 }
 0xf63   :  { %3519 = vmatpush.msra.mxu3 %v4904_v22  ;;  %3774 = vadd.xlane.f32.xlu0 %v3773_v32 }
 0xf64   :  { %v3190_v9 = vadd.f32 %v5168_v58, %v3189_v1  ;;  %3975 = vrot.lane.b32.xlu2 %v6555_v47, %s5291_s4  ;;  %v4919_v47 = vunpack.i.h.bf16 %v4917_v21 }
 0xf65   :  { %3520 = vmatpush.msra.mxu3 %v4908_v23 }
 0xf66   :  { %v3194_v48 = vsel %vm3193_vm12, %v5168_v58, %v3190_v9 }
 0xf67   :  { %v3199_v46 = vsel %vm3196_vm9, %v3198_v29, %v3194_v48  ;;  %3521 = vmatpush.msra.mxu3 %v4909_v8 }
 0xf68   :  { %v3200_v42 = vmul.f32 %v6723_v51, %v3199_v46  ;;  %v3706_v51 = vpop.permute.xlu0 %3705 }
 0xf6a   :  { %4702 = vmatmul.msk.f32.vlgmr.msrb.gmra.mxu3 %vm73_vm0, %v3200_v42 }
 0xf6b   :  { %3638 = vmatpush.msrb.mxu3 %v3034_v61 }
 0xf6e   :  { %v4912_v49 = vpop.permute.xlu1 %4911 }
 0xf6f   :  { %v4913_v12 = vunpack.i.l.bf16 %v4912_v49  ;;  %v4914_v37 = vunpack.i.h.bf16 %v4912_v49 }
 0xf70   :  { %v3400_v35 = vpop.xlane.xlu0 %3399 }
 0xf71   :  { %3559 = vmatpush.msra.mxu1 %v4913_v12  ;;  %v3406_v45 = vsub.f32 %v6718_v33, %v3400_v35 }
 0xf73   :  { %3560 = vmatpush.msra.mxu1 %v4914_v37  ;;  %v3412_v55 = vmul.f32 1.442695, %v3406_v45 }
 0xf74   :  { %3699 = vrot.lane.b32.xlu1 %v6538_v18, %s5288_s23 }
 0xf75   :  { %3561 = vmatpush.msra.mxu1 %v4918_v10  ;;  %5171 = vpow2.f32 %v3412_v55 }
 0xf77   :  { %3562 = vmatpush.msra.mxu1 %v4919_v47  ;;  %4926 = vrot.lane.b32.xlu0 %v6561_v41, %s5287_s2 }
 0xf78   :  { %v3980_v10 = vpop.permute.xlu0 %3979 }
 0xf79   :  { %4734 = vmatpush.xpose.msk.msrb.mxu1 %vm362_vm11, %v3710_v50 }
 0xf7b   :  { %v6786_v40 = vpop.eup %5171 }
 0xf7d   :  { %4735 = vmatpush.xpose.msk.msrb.mxu1 %vm362_vm11, %v3708_v0 }
 0xf7f   :  { %3971 = vrot.lane.b32.xlu0 %v6531_v43, %s5291_s4 }
 0xf81   :  { %4736 = vmatpush.xpose.msk.msrb.mxu1 %vm362_vm11, %v3706_v51 }
 0xf87   :  { %4016 = vrot.lane.b32.xlu0 %v6538_v18, %s5291_s4  ;;  %v3422_v18 = vsel %vm73_vm0, %v6786_v40, 0.0 }
 0xf8d   :  { %3402 = vmax.xlane.f32.xlu2 %v3401_v28 }
 0xf97   :  { %v3155_v43 = vpop.xlane.xlu2 %3154 }
 0xf98   :  { %5173 = vrcp.f32 %v3155_v43  ;;  %v3212_v19 = vand.u32 2147483648, %v3155_v43  ;;  %v3210_v63 = vand.u32 2147483647, %v3155_v43  ;;  %vm3206_vm13 = vweird.f32 %v3155_v43 }
 0xf9a   :  { %v3213_v27 = vor.u32 1.1754944e-38, %v3212_v19  ;;  %vm3211_vm15 = vcmp.eq.f32.partialorder %v3210_v63, 8.507059e+37 }
 0xf9e   :  { %v5174_v25 = vpop.eup %5173  ;;  %3423 = vadd.xlane.f32.xlu1 %v3422_v18 }
 0xf9f   :  { %v3202_v33 = vmul.f32 %v5174_v25, %v3155_v43  ;;  %v3418_v53 = vpop.xlane.xlu2 %3417  ;;  %vm3207_vm10 = vweird.f32 %v5174_v25 }
 0xfa0   :  { %5175 = vrcp.f32 %v3418_v53  ;;  %vm3208_vm14 = vmor %vm3206_vm13, %vm3207_vm10  ;;  %v3439_v1 = vand.u32 2147483648, %v3418_v53  ;;  %v3437_v32 = vand.u32 2147483647, %v3418_v53  ;;  %vm3433_vm2 = vweird.f32 %v3418_v53 }
 0xfa1   :  { %v3203_v14 = vsub.f32 1.0, %v3202_v33 }
 0xfa2   :  { %v3440_v8 = vor.u32 1.1754944e-38, %v3439_v1  ;;  %vm3438_vm4 = vcmp.eq.f32.partialorder %v3437_v32, 8.507059e+37 }
 0xfa3   :  { %v3204_v7 = vmul.f32 %v5174_v25, %v3203_v14 }
 0xfa5   :  { %v3205_v58 = vadd.f32 %v5174_v25, %v3204_v7  ;;  %3973 = vrot.lane.b32.xlu2 %v6551_v26, %s5291_s4 }
 0xfa6   :  { %v5176_v36 = vpop.eup %5175 }
 0xfa7   :  { %v3429_v34 = vmul.f32 %v5176_v36, %v3418_v53  ;;  %v3421_v30 = vpop.xlane.xlu2 %3420  ;;  %v3209_v21 = vsel %vm3208_vm14, %v5174_v25, %v3205_v58  ;;  %vm3434_vm1 = vweird.f32 %v5176_v36 }
 0xfa8   :  { %5177 = vrcp.f32 %v3421_v30  ;;  %v3214_v22 = vsel %vm3211_vm15, %v3213_v27, %v3209_v21  ;;  %vm3435_vm3 = vmor %vm3433_vm2, %vm3434_vm1  ;;  %v3454_v49 = vand.u32 2147483648, %v3421_v30  ;;  %v3452_v37 = vand.u32 2147483647, %v3421_v30 }
 0xfa9   :  { %v3430_v31 = vsub.f32 1.0, %v3429_v34  ;;  %v3215_v24 = vmul.f32 %v6736_v4, %v3214_v22  ;;  %vm3448_vm6 = vweird.f32 %v3421_v30 }
 0xfaa   :  { %v3455_v0 = vor.u32 1.1754944e-38, %v3454_v49  ;;  %vm3453_vm8 = vcmp.eq.f32.partialorder %v3452_v37, 8.507059e+37 }
 0xfab   :  { %v3431_v23 = vmul.f32 %v5176_v36, %v3430_v31  ;;  %4703 = vmatmul.msk.f32.gmra.mxu3 %vm73_vm0, %v3215_v24 }
 0xfad   :  { %v3432_v9 = vadd.f32 %v5176_v36, %v3431_v23 }
 0xfae   :  { %v5178_v26 = vpop.eup %5177 }
 0xfaf   :  { %v3436_v29 = vsel %vm3435_vm3, %v5176_v36, %v3432_v9  ;;  %v3444_v48 = vmul.f32 %v5178_v26, %v3421_v30  ;;  %v3704_v46 = vpop.permute.xlu2 %3703  ;;  %vm3449_vm5 = vweird.f32 %v5178_v26 }
 0xfb0   :  { %v3441_v42 = vsel %vm3438_vm4, %v3440_v8, %v3436_v29  ;;  %4737 = vmatpush.xpose.msk.msrb.mxu1 %vm362_vm11, %v3704_v46  ;;  %vm3450_vm7 = vmor %vm3448_vm6, %vm3449_vm5 }
 0xfb1   :  { %v3442_v50 = vmul.f32 %v6741_v59, %v3441_v42  ;;  %v3445_v4 = vsub.f32 1.0, %v3444_v48 }
 0xfb3   :  { %v3446_v12 = vmul.f32 %v5178_v26, %v3445_v4  ;;  %4716 = vmatmul.msk.f32.vlgmr.msra.gmra.mxu3 %vm73_vm0, %v3442_v50 }
 0xfb4   :  { %4748 = vmatpush.xpose.msk.msra.mxu3 %vm362_vm11, %v3980_v10 }
 0xfb5   :  { %v3447_v47 = vadd.f32 %v5178_v26, %v3446_v12 }
 0xfb7   :  { %v3978_v51 = vpop.permute.xlu2 %3977  ;;  %3701 = vrot.lane.b32.xlu1 %v6542_v52, %s5288_s23  ;;  %v3451_v59 = vsel %vm3450_vm7, %v5178_v26, %v3447_v47  ;;  %s4499_s23 = sshll.u32 %s7014_s19, 4  ;;  %s5296_s19 = smov [#allocation2]   ;;  %s4500_s23 = int_to_ptr.hbm [resolvable:$true] %s4499_s23 }
 0xfb8   :  { %v3456_v35 = vsel %vm3453_vm8, %v3455_v0, %v3451_v59  ;;  %4749 = vmatpush.xpose.msk.msra.mxu3 %vm362_vm11, %v3978_v51  ;;  %s4484_s22 = sshll.u32 %s5296_s19, 4  ;;  %s4485_s22 = int_to_ptr.vmem [resolvable:$true] %s4484_s22 }
 0xfb9   :  { %v3457_v45 = vmul.f32 %v6745_v2, %v3456_v35 }
 0xfbb   :  { %4717 = vmatmul.msk.f32.gmra.mxu3 %vm73_vm0, %v3457_v45 }
 0xfbf   :  { %v4922_v28 = vpop.permute.xlu2 %4921  ;;  %4026 = vrot.lane.b32.xlu1 %v6611_v13, %s5291_s4 }
 0xfc0   :  { %v4923_v55 = vunpack.i.l.bf16 %v4922_v28  ;;  %v4924_v61 = vunpack.i.h.bf16 %v4922_v28 }
 0xfc2   :  { %3872 = vmatpush.msrb.mxu0 %v4923_v55 }
 0xfc3   :  { %4724 = vmatmul.msk.f32.vlgmr.msrb.gmra.mxu3 %vm362_vm11, %v6713_v11 }
 0xfc4   :  { %3873 = vmatpush.msrb.mxu0 %v4924_v61 }
 0xfc7   :  { %v3976_v43 = vpop.permute.xlu2 %3975  ;;  %4022 = vrot.lane.b32.xlu1 %v6621_v5, %s5291_s4 }
 0xfc8   :  { %4750 = vmatpush.xpose.msk.msra.mxu3 %vm362_vm11, %v3976_v43 }
 0xfcb   :  { %4725 = vmatmul.msk.f32.gmra.mxu3 %vm362_vm11, %v6715_v20 }
 0xfce   :  { %v3772_v2 = vpop.xlane.xlu1 %3771 }
 0xfcf   :  { %5179 = vrcp.f32 %v3772_v2  ;;  %4018 = vrot.lane.b32.xlu1 %v6542_v52, %s5291_s4  ;;  %v3793_v19 = vand.u32 2147483648, %v3772_v2  ;;  %vm3787_vm9 = vweird.f32 %v3772_v2  ;;  %v3791_v63 = vand.u32 2147483647, %v3772_v2 }
 0xfd1   :  { %v3794_v36 = vor.u32 1.1754944e-38, %v3793_v19  ;;  %vm3792_vm13 = vcmp.eq.f32.partialorder %v3791_v63, 8.507059e+37 }
 0xfd5   :  { %v5180_v13 = vpop.eup %5179 }
 0xfd6   :  { %v3775_v18 = vpop.xlane.xlu0 %3774  ;;  %v3783_v25 = vmul.f32 %v5180_v13, %v3772_v2  ;;  %vm3788_vm12 = vweird.f32 %v5180_v13 }
 0xfd7   :  { %5181 = vrcp.f32 %v3775_v18  ;;  %vm3789_vm10 = vmor %vm3787_vm9, %vm3788_vm12  ;;  %v3808_v21 = vand.u32 2147483648, %v3775_v18  ;;  %vm3802_vm15 = vweird.f32 %v3775_v18  ;;  %v3806_v24 = vand.u32 2147483647, %v3775_v18 }
 0xfd8   :  { %v3784_v11 = vsub.f32 1.0, %v3783_v25 }
 0xfd9   :  { %v3809_v32 = vor.u32 1.1754944e-38, %v3808_v21  ;;  %vm3807_vm2 = vcmp.eq.f32.partialorder %v3806_v24, 8.507059e+37  ;;  %v3036_v21 = vld [vmem:[%s7011_s16 + $0x10] sm:$0xff] }
 0xfda   :  { %v3785_v53 = vmul.f32 %v5180_v13, %v3784_v11 }
 0xfdc   :  { %v3786_v7 = vadd.f32 %v5180_v13, %v3785_v53 }
 0xfdd   :  { %v5182_v33 = vpop.eup %5181 }
 0xfde   :  { %v3798_v14 = vmul.f32 %v5182_v33, %v3775_v18  ;;  %v3790_v20 = vsel %vm3789_vm10, %v5180_v13, %v3786_v7  ;;  %vm3803_vm14 = vweird.f32 %v5182_v33 }
 0xfdf   :  { %v3795_v27 = vsel %vm3792_vm13, %v3794_v36, %v3790_v20  ;;  %vm3804_vm1 = vmor %vm3802_vm15, %vm3803_vm14 }
 0xfe0   :  { %v3799_v5 = vsub.f32 1.0, %v3798_v14  ;;  %v3796_v1 = vmul.f32 %v6753_v3, %v3795_v27 }
 0xfe2   :  { %v3800_v58 = vmul.f32 %v5182_v33, %v3799_v5 }
 0xfe4   :  { %v3801_v30 = vadd.f32 %v5182_v33, %v3800_v58 }
 0xfe6   :  { %v3805_v23 = vsel %vm3804_vm1, %v5182_v33, %v3801_v30  ;;  %v6820_v46 = vpop.permute.xlu1 %3699 }
 0xfe7   :  { %v3810_v9 = vsel %vm3807_vm2, %v3809_v32, %v3805_v23 }
 0xfe8   :  { %v3811_v26 = vmul.f32 %v6759_v54, %v3810_v9  ;;  %v3035_v54 = vld [vmem:[%s7011_s16 + $0x8] sm:$0xff] }
 0xfe9   :  { %v4927_v52 = vpop.permute.xlu0 %4926  ;;  %3597 = vmatpush.msrb.mxu2 %v3035_v54 }
 0xfea   :  { %v4928_v34 = vunpack.i.l.bf16 %v4927_v52  ;;  %v4929_v31 = vunpack.i.h.bf16 %v4927_v52 }
 0xfeb   :  { %3951 = vmatpush.msra.mxu2 %v3036_v21 }
 0xfec   :  { %3874 = vmatpush.msrb.mxu0 %v4928_v34 }
 0xfed   :  { %v3292_v22 = vpop.f32.mrf.mxu3 }
 0xfee   :  { %4726 = vmatmul.msk.f32.gmra.mxu3 %vm362_vm11, %v3292_v22  ;;  %3875 = vmatpush.msrb.mxu0 %v4929_v31 }
 0xfef   :  { %4740 = vmatmul.msk.f32.vlgmr.msrb.gmra.mxu0 %vm73_vm0, %v3796_v1 }
 0xff1   :  { %v3972_v14 = vpop.permute.xlu0 %3971 }
 0xff7   :  { %4741 = vmatmul.msk.f32.gmra.mxu0 %vm73_vm0, %v3811_v26 }
 0xff9   :  { %v4017_v36 = vpop.permute.xlu0 %4016 }
0x1000   :  { %v3403_v8 = vpop.xlane.xlu2 %3402 }
0x1001   :  { %v3407_v29 = vsub.f32 %v6778_v39, %v3403_v8 }
0x1003   :  { %v3414_v3 = vmul.f32 1.442695, %v3407_v29 }
0x1005   :  { %5183 = vpow2.f32 %v3414_v3 }
0x1008   :  { %v3974_v48 = vpop.permute.xlu2 %3973 }
0x1009   :  { %4751 = vmatpush.xpose.msk.msra.mxu3 %vm362_vm11, %v3974_v48 }
0x100b   :  { %v5184_v42 = vpop.eup %5183 }
0x100c   :  { %v3425_v50 = vsel %vm73_vm0, %v5184_v42, 0.0 }
0x100d   :  { %3426 = vadd.xlane.f32.xlu2 %v3425_v50 }
0x1011   :  { %v3424_v4 = vpop.xlane.xlu1 %3423 }
0x1012   :  { %5185 = vrcp.f32 %v3424_v4  ;;  %v3469_v37 = vand.u32 2147483648, %v3424_v4  ;;  %v3467_v47 = vand.u32 2147483647, %v3424_v4  ;;  %vm3463_vm4 = vweird.f32 %v3424_v4 }
0x1014   :  { %v3470_v51 = vor.u32 1.1754944e-38, %v3469_v37  ;;  %vm3468_vm6 = vcmp.eq.f32.partialorder %v3467_v47, 8.507059e+37 }
0x1018   :  { %v5186_v49 = vpop.eup %5185 }
0x1019   :  { %v3459_v39 = vmul.f32 %v5186_v49, %v3424_v4  ;;  %vm3464_vm3 = vweird.f32 %v5186_v49 }
0x101a   :  { %vm3465_vm5 = vmor %vm3463_vm4, %vm3464_vm3 }
0x101b   :  { %v3460_v12 = vsub.f32 1.0, %v3459_v39 }
0x101d   :  { %v3461_v10 = vmul.f32 %v5186_v49, %v3460_v12 }
0x101f   :  { %v3462_v0 = vadd.f32 %v5186_v49, %v3461_v10 }
0x1021   :  { %v3466_v59 = vsel %vm3465_vm5, %v5186_v49, %v3462_v0 }
0x1022   :  { %v3471_v35 = vsel %vm3468_vm6, %v3470_v51, %v3466_v59 }
0x1023   :  { %v3472_v45 = vmul.f32 %v6786_v40, %v3471_v35 }
0x1025   :  { %3969 = vrot.lane.b32.xlu2 %v6525_v62, %s5291_s4  ;;  %4718 = vmatmul.msk.f32.vlgmr.msra.gmra.mxu1 %vm73_vm0, %v3472_v45 }
0x1029   :  { %v3702_v28 = vpop.permute.xlu1 %3701 }
0x102d   :  { %4024 = vrot.lane.b32.xlu2 %v6607_v57, %s5291_s4 }
0x102e   :  { %v3295_v55 = vpop.f32.mrf.mxu3 }
0x102f   :  { %4727 = vmatmul.msk.f32.gmra.mxu3 %vm362_vm11, %v3295_v55 }
0x1031   :  { %v4027_v61 = vpop.permute.xlu1 %4026 }
0x1032   :  { %4754 = vmatpush.xpose.msk.msra.mxu0 %vm362_vm11, %v4027_v61 }
0x1035   :  { %4020 = vrot.lane.b32.xlu2 %v6619_v60, %s5291_s4  ;;  %s5294_s4 = smov 128  }
0x1036   :  { %v3523_v43 = vpop.f32.mrf.mxu3 }
0x1037   :  { %4720 = vmatmul.msk.f32.vlgmr.msrb.gmra.mxu2 %vm362_vm11, %v3523_v43 }
0x1039   :  { %v4023_v20 = vpop.permute.xlu1 %4022 }
0x103e   :  { %v3526_v40 = vpop.f32.mrf.mxu3 }
0x103f   :  { %4721 = vmatmul.msk.f32.gmra.mxu2 %vm362_vm11, %v3526_v40 }
0x1041   :  { %v4019_v27 = vpop.permute.xlu1 %4018 }
0x1046   :  { %v6851_v34 = vpop.f32.mrf.mxu3 }
0x104e   :  { %v6853_v30 = vpop.f32.mrf.mxu3 }
0x106c   :  { %v3877_v1 = vpop.f32.mrf.mxu0 }
0x1071   :  { %v6858_v31 = vpop.f32.mrf.mxu3 }
0x1074   :  { %v3880_v32 = vpop.f32.mrf.mxu0 }
0x1080   :  { %v3427_v62 = vpop.xlane.xlu2 %3426 }
0x1081   :  { %5187 = vrcp.f32 %v3427_v62  ;;  %v3484_v25 = vand.u32 2147483648, %v3427_v62  ;;  %v3482_v33 = vand.u32 2147483647, %v3427_v62  ;;  %vm3478_vm8 = vweird.f32 %v3427_v62 }
0x1083   :  { %v3485_v60 = vor.u32 1.1754944e-38, %v3484_v25  ;;  %vm3483_vm9 = vcmp.eq.f32.partialorder %v3482_v33, 8.507059e+37 }
0x1087   :  { %v5188_v2 = vpop.eup %5187 }
0x1088   :  { %v3474_v13 = vmul.f32 %v5188_v2, %v3427_v62  ;;  %v3970_v57 = vpop.permute.xlu2 %3969  ;;  %vm3479_vm7 = vweird.f32 %v5188_v2 }
0x1089   :  { %4752 = vmatmul.msk.f32.vlgmr.msra.gmra.mxu3 %vm362_vm11, %v3970_v57  ;;  %vm3480_vm12 = vmor %vm3478_vm8, %vm3479_vm7 }
0x108a   :  { %v3475_v18 = vsub.f32 1.0, %v3474_v13 }
0x108c   :  { %v3476_v11 = vmul.f32 %v5188_v2, %v3475_v18 }
0x108e   :  { %v3477_v53 = vadd.f32 %v5188_v2, %v3476_v11 }
0x1090   :  { %v4025_v7 = vpop.permute.xlu2 %4024  ;;  %v3481_v5 = vsel %vm3480_vm12, %v5188_v2, %v3477_v53 }
0x1091   :  { %4753 = vmatmul.msk.f32.gmra.mxu3 %vm362_vm11, %v3972_v14  ;;  %4755 = vmatpush.xpose.msk.msra.mxu0 %vm362_vm11, %v4025_v7  ;;  %v3486_v19 = vsel %vm3483_vm9, %v3485_v60, %v3481_v5 }
0x1092   :  { %v3487_v63 = vmul.f32 %v5184_v42, %v3486_v19 }
0x1094   :  { %4719 = vmatmul.msk.f32.gmra.mxu1 %vm73_vm0, %v3487_v63 }
0x1095   :  { %4756 = vmatpush.xpose.msk.msra.mxu0 %vm362_vm11, %v4023_v20 }
0x1098   :  { %v4021_v58 = vpop.permute.xlu2 %4020 }
0x1099   :  { %4757 = vmatpush.xpose.msk.msra.mxu0 %vm362_vm11, %v4021_v58 }
0x109c   :  { %4738 = vmatmul.msk.f32.vlgmr.msrb.gmra.mxu1 %vm362_vm11, %v6820_v46  ;;  %4758 = vmatmul.msk.f32.vlgmr.msra.gmra.mxu0 %vm362_vm11, %v4017_v36 }
0x10a2   :  { %v3564_v52 = vpop.f32.mrf.mxu1 }
0x10a3   :  { %4722 = vmatmul.msk.f32.gmra.mxu2 %vm362_vm11, %v3564_v52 }
0x10a4   :  { %4739 = vmatmul.msk.f32.gmra.mxu1 %vm362_vm11, %v3702_v28  ;;  %4759 = vmatmul.msk.f32.gmra.mxu0 %vm362_vm11, %v4019_v27 }
0x10b2   :  { %v6860_v22 = vpop.f32.mrf.mxu3 }
0x110c   :  { %v4010_v24 = vpop.f32.mrf.mxu3 }
0x110d   :  { %v4063_v23 = vsel %vm73_vm0, %v4010_v24, -inf }
0x110e   :  { %4064 = vmax.xlane.f32.xlu1 %v4063_v23 }
0x1111   :  { %v3567_v9 = vpop.f32.mrf.mxu1 }
0x1112   :  { %4723 = vmatmul.msk.f32.gmra.mxu2 %vm362_vm11, %v3567_v9 }
0x1114   :  { %v4013_v48 = vpop.f32.mrf.mxu3 }
0x1115   :  { %v4066_v54 = vsel %vm73_vm0, %v4013_v48, -inf }
0x1119   :  { %v3740_v26 = vpop.f32.mrf.mxu1  ;;  %v4057_v8 = vpop.f32.mrf.mxu0 }
0x111a   :  { %4744 = vmatmul.msk.f32.vlgmr.msra.gmra.mxu2 %vm362_vm11, %v3877_v1  ;;  %v4069_v29 = vsel %vm73_vm0, %v4057_v8, -inf  ;;  %v3752_v3 = vsel %vm73_vm0, %v3740_v26, -inf }
0x111b   :  { %4070 = vmax.xlane.f32.xlu0 %v4069_v29  ;;  %3753 = vmax.xlane.f32.xlu2 %v3752_v3 }
0x1121   :  { %v3743_v46 = vpop.f32.mrf.mxu1  ;;  %v4060_v42 = vpop.f32.mrf.mxu0 }
0x1122   :  { %4745 = vmatmul.msk.f32.gmra.mxu2 %vm362_vm11, %v3880_v32  ;;  %v3755_v50 = vsel %vm73_vm0, %v3743_v46, -inf  ;;  %v4072_v4 = vsel %vm73_vm0, %v4060_v42, -inf }
0x1123   :  { %3756 = vmax.xlane.f32.xlu0 %v3755_v50  ;;  %4073 = vmax.xlane.f32.xlu1 %v4072_v4 }
0x1124   :  { %4067 = vmax.xlane.f32.xlu2 %v4066_v54 }
0x1137   :  { %4936 = vrot.lane.b32.xlu0 %v6682_v38, %s5287_s2 }
0x113c   :  { %4931 = vrot.lane.b32.xlu1 %v6690_v44, %s5287_s2  ;;  %s5295_s2 = smov 8  }
0x113f   :  { %4946 = vrot.lane.b32.xlu0 %v6561_v41, %s5290_s25 }
0x1144   :  { %4941 = vrot.lane.b32.xlu1 %v6575_v16, %s5290_s25 }
0x114c   :  { %4951 = vrot.lane.b32.xlu1 %v6690_v44, %s5290_s25 }
0x1181   :  { %v4065_v12 = vpop.xlane.xlu1 %4064 }
0x1182   :  { %v4075_v47 = vsub.f32 %v4010_v24, %v4065_v12 }
0x1184   :  { %v4079_v0 = vmul.f32 1.442695, %v4075_v47 }
0x118e   :  { %v4071_v49 = vpop.xlane.xlu0 %4070  ;;  %v3754_v39 = vpop.xlane.xlu2 %3753 }
0x118f   :  { %v3760_v37 = vsub.f32 %v3740_v26, %v3754_v39  ;;  %v4077_v43 = vsub.f32 %v4057_v8, %v4071_v49 }
0x1191   :  { %v3766_v10 = vmul.f32 1.442695, %v3760_v37  ;;  %v4083_v2 = vmul.f32 1.442695, %v4077_v43 }
0x1193   :  { %5189 = vpow2.f32 %v3766_v10 }
0x1194   :  { %5191 = vpow2.f32 %v4079_v0 }
0x1196   :  { %v3757_v51 = vpop.xlane.xlu0 %3756  ;;  %v4074_v13 = vpop.xlane.xlu1 %4073 }
0x1197   :  { %v3761_v59 = vsub.f32 %v3743_v46, %v3757_v51  ;;  %v4068_v35 = vpop.xlane.xlu2 %4067  ;;  %v4078_v18 = vsub.f32 %v4060_v42, %v4074_v13 }
0x1198   :  { %v4076_v41 = vsub.f32 %v4013_v48, %v4068_v35 }
0x1199   :  { %v3768_v45 = vmul.f32 1.442695, %v3761_v59  ;;  %v6881_v28 = vpop.eup %5189  ;;  %v4085_v11 = vmul.f32 1.442695, %v4078_v18 }
0x119a   :  { %v3776_v16 = vsel %vm73_vm0, %v6881_v28, 0.0  ;;  %v4081_v44 = vmul.f32 1.442695, %v4076_v41  ;;  %v6885_v55 = vpop.eup %5191 }
0x119b   :  { %5193 = vpow2.f32 %v3768_v45  ;;  %3777 = vadd.xlane.f32.xlu2 %v3776_v16  ;;  %v4087_v62 = vsel %vm73_vm0, %v6885_v55, 0.0 }
0x119c   :  { %5195 = vpow2.f32 %v4081_v44 }
0x119d   :  { %5197 = vpow2.f32 %v4083_v2 }
0x119e   :  { %5199 = vpow2.f32 %v4085_v11 }
0x11a1   :  { %v6887_v61 = vpop.eup %5193 }
0x11a2   :  { %v3779_v40 = vsel %vm73_vm0, %v6887_v61, 0.0  ;;  %v6893_v57 = vpop.eup %5195 }
0x11a3   :  { %3780 = vadd.xlane.f32.xlu0 %v3779_v40  ;;  %4088 = vadd.xlane.f32.xlu2 %v4087_v62  ;;  %v4090_v25 = vsel %vm73_vm0, %v6893_v57, 0.0  ;;  %v6897_v14 = vpop.eup %5197 }
0x11a4   :  { %v4093_v19 = vsel %vm73_vm0, %v6897_v14, 0.0  ;;  %v6903_v36 = vpop.eup %5199 }
0x11a5   :  { %v4096_v1 = vsel %vm73_vm0, %v6903_v36, 0.0 }
0x11a9   :  { %v4937_v33 = vpop.permute.xlu0 %4936 }
0x11aa   :  { %v4938_v5 = vunpack.i.l.bf16 %v4937_v33  ;;  %v4939_v63 = vunpack.i.h.bf16 %v4937_v33 }
0x11ab   :  { %4091 = vadd.xlane.f32.xlu2 %v4090_v25 }
0x11ae   :  { %v4932_v53 = vpop.permute.xlu1 %4931 }
0x11af   :  { %v4933_v60 = vunpack.i.l.bf16 %v4932_v53  ;;  %v4934_v7 = vunpack.i.h.bf16 %v4932_v53 }
0x11b1   :  { %3913 = vmatpush.msra.mxu1 %v4933_v60  ;;  %v4947_v52 = vpop.permute.xlu0 %4946 }
0x11b2   :  { %v4948_v21 = vunpack.i.l.bf16 %v4947_v52  ;;  %v4949_v24 = vunpack.i.h.bf16 %v4947_v52 }
0x11b3   :  { %3914 = vmatpush.msra.mxu1 %v4934_v7  ;;  %4094 = vadd.xlane.f32.xlu2 %v4093_v19 }
0x11b5   :  { %3915 = vmatpush.msra.mxu1 %v4938_v5 }
0x11b6   :  { %v4942_v20 = vpop.permute.xlu1 %4941 }
0x11b7   :  { %v4943_v58 = vunpack.i.l.bf16 %v4942_v20  ;;  %4956 = vrot.lane.b32.xlu0 %v6682_v38, %s5290_s25  ;;  %3916 = vmatpush.msra.mxu1 %v4939_v63  ;;  %v4944_v27 = vunpack.i.h.bf16 %v4942_v20 }
0x11b9   :  { %4189 = vmatpush.msrb.mxu1 %v4943_v58 }
0x11bb   :  { %4190 = vmatpush.msrb.mxu1 %v4944_v27  ;;  %4097 = vadd.xlane.f32.xlu2 %v4096_v1 }
0x11bd   :  { %4191 = vmatpush.msrb.mxu1 %v4948_v21 }
0x11be   :  { %v4952_v23 = vpop.permute.xlu1 %4951 }
0x11bf   :  { %v4953_v32 = vunpack.i.l.bf16 %v4952_v23  ;;  %4192 = vmatpush.msrb.mxu1 %v4949_v24  ;;  %v4954_v9 = vunpack.i.h.bf16 %v4952_v23 }
0x11c1   :  { %4230 = vmatpush.msrb.mxu3 %v4953_v32 }
0x11c3   :  { %4231 = vmatpush.msrb.mxu3 %v4954_v9 }
0x120e   :  { %v3778_v38 = vpop.xlane.xlu2 %3777 }
0x120f   :  { %5201 = vrcp.f32 %v3778_v38  ;;  %v3823_v46 = vand.u32 2147483648, %v3778_v38  ;;  %v3821_v50 = vand.u32 2147483647, %v3778_v38  ;;  %vm3817_vm13 = vweird.f32 %v3778_v38 }
0x1211   :  { %v3824_v39 = vor.u32 1.1754944e-38, %v3823_v46  ;;  %vm3822_vm15 = vcmp.eq.f32.partialorder %v3821_v50, 8.507059e+37 }
0x1215   :  { %v5202_v26 = vpop.eup %5201 }
0x1216   :  { %v3781_v8 = vpop.xlane.xlu0 %3780  ;;  %v3813_v29 = vmul.f32 %v5202_v26, %v3778_v38  ;;  %v4089_v3 = vpop.xlane.xlu2 %4088  ;;  %vm3818_vm10 = vweird.f32 %v5202_v26 }
0x1217   :  { %5203 = vrcp.f32 %v3781_v8  ;;  %vm3819_vm14 = vmor %vm3817_vm13, %vm3818_vm10  ;;  %v3838_v35 = vand.u32 2147483648, %v3781_v8  ;;  %v3836_v16 = vand.u32 2147483647, %v3781_v8  ;;  %vm3832_vm2 = vweird.f32 %v3781_v8 }
0x1218   :  { %5205 = vrcp.f32 %v4089_v3  ;;  %v3814_v48 = vsub.f32 1.0, %v3813_v29  ;;  %v4110_v11 = vand.u32 2147483648, %v4089_v3  ;;  %vm4104_vm6 = vweird.f32 %v4089_v3 }
0x1219   :  { %v3839_v40 = vor.u32 1.1754944e-38, %v3838_v35  ;;  %vm3837_vm4 = vcmp.eq.f32.partialorder %v3836_v16, 8.507059e+37  ;;  %v4108_v33 = vand.u32 2147483647, %v4089_v3 }
0x121a   :  { %v3815_v42 = vmul.f32 %v5202_v26, %v3814_v48  ;;  %v4111_v20 = vor.u32 1.1754944e-38, %v4110_v11 }
0x121b   :  { %vm4109_vm8 = vcmp.eq.f32.partialorder %v4108_v33, 8.507059e+37 }
0x121c   :  { %v3816_v54 = vadd.f32 %v5202_v26, %v3815_v42 }
0x121d   :  { %v5204_v4 = vpop.eup %5203 }
0x121e   :  { %v5206_v49 = vpop.eup %5205  ;;  %v3828_v12 = vmul.f32 %v5204_v4, %v3781_v8  ;;  %v3820_v37 = vsel %vm3819_vm14, %v5202_v26, %v3816_v54  ;;  %v4092_v47 = vpop.xlane.xlu2 %4091  ;;  %vm3833_vm1 = vweird.f32 %v5204_v4 }
0x121f   :  { %v4100_v10 = vmul.f32 %v5206_v49, %v4089_v3  ;;  %v3825_v0 = vsel %vm3822_vm15, %v3824_v39, %v3820_v37  ;;  %5207 = vrcp.f32 %v4092_v47  ;;  %vm3834_vm3 = vmor %vm3832_vm2, %vm3833_vm1  ;;  %vm4105_vm5 = vweird.f32 %v5206_v49 }
0x1220   :  { %v3829_v51 = vsub.f32 1.0, %v3828_v12  ;;  %v3826_v59 = vmul.f32 %v6881_v28, %v3825_v0  ;;  %vm4106_vm7 = vmor %vm4104_vm6, %vm4105_vm5  ;;  %v4125_v23 = vand.u32 2147483648, %v4092_v47  ;;  %vm4119_vm9 = vweird.f32 %v4092_v47 }
0x1221   :  { %v4101_v45 = vsub.f32 1.0, %v4100_v10  ;;  %v4123_v32 = vand.u32 2147483647, %v4092_v47 }
0x1222   :  { %v3830_v41 = vmul.f32 %v5204_v4, %v3829_v51  ;;  %4742 = vmatmul.msk.f32.vlgmr.msra.gmra.mxu1 %vm73_vm0, %v3826_v59  ;;  %v4126_v3 = vor.u32 1.1754944e-38, %v4125_v23 }
0x1223   :  { %v4102_v44 = vmul.f32 %v5206_v49, %v4101_v45  ;;  %vm4124_vm14 = vcmp.eq.f32.partialorder %v4123_v32, 8.507059e+37 }
0x1224   :  { %v3831_v43 = vadd.f32 %v5204_v4, %v3830_v41 }
0x1225   :  { %v5208_v62 = vpop.eup %5207  ;;  %v4103_v13 = vadd.f32 %v5206_v49, %v4102_v44 }
0x1226   :  { %v3835_v2 = vsel %vm3834_vm3, %v5204_v4, %v3831_v43  ;;  %v4115_v18 = vmul.f32 %v5208_v62, %v4092_v47  ;;  %v4095_v25 = vpop.xlane.xlu2 %4094  ;;  %vm4120_vm12 = vweird.f32 %v5208_v62 }
0x1227   :  { %v3840_v28 = vsel %vm3837_vm4, %v3839_v40, %v3835_v2  ;;  %5209 = vrcp.f32 %v4095_v25  ;;  %v4107_v19 = vsel %vm4106_vm7, %v5206_v49, %v4103_v13  ;;  %vm4121_vm10 = vmor %vm4119_vm9, %vm4120_vm12  ;;  %v4140_v38 = vand.u32 2147483648, %v4095_v25  ;;  %v3599_v40 = vpop.f32.mrf.mxu2  ;;  %v4301_v2 = vld [vmem:[%s7003_s8 + $0x18] sm:$0xff]  ;;  %v4300_v13 = vld [vmem:[%s7003_s8 + $0x10] sm:$0xff] }
0x1228   :  { %v4116_v53 = vsub.f32 1.0, %v4115_v18  ;;  %v3841_v7 = vmul.f32 %v6887_v61, %v3840_v28  ;;  %v4112_v27 = vsel %vm4109_vm8, %v4111_v20, %v4107_v19  ;;  %v4138_v8 = vand.u32 2147483647, %v4095_v25  ;;  %4335 = vmatpush.msra.mxu1 %v4301_v2  ;;  %v4299_v18 = vld [vmem:[%s7003_s8 + $0x8] sm:$0xff] }
0x1229   :  { %v4957_v60 = vpop.permute.xlu0 %4956  ;;  %v4113_v61 = vmul.f32 %v6885_v55, %v4112_v27  ;;  %vm4134_vm15 = vweird.f32 %v4095_v25  ;;  %v4141_v42 = vor.u32 1.1754944e-38, %v4140_v38 }
0x122a   :  { %v4958_v5 = vunpack.i.l.bf16 %v4957_v60  ;;  %v4117_v63 = vmul.f32 %v5208_v62, %v4116_v53  ;;  %4743 = vmatmul.msk.f32.gmra.mxu1 %vm73_vm0, %v3841_v7  ;;  %v4959_v58 = vunpack.i.h.bf16 %v4957_v60  ;;  %vm4139_vm2 = vcmp.eq.f32.partialorder %v4138_v8, 8.507059e+37  ;;  %v4968_v7 = vld [vmem:[%s7012_s17] ss:$0 sm:$0xff] }
0x122b   :  { %4336 = vmatpush.msra.mxu1 %v4300_v13  ;;  %v3641_v53 = vadd.f32 %v6851_v34, %v3599_v40 }
0x122c   :  { %4232 = vmatpush.msrb.mxu3 %v4958_v5  ;;  %v4118_v21 = vadd.f32 %v5208_v62, %v4117_v63 }
0x122d   :  { %v5210_v52 = vpop.eup %5209  ;;  %4337 = vmatpush.msra.mxu1 %v4299_v18 }
0x122e   :  { %4233 = vmatpush.msrb.mxu3 %v4959_v58  ;;  %v4130_v1 = vmul.f32 %v5210_v52, %v4095_v25  ;;  %v4098_v24 = vpop.xlane.xlu2 %4097  ;;  %vm4135_vm13 = vweird.f32 %v5210_v52  ;;  %v4122_v29 = vsel %vm4121_vm10, %v5208_v62, %v4118_v21  ;;  %v4298_v25 = vld [vmem:[%s7003_s8] sm:$0xff] }
0x122f   :  { %5211 = vrcp.f32 %v4098_v24  ;;  %vm4136_vm1 = vmor %vm4134_vm15, %vm4135_vm13  ;;  %v4127_v50 = vsel %vm4124_vm14, %v4126_v3, %v4122_v29  ;;  %v4155_v37 = vand.u32 2147483648, %v4098_v24  ;;  %v4153_v47 = vand.u32 2147483647, %v4098_v24  ;;  %v3602_v62 = vpop.f32.mrf.mxu2  ;;  %4338 = vmatpush.msra.mxu1 %v4298_v25 }
0x1230   :  { %v4131_v9 = vsub.f32 1.0, %v4130_v1  ;;  %v4128_v12 = vmul.f32 %v6893_v57, %v4127_v50  ;;  %vm4149_vm4 = vweird.f32 %v4098_v24  ;;  %v3037_v57 = vld [vmem:[%s7011_s16 + $0x18] sm:$0xff]  ;;  %v3644_v58 = vadd.f32 %v6853_v30, %v3602_v62  ;;  %v4303_v50 = vld [vmem:[%s7005_s10] sm:$0xff] }
0x1231   :  { %v4156_v51 = vor.u32 1.1754944e-38, %v4155_v37  ;;  %vm4154_vm6 = vcmp.eq.f32.partialorder %v4153_v47, 8.507059e+37  ;;  %4268 = vmatpush.msrb.mxu0 %v3037_v57 }
0x1232   :  { %v4132_v26 = vmul.f32 %v5210_v52, %v4131_v9  ;;  %4760 = vmatmul.msk.f32.vlgmr.msrb.gmra.mxu1 %vm73_vm0, %v4113_v61 }
0x1234   :  { %v4133_v48 = vadd.f32 %v5210_v52, %v4132_v26 }
0x1235   :  { %v5212_v46 = vpop.eup %5211 }
0x1236   :  { %v4137_v55 = vsel %vm4136_vm1, %v5210_v52, %v4133_v48  ;;  %v4145_v4 = vmul.f32 %v5212_v46, %v4098_v24  ;;  %vm4150_vm3 = vweird.f32 %v5212_v46 }
0x1237   :  { %v4142_v54 = vsel %vm4139_vm2, %v4141_v42, %v4137_v55  ;;  %vm4151_vm5 = vmor %vm4149_vm4, %vm4150_vm3  ;;  %v3605_v28 = vpop.f32.mrf.mxu2 }
0x1238   :  { %v4143_v49 = vmul.f32 %v6897_v14, %v4142_v54  ;;  %v4146_v39 = vsub.f32 1.0, %v4145_v4  ;;  %v3647_v23 = vadd.f32 %v6858_v31, %v3605_v28 }
0x123a   :  { %v4147_v10 = vmul.f32 %v5212_v46, %v4146_v39  ;;  %4761 = vmatmul.msk.f32.gmra.mxu1 %vm73_vm0, %v4128_v12  ;;  %4762 = vmatmul.msk.f32.vlgmr.msrb.gmra.mxu3 %vm73_vm0, %v4143_v49 }
0x123c   :  { %v4148_v0 = vadd.f32 %v5212_v46, %v4147_v10 }
0x123e   :  { %v4152_v59 = vsel %vm4151_vm5, %v5212_v46, %v4148_v0 }
0x123f   :  { %v4157_v35 = vsel %vm4154_vm6, %v4156_v51, %v4152_v59  ;;  %v3608_v11 = vpop.f32.mrf.mxu2 }
0x1240   :  { %v4158_v14 = vmul.f32 %v6903_v36, %v4157_v35 }
0x1242   :  { %4763 = vmatmul.msk.f32.gmra.mxu3 %vm73_vm0, %v4158_v14 }
0x1247   :  { %v3953_v33 = vpop.f32.mrf.mxu2 }
0x1248   :  { %v3965_v60 = vadd.f32 %v3953_v33, %v3641_v53 }
0x124f   :  { %v3956_v63 = vpop.f32.mrf.mxu2 }
0x1250   :  { %v3966_v27 = vadd.f32 %v3956_v63, %v3644_v58 }
0x129f   :  { %v3918_v45 = vpop.f32.mrf.mxu1 }
0x12a0   :  { %4746 = vmatmul.msk.f32.gmra.mxu2 %vm362_vm11, %v3918_v45 }
0x12a7   :  { %v3921_v41 = vpop.f32.mrf.mxu1 }
0x12a8   :  { %4747 = vmatmul.msk.f32.gmra.mxu2 %vm362_vm11, %v3921_v41 }
0x12af   :  { %v4194_v16 = vpop.f32.mrf.mxu1 }
0x12b0   :  { %4764 = vmatmul.msk.f32.vlgmr.msrb.gmra.mxu0 %vm362_vm11, %v4194_v16 }
0x12b7   :  { %v4197_v44 = vpop.f32.mrf.mxu1 }
0x12b8   :  { %4765 = vmatmul.msk.f32.gmra.mxu0 %vm362_vm11, %v4197_v44 }
0x12bd   :  { %v4235_v36 = vpop.f32.mrf.mxu3 }
0x12c0   :  { %4766 = vmatmul.msk.f32.gmra.mxu0 %vm362_vm11, %v4235_v36 }
0x12c5   :  { %v4238_v43 = vpop.f32.mrf.mxu3 }
0x12c8   :  { %4767 = vmatmul.msk.f32.gmra.mxu0 %vm362_vm11, %v4238_v43 }
0x1323   :  { %v3959_v24 = vpop.f32.mrf.mxu2 }
0x1324   :  { %v3967_v32 = vadd.f32 %v3959_v24, %v3647_v23 }
0x132b   :  { %v3962_v30 = vpop.f32.mrf.mxu2 }
0x132d   :  { %v4270_v5 = vpop.f32.mrf.mxu0 }
0x132e   :  { %v4282_v19 = vadd.f32 %v4270_v5, %v3965_v60 }
0x1330   :  { %v4290_v20 = vadd.f32 %v4968_v7, %v4282_v19 }
0x1332   :  { %v4294_v52 = vadd.f32 %v4290_v20, %v6492_v6  ;;  %v3650_v6 = vadd.f32 %v6860_v22, %v3608_v11  ;;  %v4305_v22 = vld [vmem:[%s7005_s10 + $0x10] sm:$0xff] }
0x1334   :  { %4768 = vmatmul.msk.f32.vlgmr.msra.gmra.mxu1 %vm73_vm0, %v4294_v52  ;;  %v3968_v29 = vadd.f32 %v3962_v30, %v3650_v6 }
0x1335   :  { %v4273_v21 = vpop.f32.mrf.mxu0 }
0x1336   :  { %v4283_v1 = vadd.f32 %v4273_v21, %v3966_v27 }
0x1338   :  { %v4291_v34 = vadd.f32 %v4968_v7, %v4283_v1 }
0x133a   :  { %v4295_v61 = vadd.f32 %v4291_v34, %v6497_v15  ;;  %v4306_v15 = vld [vmem:[%s7005_s10 + $0x18] sm:$0xff] }
0x133b   :  { %4459 = vmatpush.msrb.mxu2 %v4306_v15 }
0x133c   :  { %4769 = vmatmul.msk.f32.gmra.mxu1 %vm73_vm0, %v4295_v61 }
0x133d   :  { %v4276_v9 = vpop.f32.mrf.mxu0  ;;  %4460 = vmatpush.msrb.mxu2 %v4305_v22 }
0x133e   :  { %v4284_v38 = vadd.f32 %v4276_v9, %v3967_v32 }
0x1340   :  { %v4292_v26 = vadd.f32 %v4968_v7, %v4284_v38 }
0x1342   :  { %v4296_v8 = vadd.f32 %v4292_v26, %v6592_v56  ;;  %v4969_v56 = vld [vmem:[%s7004_s9] ss:$0 sm:$0xff]  ;;  %s5293_s9 = smov [#allocation4]  }
0x1344   :  { %4770 = vmatmul.msk.f32.gmra.mxu1 %vm73_vm0, %v4296_v8 }
0x1345   :  { %v4279_v3 = vpop.f32.mrf.mxu0 }
0x1346   :  { %v4285_v48 = vadd.f32 %v4279_v3, %v3968_v29 }
0x1348   :  { %v4293_v46 = vadd.f32 %v4968_v7, %v4285_v48 }
0x134a   :  { %v4297_v31 = vadd.f32 %v4293_v46, %v6597_v17  ;;  %v4304_v17 = vld [vmem:[%s7005_s10 + $0x8] sm:$0xff]  ;;  %s4497_s10 = sshll.u32 %s5293_s9, 4  ;;  %s4498_s10 = int_to_ptr.vmem [resolvable:$true] %s4497_s10 }
0x134b   :  { %4461 = vmatpush.msrb.mxu2 %v4304_v17  ;;  %4505 = dma.vmem_to_hbm [thread:$0]  %s4498_s10, 512, %s4500_s23, [#allocation5], %s5294_s4, %s5294_s4, %s5295_s2  }
0x134c   :  { %4771 = vmatmul.msk.f32.gmra.mxu1 %vm73_vm0, %v4297_v31 }
0x134d   :  { %4462 = vmatpush.msrb.mxu2 %v4303_v50  ;;  %v4970_v50 = vld [vmem:[%s7006_s11] ss:$0 sm:$0xff] }
0x13b1   :  { %v4340_v42 = vpop.f32.mrf.mxu1 }
0x13b2   :  { %v4341_v55 = vadd.f32 %v4969_v56, %v4340_v42 }
0x13b4   :  { %v4772_v4 = vmul.f32 -1.442695, %v4341_v55 }
0x13b6   :  { %5213 = vpow2.f32 %v4772_v4 }
0x13b9   :  { %v4343_v54 = vpop.f32.mrf.mxu1 }
0x13ba   :  { %v4344_v49 = vadd.f32 %v4969_v56, %v4343_v54 }
0x13bc   :  { %v5214_v39 = vpop.eup %5213  ;;  %v4773_v12 = vmul.f32 -1.442695, %v4344_v49 }
0x13bd   :  { %v4364_v37 = vadd.f32 1.0, %v5214_v39 }
0x13be   :  { %5215 = vpow2.f32 %v4773_v12 }
0x13bf   :  { %5217 = vrcp.f32 %v4364_v37  ;;  %v4379_v45 = vand.u32 2147483648, %v4364_v37  ;;  %v4377_v44 = vand.u32 2147483647, %v4364_v37  ;;  %vm4373_vm7 = vweird.f32 %v4364_v37 }
0x13c1   :  { %v4346_v10 = vpop.f32.mrf.mxu1  ;;  %v4380_v13 = vor.u32 1.1754944e-38, %v4379_v45  ;;  %vm4378_vm12 = vcmp.eq.f32.partialorder %v4377_v44, 8.507059e+37 }
0x13c2   :  { %v6970_v47 = vadd.f32 %v4969_v56, %v4346_v10 }
0x13c4   :  { %v5216_v0 = vpop.eup %5215  ;;  %v4774_v51 = vmul.f32 -1.442695, %v6970_v47 }
0x13c5   :  { %v5218_v59 = vpop.eup %5217  ;;  %v4365_v35 = vadd.f32 1.0, %v5216_v0 }
0x13c6   :  { %v4369_v14 = vmul.f32 %v5218_v59, %v4364_v37  ;;  %5219 = vpow2.f32 %v4774_v51  ;;  %vm4374_vm11 = vweird.f32 %v5218_v59 }
0x13c7   :  { %5221 = vrcp.f32 %v4365_v35  ;;  %vm4375_vm8 = vmor %vm4373_vm7, %vm4374_vm11  ;;  %v4394_v60 = vand.u32 2147483648, %v4365_v35  ;;  %v4392_v5 = vand.u32 2147483647, %v4365_v35  ;;  %vm4388_vm10 = vweird.f32 %v4365_v35 }
0x13c8   :  { %v4370_v57 = vsub.f32 1.0, %v4369_v14 }
0x13c9   :  { %v4349_v41 = vpop.f32.mrf.mxu1  ;;  %v4395_v58 = vor.u32 1.1754944e-38, %v4394_v60  ;;  %vm4393_vm14 = vcmp.eq.f32.partialorder %v4392_v5, 8.507059e+37 }
0x13ca   :  { %v4371_v16 = vmul.f32 %v5218_v59, %v4370_v57  ;;  %v6973_v36 = vadd.f32 %v4969_v56, %v4349_v41 }
0x13cc   :  { %v5220_v43 = vpop.eup %5219  ;;  %v4372_v40 = vadd.f32 %v5218_v59, %v4371_v16  ;;  %v4775_v62 = vmul.f32 -1.442695, %v6973_v36 }
0x13cd   :  { %v5222_v2 = vpop.eup %5221  ;;  %v4366_v18 = vadd.f32 1.0, %v5220_v43 }
0x13ce   :  { %v4376_v25 = vsel %vm4375_vm8, %v5218_v59, %v4372_v40  ;;  %v4384_v28 = vmul.f32 %v5222_v2, %v4365_v35  ;;  %5223 = vpow2.f32 %v4775_v62  ;;  %vm4389_vm9 = vweird.f32 %v5222_v2 }
0x13cf   :  { %v4381_v11 = vsel %vm4378_vm12, %v4380_v13, %v4376_v25  ;;  %5225 = vrcp.f32 %v4366_v18  ;;  %vm4390_vm13 = vmor %vm4388_vm10, %vm4389_vm9  ;;  %v4409_v23 = vand.u32 2147483648, %v4366_v18  ;;  %v4407_v32 = vand.u32 2147483647, %v4366_v18 }
0x13d0   :  { %v4428_v33 = vmul.f32 %v4381_v11, %v4341_v55  ;;  %v4385_v53 = vsub.f32 1.0, %v4384_v28  ;;  %vm4403_vm1 = vweird.f32 %v4366_v18 }
0x13d1   :  { %v4410_v26 = vor.u32 1.1754944e-38, %v4409_v23  ;;  %vm4408_vm3 = vcmp.eq.f32.partialorder %v4407_v32, 8.507059e+37 }
0x13d2   :  { %v4386_v7 = vmul.f32 %v5222_v2, %v4385_v53  ;;  %4776 = vmatmul.msk.f32.vlgmr.msrb.gmra.mxu2 %vm73_vm0, %v4428_v33 }
0x13d4   :  { %v5224_v19 = vpop.eup %5223  ;;  %v4387_v63 = vadd.f32 %v5222_v2, %v4386_v7 }
0x13d5   :  { %v5226_v20 = vpop.eup %5225  ;;  %v4367_v52 = vadd.f32 1.0, %v5224_v19 }
0x13d6   :  { %v4391_v27 = vsel %vm4390_vm13, %v5222_v2, %v4387_v63  ;;  %v4399_v21 = vmul.f32 %v5226_v20, %v4366_v18  ;;  %vm4404_vm15 = vweird.f32 %v5226_v20 }
0x13d7   :  { %v4396_v1 = vsel %vm4393_vm14, %v4395_v58, %v4391_v27  ;;  %5227 = vrcp.f32 %v4367_v52  ;;  %vm4405_vm2 = vmor %vm4403_vm1, %vm4404_vm15  ;;  %v4424_v48 = vand.u32 2147483648, %v4367_v52  ;;  %v4422_v31 = vand.u32 2147483647, %v4367_v52 }
0x13d8   :  { %v4429_v24 = vmul.f32 %v4396_v1, %v4344_v49  ;;  %v4400_v34 = vsub.f32 1.0, %v4399_v21  ;;  %vm4418_vm5 = vweird.f32 %v4367_v52 }
0x13d9   :  { %v4425_v22 = vor.u32 1.1754944e-38, %v4424_v48  ;;  %vm4423_vm11 = vcmp.eq.f32.partialorder %v4422_v31, 8.507059e+37 }
0x13da   :  { %v4401_v61 = vmul.f32 %v5226_v20, %v4400_v34  ;;  %4777 = vmatmul.msk.f32.gmra.mxu2 %vm73_vm0, %v4429_v24 }
0x13dc   :  { %v4402_v9 = vadd.f32 %v5226_v20, %v4401_v61 }
0x13dd   :  { %v5228_v38 = vpop.eup %5227 }
0x13de   :  { %v4406_v30 = vsel %vm4405_vm2, %v5226_v20, %v4402_v9  ;;  %v4414_v6 = vmul.f32 %v5228_v38, %v4367_v52  ;;  %vm4419_vm4 = vweird.f32 %v5228_v38 }
0x13df   :  { %v4411_v8 = vsel %vm4408_vm3, %v4410_v26, %v4406_v30  ;;  %vm4420_vm6 = vmor %vm4418_vm5, %vm4419_vm4 }
0x13e0   :  { %v4430_v29 = vmul.f32 %v4411_v8, %v6970_v47  ;;  %v4415_v3 = vsub.f32 1.0, %v4414_v6 }
0x13e2   :  { %v4416_v46 = vmul.f32 %v5228_v38, %v4415_v3  ;;  %4778 = vmatmul.msk.f32.gmra.mxu2 %vm73_vm0, %v4430_v29 }
0x13e4   :  { %v4417_v15 = vadd.f32 %v5228_v38, %v4416_v46 }
0x13e6   :  { %v4421_v56 = vsel %vm4420_vm6, %v5228_v38, %v4417_v15 }
0x13e7   :  { %v4426_v17 = vsel %vm4423_vm11, %v4425_v22, %v4421_v56 }
0x13e8   :  { %v4431_v42 = vmul.f32 %v4426_v17, %v6973_v36 }
0x13ea   :  { %4779 = vmatmul.msk.f32.gmra.mxu2 %vm73_vm0, %v4431_v42 }
0x1455   :  { %v4464_v55 = vpop.f32.mrf.mxu2 }
0x1456   :  { %v4465_v4 = vadd.f32 %v4970_v50, %v4464_v55 }
0x1458   :  { %4476 = vst.msk [vmem:[#allocation2] sm:$0xff] %vm73_vm0, %v4465_v4 }
0x145d   :  { %v4467_v54 = vpop.f32.mrf.mxu2 }
0x145e   :  { %v4468_v49 = vadd.f32 %v4970_v50, %v4467_v54 }
0x1460   :  { %4477 = vst.msk [vmem:[#allocation2 + $0x8] sm:$0xff] %vm73_vm0, %v4468_v49 }
0x1465   :  { %v4470_v39 = vpop.f32.mrf.mxu2 }
0x1466   :  { %v4471_v12 = vadd.f32 %v4970_v50, %v4470_v39 }
0x1468   :  { %4478 = vst.msk [vmem:[#allocation2 + $0x10] sm:$0xff] %vm73_vm0, %v4471_v12 }
0x146d   :  { %v4473_v37 = vpop.f32.mrf.mxu2 }
0x146e   :  { %v4474_v10 = vadd.f32 %v4970_v50, %v4473_v37 }
0x1470   :  { %4479 = vst.msk [vmem:[#allocation2 + $0x18] sm:$0xff] %vm73_vm0, %v4474_v10 }
0x1471   :  { %4492 = dma.vmem_to_hbm [thread:$0]  %s4485_s22, 512, %s4487_s3, [#allocation3], %s5294_s4, %s5294_s4, %s5295_s2  }
0x1472   :  { %5277 = dma.done.wait [#allocation3], 512  }
0x1473   :  { %5278 = vsyncadd [#allocation3], 4294966784 }
0x1474   :  { %5279 = dma.done.wait [#allocation5], 512  }
0x1475   :  { %5280 = vsyncadd [#allocation5], 4294966784 }
0x1476   :  { %4514 = vsyncpa [#allocation3], 1 }
0x1477   :  { %4515 = vsyncpa [#allocation5], 1 }

</bundles_post_ra>
